<compile_context>
chip_gen: v6e
topology: v6e:2x2x1
jax: 0.10.0
libtpu: 0.0.40
codegen_flags: <defaults>
</compile_context>

<pallas_src>
import functools

import numpy as np
import jax
import jax.numpy as jnp
from jax.experimental import pallas as pl
from jax.experimental.pallas import tpu as pltpu

GROUPS = 8      # GroupNorm groups (PyTorch default in ConvGNReLU)
EPS = 1e-5      # PyTorch GroupNorm default eps


# ----------------------------------------------------------------------------
# Pallas kernels
# ----------------------------------------------------------------------------
def conv_gn_relu_kernel(*args, num_inputs):
    """Fused 3x3 conv + GroupNorm + ReLU for one batch element.

    Layout (lane-dense, NCHW-flattened, padded):
      x_ref[i] : (3*Cin_i, Np + 2)  bf16  dy-stacked, zero-padded, flattened
                                          input; tap dx is the static lane
                                          slice [dx : dx + Np].
      w_ref[i] : (3, Cout, 3*Cin_i) bf16  w_ref[i][dx][cout, dy*Cin_i + c].
      g_ref    : (Cout, 1)          f32   GroupNorm gamma.
      b_ref    : (Cout, 1)          f32   GroupNorm beta.
      m_ref    : (Cout, Cout)       f32   group-membership mask * 1/n_per_group.
      msk_ref  : (1, Np)            f32   1.0 on interior pixels, 0 on pad ring.
      o_ref    : (Cout, Np)         bf16/f32 padded-flat NCHW output (pad ring
                                          holds don't-care values; the wrapper
                                          crops it, so no extra mask pass).
    """
    x_refs = args[:num_inputs]
    w_refs = args[num_inputs:2 * num_inputs]
    g_ref, b_ref, m_ref, msk_ref, o_ref = args[2 * num_inputs:]
    n = msk_ref.shape[1]
    cout = o_ref.shape[0]

    # 3 matmuls per input, bf16 operands straight off the refs, f32 accumulate.
    acc = jnp.zeros((cout, n), jnp.float32)
    for i in range(num_inputs):
        xr, wr = x_refs[i], w_refs[i]
        for dx in range(3):
            acc = acc + jnp.dot(wr[dx], xr[:, dx:dx + n],
                                preferred_element_type=jnp.float32)

    # GroupNorm: lane-reduce per channel first, then a tiny group-mix matvec.
    mask = msk_ref[...]                                   # (1, Np)
    ym = acc * mask
    csum = jnp.sum(ym, axis=1, keepdims=True)             # (Cout, 1)  sum y
    csq = jnp.sum(ym * acc, axis=1, keepdims=True)        # (Cout, 1)  sum y^2
    gmean = jnp.dot(m_ref[...], csum, preferred_element_type=jnp.float32)
    gmsq = jnp.dot(m_ref[...], csq, preferred_element_type=jnp.float32)
    inv = jax.lax.rsqrt(gmsq - gmean * gmean + EPS)       # EUP rsqrt
    s = inv * g_ref[...]                                  # per-channel scale
    t = b_ref[...] - gmean * s                            # per-channel shift
    o_ref[...] = jnp.maximum(acc * s + t, 0.0).astype(o_ref.dtype)


def mlp_kernel(x_ref, w1_ref, b1_ref, w2_ref, b2_ref, w3_ref, b3_ref, o_ref):
    """Bottleneck MLP: (Linear -> ReLU) x3. bf16 MXU operands, f32 accumulate."""
    h = jnp.dot(x_ref[...], w1_ref[...],
                preferred_element_type=jnp.float32) + b1_ref[...]
    h = jnp.maximum(h, 0.0)
    h = jnp.dot(h.astype(jnp.bfloat16), w2_ref[...],
                preferred_element_type=jnp.float32) + b2_ref[...]
    h = jnp.maximum(h, 0.0)
    h = jnp.dot(h.astype(jnp.bfloat16), w3_ref[...],
                preferred_element_type=jnp.float32) + b3_ref[...]
    o_ref[...] = jnp.maximum(h, 0.0)


# ----------------------------------------------------------------------------
# Wrappers (layout prep + pallas_call plumbing)
# ----------------------------------------------------------------------------
def conv_gn_relu(xs, w, gamma, beta, out_dtype=jnp.bfloat16):
    """xs: tuple of NCHW inputs whose channels concat to w's Cin (the decoder
    passes (cur, skip) so the concat never hits HBM).
    w: (Cout, sum(Cin_i), 3, 3); stride=1, pad=1, no bias. Returns NCHW."""
    B, _, H, W = xs[0].shape
    Cout = w.shape[0]
    Hp, Wp = H + 2, W + 2
    Np = Hp * Wp
    cins = [int(x.shape[1]) for x in xs]
    offs = np.concatenate([[0], np.cumsum(cins)])

    xsts, wsts, in_specs = [], [], []
    for i, x in enumerate(xs):
        ci = cins[i]
        # pad spatially (padding=1), flatten, zero-extend the flat axis, and
        # stack the three dy shifts along channels -> every 3x3 tap becomes one
        # of three static lane slices of a (3*Cin, Np+2) block inside the
        # kernel (no 9x im2col in HBM, no in-kernel concat).
        xp = jnp.pad(x, ((0, 0), (0, 0), (1, 1), (1, 1))).reshape(B, ci, Np)
        xe = jnp.pad(xp, ((0, 0), (0, 0), (Wp + 1, Wp + 1)))
        xst = jnp.concatenate(
            [xe[:, :, dy * Wp: dy * Wp + Np + 2] for dy in range(3)],
            axis=1).astype(jnp.bfloat16)                       # (B, 3*ci, Np+2)
        xsts.append(xst)
        in_specs.append(pl.BlockSpec((None, 3 * ci, Np + 2), lambda b: (b, 0, 0)))

        wi = w[:, offs[i]:offs[i] + ci, :, :]                  # (Cout, ci, 3, 3)
        wst = jnp.stack(
            [jnp.transpose(wi[:, :, :, dx], (0, 2, 1)).reshape(Cout, 3 * ci)
             for dx in range(3)], axis=0).astype(jnp.bfloat16)  # (3, Cout, 3*ci)
        wsts.append(wst)

    for ci in cins:
        in_specs.append(pl.BlockSpec((3, Cout, 3 * ci), lambda b: (0, 0, 0)))

    # Group-membership mask with 1/n_per_group folded in (host-built).
    cs = Cout // GROUPS
    n_per_group = float(H * W * cs)
    Mdiv = np.zeros((Cout, Cout), np.float32)
    for c in range(Cout):
        g = c // cs
        Mdiv[c, g * cs:(g + 1) * cs] = 1.0 / n_per_group
    Mdiv = jnp.asarray(Mdiv)

    # Interior-pixel mask over padded flattened positions.
    msk = np.zeros((Hp, Wp), np.float32)
    msk[1:H + 1, 1:W + 1] = 1.0
    msk = jnp.asarray(msk.reshape(1, Np))

    in_specs += [
        pl.BlockSpec((Cout, 1), lambda b: (0, 0)),
        pl.BlockSpec((Cout, 1), lambda b: (0, 0)),
        pl.BlockSpec((Cout, Cout), lambda b: (0, 0)),
        pl.BlockSpec((1, Np), lambda b: (0, 0)),
    ]

    # TODO(synk): beyond toy shapes, tile the flat spatial axis into the grid
    # (halo Wp+1), use a two-pass GroupNorm with a VMEM scratch accumulator,
    # and set vmem_limit_bytes explicitly (v7x 64 MiB / v5e 16 MiB scoped).
    kernel = functools.partial(conv_gn_relu_kernel, num_inputs=len(xs))
    out = pl.pallas_call(
        kernel,
        out_shape=jax.ShapeDtypeStruct((B, Cout, Np), out_dtype),
        grid=(B,),
        in_specs=in_specs,
        out_specs=pl.BlockSpec((None, Cout, Np), lambda b: (b, 0, 0)),
        compiler_params=pltpu.CompilerParams(
            dimension_semantics=("parallel",)),
    )(*xsts, *wsts,
      gamma.reshape(Cout, 1).astype(jnp.float32),
      beta.reshape(Cout, 1).astype(jnp.float32),
      Mdiv, msk)

    # Crop the pad ring (interior pixels only).
    return out.reshape(B, Cout, Hp, Wp)[:, :, 1:H + 1, 1:W + 1]


def bottleneck_mlp(x_bf16, mlp_params):
    """x: (B, D) bf16 -> (B, D) f32, three Linear+ReLU layers fused."""
    w1, b1, w2, b2, w3, b3 = mlp_params
    B, D = x_bf16.shape
    vmem = pl.BlockSpec(memory_space=pltpu.MemorySpace.VMEM)
    # TODO(synk): for large D tile the K axis with a grid + f32 scratch
    # accumulator instead of making all three weights VMEM-resident.
    return pl.pallas_call(
        mlp_kernel,
        out_shape=jax.ShapeDtypeStruct((B, D), jnp.float32),
        in_specs=[vmem] * 7,
        out_specs=vmem,
    )(x_bf16,
      w1.astype(jnp.bfloat16), b1.reshape(1, -1).astype(jnp.float32),
      w2.astype(jnp.bfloat16), b2.reshape(1, -1).astype(jnp.float32),
      w3.astype(jnp.bfloat16), b3.reshape(1, -1).astype(jnp.float32))


# TODO(synk): bilinear resize kept as tiny XLA glue fused by jit (semantics
# match F.interpolate(align_corners=False)); fusing it into the conv kernel
# prologue/epilogue is a further launch-count optimization.
def downsample_half(x):
    # bilinear scale_factor=0.5, align_corners=False == 2x2 average pooling
    B, C, H, W = x.shape
    return x.reshape(B, C, H // 2, 2, W // 2, 2).mean(axis=(3, 5))


def _up_matrix(H):
    out = 2 * H
    U = np.zeros((out, H), dtype=np.float32)
    for i in range(out):
        src = max((i + 0.5) / 2.0 - 0.5, 0.0)
        i0 = min(int(np.floor(src)), H - 1)
        i1 = min(i0 + 1, H - 1)
        f = src - i0
        U[i, i0] += 1.0 - f
        U[i, i1] += f
    return U


def upsample_double(x):
    # bilinear scale_factor=2.0, align_corners=False, as separable 1-D matrices
    B, C, H, W = x.shape
    Uh = jnp.asarray(_up_matrix(H))
    Uw = jnp.asarray(_up_matrix(W))
    return jnp.einsum('oh,bchw,pw->bcop', Uh, x, Uw)


# ----------------------------------------------------------------------------
# Parameter init (deterministic, synthetic) and forward pass
# ----------------------------------------------------------------------------
def init_unet_params(key, in_chnls, out_chnls, img_size, num_blocks=4):
    c = out_chnls
    assert num_blocks == 4
    enc_in = [in_chnls, c, 2 * c, 2 * c]
    enc_out = [c, 2 * c, 2 * c, 2 * c]
    dec_in = [4 * c, 4 * c, 4 * c, 2 * c]
    dec_out = [2 * c, 2 * c, c, c]
    fs = img_size // 2 ** (num_blocks - 1)

    keys = jax.random.split(key, 2 * num_blocks + 3)
    ki = 0
    params = {'down': [], 'up': []}
    for cin, cout in zip(enc_in, enc_out):
        w = jax.random.normal(keys[ki], (cout, cin, 3, 3), jnp.float32) / np.sqrt(9 * cin)
        ki += 1
        params['down'].append((w, jnp.ones((cout,), jnp.float32),
                               jnp.zeros((cout,), jnp.float32)))
    for cin, cout in zip(dec_in, dec_out):
        w = jax.random.normal(keys[ki], (cout, cin, 3, 3), jnp.float32) / np.sqrt(9 * cin)
        ki += 1
        params['up'].append((w, jnp.ones((cout,), jnp.float32),
                             jnp.zeros((cout,), jnp.float32)))

    D = 2 * c * fs * fs

    def lin(k, din, dout):
        kw, kb = jax.random.split(k)
        return (jax.random.normal(kw, (din, dout), jnp.float32) / np.sqrt(din),
                jax.random.normal(kb, (dout,), jnp.float32) * 0.01)

    w1, b1 = lin(keys[ki], D, 128); ki += 1
    w2, b2 = lin(keys[ki], 128, 128); ki += 1
    w3, b3 = lin(keys[ki], 128, D); ki += 1
    params['mlp'] = (w1, b1, w2, b2, w3, b3)
    return params


def unet_forward(params, x):
    B = x.shape[0]
    skips = []
    cur = x
    n_down = len(params['down'])
    for i, (w, g, b) in enumerate(params['down']):
        cur = conv_gn_relu((cur,), w, g, b, out_dtype=jnp.bfloat16)
        skips.append(cur)
        if i < n_down - 1:
            cur = downsample_half(cur)

    fs = cur.shape[-1]
    flat = cur.reshape(B, -1)                     # NCHW flatten == x.view(B,-1)
    bott = bottleneck_mlp(flat, params['mlp'])
    cur = bott.reshape(B, -1, fs, fs)

    n_up = len(params['up'])
    for i, (w, g, b) in enumerate(params['up']):
        skip = skips[len(skips) - 1 - i]
        out_dt = jnp.float32 if i == n_up - 1 else jnp.bfloat16
        # channel-concat semantics: kernel takes (cur, skip) as two inputs
        cur = conv_gn_relu((cur, skip), w, g, b, out_dtype=out_dt)
        if i < n_up - 1:
            cur = upsample_double(cur)
    return cur


if __name__ == "__main__":
    key = jax.random.PRNGKey(0)
    kparam, kx = jax.random.split(key)

    # small shapes: batch=2, in_chnls=4, out_chnls=8 (needs %8 for GroupNorm),
    # img_size=16, num_blocks=4  ->  featuremap_size=2, bottleneck dim 64
    B, in_chnls, out_chnls, img_size = 2, 4, 8, 16
    params = init_unet_params(kparam, in_chnls, out_chnls, img_size, num_blocks=4)
    x = jax.random.normal(kx, (B, in_chnls, img_size, img_size), jnp.float32)

    fwd = jax.jit(unet_forward)
    out = jax.block_until_ready(fwd(params, x))
    assert out.shape == (B, out_chnls, img_size, img_size), out.shape
    assert bool(jnp.all(jnp.isfinite(out)))
    print("KERNEL_OK")
</pallas_src>

<mosaic_0001>
module attributes {stable_mosaic.version = 11 : i64} {
  func.func @conv_gn_relu_kernel(%arg0: i32, %arg1: memref<1x12x326xbf16, #tpu.memory_space<vmem>>, %arg2: memref<3x8x12xbf16, #tpu.memory_space<vmem>>, %arg3: memref<8x1xf32, #tpu.memory_space<vmem>>, %arg4: memref<8x1xf32, #tpu.memory_space<vmem>>, %arg5: memref<8x8xf32, #tpu.memory_space<vmem>>, %arg6: memref<1x324xf32, #tpu.memory_space<vmem>>, %arg7: memref<1x8x324xbf16, #tpu.memory_space<vmem>>) attributes {dimension_semantics = [#tpu.dimension_semantics<parallel>], iteration_bounds = array<i64: 2>, scalar_prefetch = 0 : i64, scratch_operands = 0 : i64, tpu.core_type = #tpu.core_type<tc>, window_params = [{transform_indices = @transform_0, window_bounds = array<i64: 1, 12, 326>}, {pipeline_mode = #tpu.pipeline_mode<synchronous>, transform_indices = @transform_1, window_bounds = array<i64: 3, 8, 12>}, {pipeline_mode = #tpu.pipeline_mode<synchronous>, transform_indices = @transform_2, window_bounds = array<i64: 8, 1>}, {pipeline_mode = #tpu.pipeline_mode<synchronous>, transform_indices = @transform_3, window_bounds = array<i64: 8, 1>}, {pipeline_mode = #tpu.pipeline_mode<synchronous>, transform_indices = @transform_4, window_bounds = array<i64: 8, 8>}, {pipeline_mode = #tpu.pipeline_mode<synchronous>, transform_indices = @transform_5, window_bounds = array<i64: 1, 324>}, {transform_indices = @transform_6, window_bounds = array<i64: 1, 8, 324>}]} {
    %cst = arith.constant 0.000000e+00 : f32
    %0 = vector.broadcast %cst : f32 to vector<8x324xf32>
    %c0 = arith.constant 0 : index
    %c0_0 = arith.constant 0 : index
    %c0_1 = arith.constant 0 : index
    %1 = vector.load %arg2[%c0, %c0_0, %c0_1] : memref<3x8x12xbf16, #tpu.memory_space<vmem>>, vector<1x8x12xbf16>
    %2 = vector.shape_cast %1 : vector<1x8x12xbf16> to vector<8x12xbf16>
    %c0_2 = arith.constant 0 : index
    %c0_3 = arith.constant 0 : index
    %c0_4 = arith.constant 0 : index
    %3 = vector.load %arg1[%c0_2, %c0_3, %c0_4] : memref<1x12x326xbf16, #tpu.memory_space<vmem>>, vector<1x12x324xbf16>
    %4 = vector.shape_cast %3 : vector<1x12x324xbf16> to vector<12x324xbf16>
    %cst_5 = arith.constant dense<0.000000e+00> : vector<8x324xf32>
    %5 = tpu.matmul %2, %4, %cst_5 {dimension_numbers = #tpu.dot_dimension_numbers<[1], [0], [0], [1], [0, 0, 1, 1], [], []>} : vector<8x12xbf16>, vector<12x324xbf16>, vector<8x324xf32> -> vector<8x324xf32>
    %6 = arith.addf %0, %5 : vector<8x324xf32>
    %c1 = arith.constant 1 : index
    %c0_6 = arith.constant 0 : index
    %c0_7 = arith.constant 0 : index
    %7 = vector.load %arg2[%c1, %c0_6, %c0_7] : memref<3x8x12xbf16, #tpu.memory_space<vmem>>, vector<1x8x12xbf16>
    %8 = vector.shape_cast %7 : vector<1x8x12xbf16> to vector<8x12xbf16>
    %c0_8 = arith.constant 0 : index
    %c0_9 = arith.constant 0 : index
    %c1_10 = arith.constant 1 : index
    %9 = vector.load %arg1[%c0_8, %c0_9, %c1_10] : memref<1x12x326xbf16, #tpu.memory_space<vmem>>, vector<1x12x324xbf16>
    %10 = vector.shape_cast %9 : vector<1x12x324xbf16> to vector<12x324xbf16>
    %cst_11 = arith.constant dense<0.000000e+00> : vector<8x324xf32>
    %11 = tpu.matmul %8, %10, %cst_11 {dimension_numbers = #tpu.dot_dimension_numbers<[1], [0], [0], [1], [0, 0, 1, 1], [], []>} : vector<8x12xbf16>, vector<12x324xbf16>, vector<8x324xf32> -> vector<8x324xf32>
    %12 = arith.addf %6, %11 : vector<8x324xf32>
    %c2 = arith.constant 2 : index
    %c0_12 = arith.constant 0 : index
    %c0_13 = arith.constant 0 : index
    %13 = vector.load %arg2[%c2, %c0_12, %c0_13] : memref<3x8x12xbf16, #tpu.memory_space<vmem>>, vector<1x8x12xbf16>
    %14 = vector.shape_cast %13 : vector<1x8x12xbf16> to vector<8x12xbf16>
    %c0_14 = arith.constant 0 : index
    %c0_15 = arith.constant 0 : index
    %c2_16 = arith.constant 2 : index
    %15 = vector.load %arg1[%c0_14, %c0_15, %c2_16] : memref<1x12x326xbf16, #tpu.memory_space<vmem>>, vector<1x12x324xbf16>
    %16 = vector.shape_cast %15 : vector<1x12x324xbf16> to vector<12x324xbf16>
    %cst_17 = arith.constant dense<0.000000e+00> : vector<8x324xf32>
    %17 = tpu.matmul %14, %16, %cst_17 {dimension_numbers = #tpu.dot_dimension_numbers<[1], [0], [0], [1], [0, 0, 1, 1], [], []>} : vector<8x12xbf16>, vector<12x324xbf16>, vector<8x324xf32> -> vector<8x324xf32>
    %18 = arith.addf %12, %17 : vector<8x324xf32>
    %c0_18 = arith.constant 0 : index
    %c0_19 = arith.constant 0 : index
    %19 = vector.load %arg6[%c0_18, %c0_19] : memref<1x324xf32, #tpu.memory_space<vmem>>, vector<1x324xf32>
    %20 = vector.broadcast %19 : vector<1x324xf32> to vector<8x324xf32>
    %21 = arith.mulf %18, %20 : vector<8x324xf32>
    %cst_20 = arith.constant dense<0.000000e+00> : vector<8xf32>
    %22 = vector.multi_reduction <add>, %21, %cst_20 [1] : vector<8x324xf32> to vector<8xf32>
    %23 = vector.shape_cast %22 : vector<8xf32> to vector<8x1xf32>
    %24 = arith.mulf %21, %18 : vector<8x324xf32>
    %cst_21 = arith.constant dense<0.000000e+00> : vector<8xf32>
    %25 = vector.multi_reduction <add>, %24, %cst_21 [1] : vector<8x324xf32> to vector<8xf32>
    %26 = vector.shape_cast %25 : vector<8xf32> to vector<8x1xf32>
    %c0_22 = arith.constant 0 : index
    %c0_23 = arith.constant 0 : index
    %27 = vector.load %arg5[%c0_22, %c0_23] : memref<8x8xf32, #tpu.memory_space<vmem>>, vector<8x8xf32>
    %cst_24 = arith.constant dense<0.000000e+00> : vector<8x1xf32>
    %28 = tpu.matmul %27, %23, %cst_24 {dimension_numbers = #tpu.dot_dimension_numbers<[1], [0], [0], [1], [0, 0, 1, 1], [], []>} : vector<8x8xf32>, vector<8x1xf32>, vector<8x1xf32> -> vector<8x1xf32>
    %c0_25 = arith.constant 0 : index
    %c0_26 = arith.constant 0 : index
    %29 = vector.load %arg5[%c0_25, %c0_26] : memref<8x8xf32, #tpu.memory_space<vmem>>, vector<8x8xf32>
    %cst_27 = arith.constant dense<0.000000e+00> : vector<8x1xf32>
    %30 = tpu.matmul %29, %26, %cst_27 {dimension_numbers = #tpu.dot_dimension_numbers<[1], [0], [0], [1], [0, 0, 1, 1], [], []>} : vector<8x8xf32>, vector<8x1xf32>, vector<8x1xf32> -> vector<8x1xf32>
    %31 = arith.mulf %28, %28 : vector<8x1xf32>
    %32 = arith.subf %30, %31 : vector<8x1xf32>
    %cst_28 = arith.constant 9.99999974E-6 : f32
    %33 = vector.broadcast %cst_28 : f32 to vector<8x1xf32>
    %34 = arith.addf %32, %33 : vector<8x1xf32>
    %35 = math.rsqrt %34 : vector<8x1xf32>
    %c0_29 = arith.constant 0 : index
    %c0_30 = arith.constant 0 : index
    %36 = vector.load %arg3[%c0_29, %c0_30] : memref<8x1xf32, #tpu.memory_space<vmem>>, vector<8x1xf32>
    %37 = arith.mulf %35, %36 : vector<8x1xf32>
    %c0_31 = arith.constant 0 : index
    %c0_32 = arith.constant 0 : index
    %38 = vector.load %arg4[%c0_31, %c0_32] : memref<8x1xf32, #tpu.memory_space<vmem>>, vector<8x1xf32>
    %39 = arith.mulf %28, %37 : vector<8x1xf32>
    %40 = arith.subf %38, %39 : vector<8x1xf32>
    %41 = vector.broadcast %37 : vector<8x1xf32> to vector<8x324xf32>
    %42 = arith.mulf %18, %41 : vector<8x324xf32>
    %43 = vector.broadcast %40 : vector<8x1xf32> to vector<8x324xf32>
    %44 = arith.addf %42, %43 : vector<8x324xf32>
    %cst_33 = arith.constant 0.000000e+00 : f32
    %45 = vector.broadcast %cst_33 : f32 to vector<8x324xf32>
    %46 = arith.maximumf %44, %45 : vector<8x324xf32>
    %47 = arith.truncf %46 : vector<8x324xf32> to vector<8x324xbf16>
    %c0_34 = arith.constant 0 : index
    %c0_35 = arith.constant 0 : index
    %c0_36 = arith.constant 0 : index
    %48 = vector.load %arg7[%c0_34, %c0_35, %c0_36] : memref<1x8x324xbf16, #tpu.memory_space<vmem>>, vector<1x8x324xbf16>
    %49 = vector.shape_cast %48 : vector<1x8x324xbf16> to vector<8x324xbf16>
    %50 = vector.shape_cast %47 : vector<8x324xbf16> to vector<1x8x324xbf16>
    tpu.vector_store %arg7[%c0_34, %c0_35, %c0_36], %50 {strides = array<i32>} : memref<1x8x324xbf16, #tpu.memory_space<vmem>>, vector<1x8x324xbf16>,
    return
  }
  func.func @transform_0(%arg0: i32) -> (i32, i32, i32) {
    %c0_i32 = arith.constant 0 : i32
    %c0_i32_0 = arith.constant 0 : i32
    %c0_i32_1 = arith.constant 0 : i32
    return %arg0, %c0_i32, %c0_i32_0 : i32, i32, i32
  }
  func.func @transform_1(%arg0: i32) -> (i32, i32, i32) {
    %c0_i32 = arith.constant 0 : i32
    %c0_i32_0 = arith.constant 0 : i32
    %c0_i32_1 = arith.constant 0 : i32
    %c0_i32_2 = arith.constant 0 : i32
    return %c0_i32, %c0_i32_0, %c0_i32_1 : i32, i32, i32
  }
  func.func @transform_2(%arg0: i32) -> (i32, i32) {
    %c0_i32 = arith.constant 0 : i32
    %c0_i32_0 = arith.constant 0 : i32
    %c0_i32_1 = arith.constant 0 : i32
    return %c0_i32, %c0_i32_0 : i32, i32
  }
  func.func @transform_3(%arg0: i32) -> (i32, i32) {
    %c0_i32 = arith.constant 0 : i32
    %c0_i32_0 = arith.constant 0 : i32
    %c0_i32_1 = arith.constant 0 : i32
    return %c0_i32, %c0_i32_0 : i32, i32
  }
  func.func @transform_4(%arg0: i32) -> (i32, i32) {
    %c0_i32 = arith.constant 0 : i32
    %c0_i32_0 = arith.constant 0 : i32
    %c0_i32_1 = arith.constant 0 : i32
    return %c0_i32, %c0_i32_0 : i32, i32
  }
  func.func @transform_5(%arg0: i32) -> (i32, i32) {
    %c0_i32 = arith.constant 0 : i32
    %c0_i32_0 = arith.constant 0 : i32
    %c0_i32_1 = arith.constant 0 : i32
    return %c0_i32, %c0_i32_0 : i32, i32
  }
  func.func @transform_6(%arg0: i32) -> (i32, i32, i32) {
    %c0_i32 = arith.constant 0 : i32
    %c0_i32_0 = arith.constant 0 : i32
    %c0_i32_1 = arith.constant 0 : i32
    return %arg0, %c0_i32, %c0_i32_0 : i32, i32, i32
  }
}

module attributes {stable_mosaic.version = 11 : i64} {
  func.func @conv_gn_relu_kernel(%arg0: i32, %arg1: memref<1x24x102xbf16, #tpu.memory_space<vmem>>, %arg2: memref<3x16x24xbf16, #tpu.memory_space<vmem>>, %arg3: memref<16x1xf32, #tpu.memory_space<vmem>>, %arg4: memref<16x1xf32, #tpu.memory_space<vmem>>, %arg5: memref<16x16xf32, #tpu.memory_space<vmem>>, %arg6: memref<1x100xf32, #tpu.memory_space<vmem>>, %arg7: memref<1x16x100xbf16, #tpu.memory_space<vmem>>) attributes {dimension_semantics = [#tpu.dimension_semantics<parallel>], iteration_bounds = array<i64: 2>, scalar_prefetch = 0 : i64, scratch_operands = 0 : i64, tpu.core_type = #tpu.core_type<tc>, window_params = [{transform_indices = @transform_0, window_bounds = array<i64: 1, 24, 102>}, {pipeline_mode = #tpu.pipeline_mode<synchronous>, transform_indices = @transform_1, window_bounds = array<i64: 3, 16, 24>}, {pipeline_mode = #tpu.pipeline_mode<synchronous>, transform_indices = @transform_2, window_bounds = array<i64: 16, 1>}, {pipeline_mode = #tpu.pipeline_mode<synchronous>, transform_indices = @transform_3, window_bounds = array<i64: 16, 1>}, {pipeline_mode = #tpu.pipeline_mode<synchronous>, transform_indices = @transform_4, window_bounds = array<i64: 16, 16>}, {pipeline_mode = #tpu.pipeline_mode<synchronous>, transform_indices = @transform_5, window_bounds = array<i64: 1, 100>}, {transform_indices = @transform_6, window_bounds = array<i64: 1, 16, 100>}]} {
    %cst = arith.constant 0.000000e+00 : f32
    %0 = vector.broadcast %cst : f32 to vector<16x100xf32>
    %c0 = arith.constant 0 : index
    %c0_0 = arith.constant 0 : index
    %c0_1 = arith.constant 0 : index
    %1 = vector.load %arg2[%c0, %c0_0, %c0_1] : memref<3x16x24xbf16, #tpu.memory_space<vmem>>, vector<1x16x24xbf16>
    %2 = vector.shape_cast %1 : vector<1x16x24xbf16> to vector<16x24xbf16>
    %c0_2 = arith.constant 0 : index
    %c0_3 = arith.constant 0 : index
    %c0_4 = arith.constant 0 : index
    %3 = vector.load %arg1[%c0_2, %c0_3, %c0_4] : memref<1x24x102xbf16, #tpu.memory_space<vmem>>, vector<1x24x100xbf16>
    %4 = vector.shape_cast %3 : vector<1x24x100xbf16> to vector<24x100xbf16>
    %cst_5 = arith.constant dense<0.000000e+00> : vector<16x100xf32>
    %5 = tpu.matmul %2, %4, %cst_5 {dimension_numbers = #tpu.dot_dimension_numbers<[1], [0], [0], [1], [0, 0, 1, 1], [], []>} : vector<16x24xbf16>, vector<24x100xbf16>, vector<16x100xf32> -> vector<16x100xf32>
    %6 = arith.addf %0, %5 : vector<16x100xf32>
    %c1 = arith.constant 1 : index
    %c0_6 = arith.constant 0 : index
    %c0_7 = arith.constant 0 : index
    %7 = vector.load %arg2[%c1, %c0_6, %c0_7] : memref<3x16x24xbf16, #tpu.memory_space<vmem>>, vector<1x16x24xbf16>
    %8 = vector.shape_cast %7 : vector<1x16x24xbf16> to vector<16x24xbf16>
    %c0_8 = arith.constant 0 : index
    %c0_9 = arith.constant 0 : index
    %c1_10 = arith.constant 1 : index
    %9 = vector.load %arg1[%c0_8, %c0_9, %c1_10] : memref<1x24x102xbf16, #tpu.memory_space<vmem>>, vector<1x24x100xbf16>
    %10 = vector.shape_cast %9 : vector<1x24x100xbf16> to vector<24x100xbf16>
    %cst_11 = arith.constant dense<0.000000e+00> : vector<16x100xf32>
    %11 = tpu.matmul %8, %10, %cst_11 {dimension_numbers = #tpu.dot_dimension_numbers<[1], [0], [0], [1], [0, 0, 1, 1], [], []>} : vector<16x24xbf16>, vector<24x100xbf16>, vector<16x100xf32> -> vector<16x100xf32>
    %12 = arith.addf %6, %11 : vector<16x100xf32>
    %c2 = arith.constant 2 : index
    %c0_12 = arith.constant 0 : index
    %c0_13 = arith.constant 0 : index
    %13 = vector.load %arg2[%c2, %c0_12, %c0_13] : memref<3x16x24xbf16, #tpu.memory_space<vmem>>, vector<1x16x24xbf16>
    %14 = vector.shape_cast %13 : vector<1x16x24xbf16> to vector<16x24xbf16>
    %c0_14 = arith.constant 0 : index
    %c0_15 = arith.constant 0 : index
    %c2_16 = arith.constant 2 : index
    %15 = vector.load %arg1[%c0_14, %c0_15, %c2_16] : memref<1x24x102xbf16, #tpu.memory_space<vmem>>, vector<1x24x100xbf16>
    %16 = vector.shape_cast %15 : vector<1x24x100xbf16> to vector<24x100xbf16>
    %cst_17 = arith.constant dense<0.000000e+00> : vector<16x100xf32>
    %17 = tpu.matmul %14, %16, %cst_17 {dimension_numbers = #tpu.dot_dimension_numbers<[1], [0], [0], [1], [0, 0, 1, 1], [], []>} : vector<16x24xbf16>, vector<24x100xbf16>, vector<16x100xf32> -> vector<16x100xf32>
    %18 = arith.addf %12, %17 : vector<16x100xf32>
    %c0_18 = arith.constant 0 : index
    %c0_19 = arith.constant 0 : index
    %19 = vector.load %arg6[%c0_18, %c0_19] : memref<1x100xf32, #tpu.memory_space<vmem>>, vector<1x100xf32>
    %20 = vector.broadcast %19 : vector<1x100xf32> to vector<16x100xf32>
    %21 = arith.mulf %18, %20 : vector<16x100xf32>
    %cst_20 = arith.constant dense<0.000000e+00> : vector<16xf32>
    %22 = vector.multi_reduction <add>, %21, %cst_20 [1] : vector<16x100xf32> to vector<16xf32>
    %23 = vector.shape_cast %22 : vector<16xf32> to vector<16x1xf32>
    %24 = arith.mulf %21, %18 : vector<16x100xf32>
    %cst_21 = arith.constant dense<0.000000e+00> : vector<16xf32>
    %25 = vector.multi_reduction <add>, %24, %cst_21 [1] : vector<16x100xf32> to vector<16xf32>
    %26 = vector.shape_cast %25 : vector<16xf32> to vector<16x1xf32>
    %c0_22 = arith.constant 0 : index
    %c0_23 = arith.constant 0 : index
    %27 = vector.load %arg5[%c0_22, %c0_23] : memref<16x16xf32, #tpu.memory_space<vmem>>, vector<16x16xf32>
    %cst_24 = arith.constant dense<0.000000e+00> : vector<16x1xf32>
    %28 = tpu.matmul %27, %23, %cst_24 {dimension_numbers = #tpu.dot_dimension_numbers<[1], [0], [0], [1], [0, 0, 1, 1], [], []>} : vector<16x16xf32>, vector<16x1xf32>, vector<16x1xf32> -> vector<16x1xf32>
    %c0_25 = arith.constant 0 : index
    %c0_26 = arith.constant 0 : index
    %29 = vector.load %arg5[%c0_25, %c0_26] : memref<16x16xf32, #tpu.memory_space<vmem>>, vector<16x16xf32>
    %cst_27 = arith.constant dense<0.000000e+00> : vector<16x1xf32>
    %30 = tpu.matmul %29, %26, %cst_27 {dimension_numbers = #tpu.dot_dimension_numbers<[1], [0], [0], [1], [0, 0, 1, 1], [], []>} : vector<16x16xf32>, vector<16x1xf32>, vector<16x1xf32> -> vector<16x1xf32>
    %31 = arith.mulf %28, %28 : vector<16x1xf32>
    %32 = arith.subf %30, %31 : vector<16x1xf32>
    %cst_28 = arith.constant 9.99999974E-6 : f32
    %33 = vector.broadcast %cst_28 : f32 to vector<16x1xf32>
    %34 = arith.addf %32, %33 : vector<16x1xf32>
    %35 = math.rsqrt %34 : vector<16x1xf32>
    %c0_29 = arith.constant 0 : index
    %c0_30 = arith.constant 0 : index
    %36 = vector.load %arg3[%c0_29, %c0_30] : memref<16x1xf32, #tpu.memory_space<vmem>>, vector<16x1xf32>
    %37 = arith.mulf %35, %36 : vector<16x1xf32>
    %c0_31 = arith.constant 0 : index
    %c0_32 = arith.constant 0 : index
    %38 = vector.load %arg4[%c0_31, %c0_32] : memref<16x1xf32, #tpu.memory_space<vmem>>, vector<16x1xf32>
    %39 = arith.mulf %28, %37 : vector<16x1xf32>
    %40 = arith.subf %38, %39 : vector<16x1xf32>
    %41 = vector.broadcast %37 : vector<16x1xf32> to vector<16x100xf32>
    %42 = arith.mulf %18, %41 : vector<16x100xf32>
    %43 = vector.broadcast %40 : vector<16x1xf32> to vector<16x100xf32>
    %44 = arith.addf %42, %43 : vector<16x100xf32>
    %cst_33 = arith.constant 0.000000e+00 : f32
    %45 = vector.broadcast %cst_33 : f32 to vector<16x100xf32>
    %46 = arith.maximumf %44, %45 : vector<16x100xf32>
    %47 = arith.truncf %46 : vector<16x100xf32> to vector<16x100xbf16>
    %c0_34 = arith.constant 0 : index
    %c0_35 = arith.constant 0 : index
    %c0_36 = arith.constant 0 : index
    %48 = vector.load %arg7[%c0_34, %c0_35, %c0_36] : memref<1x16x100xbf16, #tpu.memory_space<vmem>>, vector<1x16x100xbf16>
    %49 = vector.shape_cast %48 : vector<1x16x100xbf16> to vector<16x100xbf16>
    %50 = vector.shape_cast %47 : vector<16x100xbf16> to vector<1x16x100xbf16>
    tpu.vector_store %arg7[%c0_34, %c0_35, %c0_36], %50 {strides = array<i32>} : memref<1x16x100xbf16, #tpu.memory_space<vmem>>, vector<1x16x100xbf16>,
    return
  }
  func.func @transform_0(%arg0: i32) -> (i32, i32, i32) {
    %c0_i32 = arith.constant 0 : i32
    %c0_i32_0 = arith.constant 0 : i32
    %c0_i32_1 = arith.constant 0 : i32
    return %arg0, %c0_i32, %c0_i32_0 : i32, i32, i32
  }
  func.func @transform_1(%arg0: i32) -> (i32, i32, i32) {
    %c0_i32 = arith.constant 0 : i32
    %c0_i32_0 = arith.constant 0 : i32
    %c0_i32_1 = arith.constant 0 : i32
    %c0_i32_2 = arith.constant 0 : i32
    return %c0_i32, %c0_i32_0, %c0_i32_1 : i32, i32, i32
  }
  func.func @transform_2(%arg0: i32) -> (i32, i32) {
    %c0_i32 = arith.constant 0 : i32
    %c0_i32_0 = arith.constant 0 : i32
    %c0_i32_1 = arith.constant 0 : i32
    return %c0_i32, %c0_i32_0 : i32, i32
  }
  func.func @transform_3(%arg0: i32) -> (i32, i32) {
    %c0_i32 = arith.constant 0 : i32
    %c0_i32_0 = arith.constant 0 : i32
    %c0_i32_1 = arith.constant 0 : i32
    return %c0_i32, %c0_i32_0 : i32, i32
  }
  func.func @transform_4(%arg0: i32) -> (i32, i32) {
    %c0_i32 = arith.constant 0 : i32
    %c0_i32_0 = arith.constant 0 : i32
    %c0_i32_1 = arith.constant 0 : i32
    return %c0_i32, %c0_i32_0 : i32, i32
  }
  func.func @transform_5(%arg0: i32) -> (i32, i32) {
    %c0_i32 = arith.constant 0 : i32
    %c0_i32_0 = arith.constant 0 : i32
    %c0_i32_1 = arith.constant 0 : i32
    return %c0_i32, %c0_i32_0 : i32, i32
  }
  func.func @transform_6(%arg0: i32) -> (i32, i32, i32) {
    %c0_i32 = arith.constant 0 : i32
    %c0_i32_0 = arith.constant 0 : i32
    %c0_i32_1 = arith.constant 0 : i32
    return %arg0, %c0_i32, %c0_i32_0 : i32, i32, i32
  }
}

module attributes {stable_mosaic.version = 11 : i64} {
  func.func @conv_gn_relu_kernel(%arg0: i32, %arg1: memref<1x48x38xbf16, #tpu.memory_space<vmem>>, %arg2: memref<3x16x48xbf16, #tpu.memory_space<vmem>>, %arg3: memref<16x1xf32, #tpu.memory_space<vmem>>, %arg4: memref<16x1xf32, #tpu.memory_space<vmem>>, %arg5: memref<16x16xf32, #tpu.memory_space<vmem>>, %arg6: memref<1x36xf32, #tpu.memory_space<vmem>>, %arg7: memref<1x16x36xbf16, #tpu.memory_space<vmem>>) attributes {dimension_semantics = [#tpu.dimension_semantics<parallel>], iteration_bounds = array<i64: 2>, scalar_prefetch = 0 : i64, scratch_operands = 0 : i64, tpu.core_type = #tpu.core_type<tc>, window_params = [{transform_indices = @transform_0, window_bounds = array<i64: 1, 48, 38>}, {pipeline_mode = #tpu.pipeline_mode<synchronous>, transform_indices = @transform_1, window_bounds = array<i64: 3, 16, 48>}, {pipeline_mode = #tpu.pipeline_mode<synchronous>, transform_indices = @transform_2, window_bounds = array<i64: 16, 1>}, {pipeline_mode = #tpu.pipeline_mode<synchronous>, transform_indices = @transform_3, window_bounds = array<i64: 16, 1>}, {pipeline_mode = #tpu.pipeline_mode<synchronous>, transform_indices = @transform_4, window_bounds = array<i64: 16, 16>}, {pipeline_mode = #tpu.pipeline_mode<synchronous>, transform_indices = @transform_5, window_bounds = array<i64: 1, 36>}, {transform_indices = @transform_6, window_bounds = array<i64: 1, 16, 36>}]} {
    %cst = arith.constant 0.000000e+00 : f32
    %0 = vector.broadcast %cst : f32 to vector<16x36xf32>
    %c0 = arith.constant 0 : index
    %c0_0 = arith.constant 0 : index
    %c0_1 = arith.constant 0 : index
    %1 = vector.load %arg2[%c0, %c0_0, %c0_1] : memref<3x16x48xbf16, #tpu.memory_space<vmem>>, vector<1x16x48xbf16>
    %2 = vector.shape_cast %1 : vector<1x16x48xbf16> to vector<16x48xbf16>
    %c0_2 = arith.constant 0 : index
    %c0_3 = arith.constant 0 : index
    %c0_4 = arith.constant 0 : index
    %3 = vector.load %arg1[%c0_2, %c0_3, %c0_4] : memref<1x48x38xbf16, #tpu.memory_space<vmem>>, vector<1x48x36xbf16>
    %4 = vector.shape_cast %3 : vector<1x48x36xbf16> to vector<48x36xbf16>
    %cst_5 = arith.constant dense<0.000000e+00> : vector<16x36xf32>
    %5 = tpu.matmul %2, %4, %cst_5 {dimension_numbers = #tpu.dot_dimension_numbers<[1], [0], [0], [1], [0, 0, 1, 1], [], []>} : vector<16x48xbf16>, vector<48x36xbf16>, vector<16x36xf32> -> vector<16x36xf32>
    %6 = arith.addf %0, %5 : vector<16x36xf32>
    %c1 = arith.constant 1 : index
    %c0_6 = arith.constant 0 : index
    %c0_7 = arith.constant 0 : index
    %7 = vector.load %arg2[%c1, %c0_6, %c0_7] : memref<3x16x48xbf16, #tpu.memory_space<vmem>>, vector<1x16x48xbf16>
    %8 = vector.shape_cast %7 : vector<1x16x48xbf16> to vector<16x48xbf16>
    %c0_8 = arith.constant 0 : index
    %c0_9 = arith.constant 0 : index
    %c1_10 = arith.constant 1 : index
    %9 = vector.load %arg1[%c0_8, %c0_9, %c1_10] : memref<1x48x38xbf16, #tpu.memory_space<vmem>>, vector<1x48x36xbf16>
    %10 = vector.shape_cast %9 : vector<1x48x36xbf16> to vector<48x36xbf16>
    %cst_11 = arith.constant dense<0.000000e+00> : vector<16x36xf32>
    %11 = tpu.matmul %8, %10, %cst_11 {dimension_numbers = #tpu.dot_dimension_numbers<[1], [0], [0], [1], [0, 0, 1, 1], [], []>} : vector<16x48xbf16>, vector<48x36xbf16>, vector<16x36xf32> -> vector<16x36xf32>
    %12 = arith.addf %6, %11 : vector<16x36xf32>
    %c2 = arith.constant 2 : index
    %c0_12 = arith.constant 0 : index
    %c0_13 = arith.constant 0 : index
    %13 = vector.load %arg2[%c2, %c0_12, %c0_13] : memref<3x16x48xbf16, #tpu.memory_space<vmem>>, vector<1x16x48xbf16>
    %14 = vector.shape_cast %13 : vector<1x16x48xbf16> to vector<16x48xbf16>
    %c0_14 = arith.constant 0 : index
    %c0_15 = arith.constant 0 : index
    %c2_16 = arith.constant 2 : index
    %15 = vector.load %arg1[%c0_14, %c0_15, %c2_16] : memref<1x48x38xbf16, #tpu.memory_space<vmem>>, vector<1x48x36xbf16>
    %16 = vector.shape_cast %15 : vector<1x48x36xbf16> to vector<48x36xbf16>
    %cst_17 = arith.constant dense<0.000000e+00> : vector<16x36xf32>
    %17 = tpu.matmul %14, %16, %cst_17 {dimension_numbers = #tpu.dot_dimension_numbers<[1], [0], [0], [1], [0, 0, 1, 1], [], []>} : vector<16x48xbf16>, vector<48x36xbf16>, vector<16x36xf32> -> vector<16x36xf32>
    %18 = arith.addf %12, %17 : vector<16x36xf32>
    %c0_18 = arith.constant 0 : index
    %c0_19 = arith.constant 0 : index
    %19 = vector.load %arg6[%c0_18, %c0_19] : memref<1x36xf32, #tpu.memory_space<vmem>>, vector<1x36xf32>
    %20 = vector.broadcast %19 : vector<1x36xf32> to vector<16x36xf32>
    %21 = arith.mulf %18, %20 : vector<16x36xf32>
    %cst_20 = arith.constant dense<0.000000e+00> : vector<16xf32>
    %22 = vector.multi_reduction <add>, %21, %cst_20 [1] : vector<16x36xf32> to vector<16xf32>
    %23 = vector.shape_cast %22 : vector<16xf32> to vector<16x1xf32>
    %24 = arith.mulf %21, %18 : vector<16x36xf32>
    %cst_21 = arith.constant dense<0.000000e+00> : vector<16xf32>
    %25 = vector.multi_reduction <add>, %24, %cst_21 [1] : vector<16x36xf32> to vector<16xf32>
    %26 = vector.shape_cast %25 : vector<16xf32> to vector<16x1xf32>
    %c0_22 = arith.constant 0 : index
    %c0_23 = arith.constant 0 : index
    %27 = vector.load %arg5[%c0_22, %c0_23] : memref<16x16xf32, #tpu.memory_space<vmem>>, vector<16x16xf32>
    %cst_24 = arith.constant dense<0.000000e+00> : vector<16x1xf32>
    %28 = tpu.matmul %27, %23, %cst_24 {dimension_numbers = #tpu.dot_dimension_numbers<[1], [0], [0], [1], [0, 0, 1, 1], [], []>} : vector<16x16xf32>, vector<16x1xf32>, vector<16x1xf32> -> vector<16x1xf32>
    %c0_25 = arith.constant 0 : index
    %c0_26 = arith.constant 0 : index
    %29 = vector.load %arg5[%c0_25, %c0_26] : memref<16x16xf32, #tpu.memory_space<vmem>>, vector<16x16xf32>
    %cst_27 = arith.constant dense<0.000000e+00> : vector<16x1xf32>
    %30 = tpu.matmul %29, %26, %cst_27 {dimension_numbers = #tpu.dot_dimension_numbers<[1], [0], [0], [1], [0, 0, 1, 1], [], []>} : vector<16x16xf32>, vector<16x1xf32>, vector<16x1xf32> -> vector<16x1xf32>
    %31 = arith.mulf %28, %28 : vector<16x1xf32>
    %32 = arith.subf %30, %31 : vector<16x1xf32>
    %cst_28 = arith.constant 9.99999974E-6 : f32
    %33 = vector.broadcast %cst_28 : f32 to vector<16x1xf32>
    %34 = arith.addf %32, %33 : vector<16x1xf32>
    %35 = math.rsqrt %34 : vector<16x1xf32>
    %c0_29 = arith.constant 0 : index
    %c0_30 = arith.constant 0 : index
    %36 = vector.load %arg3[%c0_29, %c0_30] : memref<16x1xf32, #tpu.memory_space<vmem>>, vector<16x1xf32>
    %37 = arith.mulf %35, %36 : vector<16x1xf32>
    %c0_31 = arith.constant 0 : index
    %c0_32 = arith.constant 0 : index
    %38 = vector.load %arg4[%c0_31, %c0_32] : memref<16x1xf32, #tpu.memory_space<vmem>>, vector<16x1xf32>
    %39 = arith.mulf %28, %37 : vector<16x1xf32>
    %40 = arith.subf %38, %39 : vector<16x1xf32>
    %41 = vector.broadcast %37 : vector<16x1xf32> to vector<16x36xf32>
    %42 = arith.mulf %18, %41 : vector<16x36xf32>
    %43 = vector.broadcast %40 : vector<16x1xf32> to vector<16x36xf32>
    %44 = arith.addf %42, %43 : vector<16x36xf32>
    %cst_33 = arith.constant 0.000000e+00 : f32
    %45 = vector.broadcast %cst_33 : f32 to vector<16x36xf32>
    %46 = arith.maximumf %44, %45 : vector<16x36xf32>
    %47 = arith.truncf %46 : vector<16x36xf32> to vector<16x36xbf16>
    %c0_34 = arith.constant 0 : index
    %c0_35 = arith.constant 0 : index
    %c0_36 = arith.constant 0 : index
    %48 = vector.load %arg7[%c0_34, %c0_35, %c0_36] : memref<1x16x36xbf16, #tpu.memory_space<vmem>>, vector<1x16x36xbf16>
    %49 = vector.shape_cast %48 : vector<1x16x36xbf16> to vector<16x36xbf16>
    %50 = vector.shape_cast %47 : vector<16x36xbf16> to vector<1x16x36xbf16>
    tpu.vector_store %arg7[%c0_34, %c0_35, %c0_36], %50 {strides = array<i32>} : memref<1x16x36xbf16, #tpu.memory_space<vmem>>, vector<1x16x36xbf16>,
    return
  }
  func.func @transform_0(%arg0: i32) -> (i32, i32, i32) {
    %c0_i32 = arith.constant 0 : i32
    %c0_i32_0 = arith.constant 0 : i32
    %c0_i32_1 = arith.constant 0 : i32
    return %arg0, %c0_i32, %c0_i32_0 : i32, i32, i32
  }
  func.func @transform_1(%arg0: i32) -> (i32, i32, i32) {
    %c0_i32 = arith.constant 0 : i32
    %c0_i32_0 = arith.constant 0 : i32
    %c0_i32_1 = arith.constant 0 : i32
    %c0_i32_2 = arith.constant 0 : i32
    return %c0_i32, %c0_i32_0, %c0_i32_1 : i32, i32, i32
  }
  func.func @transform_2(%arg0: i32) -> (i32, i32) {
    %c0_i32 = arith.constant 0 : i32
    %c0_i32_0 = arith.constant 0 : i32
    %c0_i32_1 = arith.constant 0 : i32
    return %c0_i32, %c0_i32_0 : i32, i32
  }
  func.func @transform_3(%arg0: i32) -> (i32, i32) {
    %c0_i32 = arith.constant 0 : i32
    %c0_i32_0 = arith.constant 0 : i32
    %c0_i32_1 = arith.constant 0 : i32
    return %c0_i32, %c0_i32_0 : i32, i32
  }
  func.func @transform_4(%arg0: i32) -> (i32, i32) {
    %c0_i32 = arith.constant 0 : i32
    %c0_i32_0 = arith.constant 0 : i32
    %c0_i32_1 = arith.constant 0 : i32
    return %c0_i32, %c0_i32_0 : i32, i32
  }
  func.func @transform_5(%arg0: i32) -> (i32, i32) {
    %c0_i32 = arith.constant 0 : i32
    %c0_i32_0 = arith.constant 0 : i32
    %c0_i32_1 = arith.constant 0 : i32
    return %c0_i32, %c0_i32_0 : i32, i32
  }
  func.func @transform_6(%arg0: i32) -> (i32, i32, i32) {
    %c0_i32 = arith.constant 0 : i32
    %c0_i32_0 = arith.constant 0 : i32
    %c0_i32_1 = arith.constant 0 : i32
    return %arg0, %c0_i32, %c0_i32_0 : i32, i32, i32
  }
}

module attributes {stable_mosaic.version = 11 : i64} {
  func.func @conv_gn_relu_kernel(%arg0: i32, %arg1: memref<1x48x18xbf16, #tpu.memory_space<vmem>>, %arg2: memref<3x16x48xbf16, #tpu.memory_space<vmem>>, %arg3: memref<16x1xf32, #tpu.memory_space<vmem>>, %arg4: memref<16x1xf32, #tpu.memory_space<vmem>>, %arg5: memref<16x16xf32, #tpu.memory_space<vmem>>, %arg6: memref<1x16xf32, #tpu.memory_space<vmem>>, %arg7: memref<1x16x16xbf16, #tpu.memory_space<vmem>>) attributes {dimension_semantics = [#tpu.dimension_semantics<parallel>], iteration_bounds = array<i64: 2>, scalar_prefetch = 0 : i64, scratch_operands = 0 : i64, tpu.core_type = #tpu.core_type<tc>, window_params = [{transform_indices = @transform_0, window_bounds = array<i64: 1, 48, 18>}, {pipeline_mode = #tpu.pipeline_mode<synchronous>, transform_indices = @transform_1, window_bounds = array<i64: 3, 16, 48>}, {pipeline_mode = #tpu.pipeline_mode<synchronous>, transform_indices = @transform_2, window_bounds = array<i64: 16, 1>}, {pipeline_mode = #tpu.pipeline_mode<synchronous>, transform_indices = @transform_3, window_bounds = array<i64: 16, 1>}, {pipeline_mode = #tpu.pipeline_mode<synchronous>, transform_indices = @transform_4, window_bounds = array<i64: 16, 16>}, {pipeline_mode = #tpu.pipeline_mode<synchronous>, transform_indices = @transform_5, window_bounds = array<i64: 1, 16>}, {transform_indices = @transform_6, window_bounds = array<i64: 1, 16, 16>}]} {
    %cst = arith.constant 0.000000e+00 : f32
    %0 = vector.broadcast %cst : f32 to vector<16x16xf32>
    %c0 = arith.constant 0 : index
    %c0_0 = arith.constant 0 : index
    %c0_1 = arith.constant 0 : index
    %1 = vector.load %arg2[%c0, %c0_0, %c0_1] : memref<3x16x48xbf16, #tpu.memory_space<vmem>>, vector<1x16x48xbf16>
    %2 = vector.shape_cast %1 : vector<1x16x48xbf16> to vector<16x48xbf16>
    %c0_2 = arith.constant 0 : index
    %c0_3 = arith.constant 0 : index
    %c0_4 = arith.constant 0 : index
    %3 = vector.load %arg1[%c0_2, %c0_3, %c0_4] : memref<1x48x18xbf16, #tpu.memory_space<vmem>>, vector<1x48x16xbf16>
    %4 = vector.shape_cast %3 : vector<1x48x16xbf16> to vector<48x16xbf16>
    %cst_5 = arith.constant dense<0.000000e+00> : vector<16x16xf32>
    %5 = tpu.matmul %2, %4, %cst_5 {dimension_numbers = #tpu.dot_dimension_numbers<[1], [0], [0], [1], [0, 0, 1, 1], [], []>} : vector<16x48xbf16>, vector<48x16xbf16>, vector<16x16xf32> -> vector<16x16xf32>
    %6 = arith.addf %0, %5 : vector<16x16xf32>
    %c1 = arith.constant 1 : index
    %c0_6 = arith.constant 0 : index
    %c0_7 = arith.constant 0 : index
    %7 = vector.load %arg2[%c1, %c0_6, %c0_7] : memref<3x16x48xbf16, #tpu.memory_space<vmem>>, vector<1x16x48xbf16>
    %8 = vector.shape_cast %7 : vector<1x16x48xbf16> to vector<16x48xbf16>
    %c0_8 = arith.constant 0 : index
    %c0_9 = arith.constant 0 : index
    %c1_10 = arith.constant 1 : index
    %9 = vector.load %arg1[%c0_8, %c0_9, %c1_10] : memref<1x48x18xbf16, #tpu.memory_space<vmem>>, vector<1x48x16xbf16>
    %10 = vector.shape_cast %9 : vector<1x48x16xbf16> to vector<48x16xbf16>
    %cst_11 = arith.constant dense<0.000000e+00> : vector<16x16xf32>
    %11 = tpu.matmul %8, %10, %cst_11 {dimension_numbers = #tpu.dot_dimension_numbers<[1], [0], [0], [1], [0, 0, 1, 1], [], []>} : vector<16x48xbf16>, vector<48x16xbf16>, vector<16x16xf32> -> vector<16x16xf32>
    %12 = arith.addf %6, %11 : vector<16x16xf32>
    %c2 = arith.constant 2 : index
    %c0_12 = arith.constant 0 : index
    %c0_13 = arith.constant 0 : index
    %13 = vector.load %arg2[%c2, %c0_12, %c0_13] : memref<3x16x48xbf16, #tpu.memory_space<vmem>>, vector<1x16x48xbf16>
    %14 = vector.shape_cast %13 : vector<1x16x48xbf16> to vector<16x48xbf16>
    %c0_14 = arith.constant 0 : index
    %c0_15 = arith.constant 0 : index
    %c2_16 = arith.constant 2 : index
    %15 = vector.load %arg1[%c0_14, %c0_15, %c2_16] : memref<1x48x18xbf16, #tpu.memory_space<vmem>>, vector<1x48x16xbf16>
    %16 = vector.shape_cast %15 : vector<1x48x16xbf16> to vector<48x16xbf16>
    %cst_17 = arith.constant dense<0.000000e+00> : vector<16x16xf32>
    %17 = tpu.matmul %14, %16, %cst_17 {dimension_numbers = #tpu.dot_dimension_numbers<[1], [0], [0], [1], [0, 0, 1, 1], [], []>} : vector<16x48xbf16>, vector<48x16xbf16>, vector<16x16xf32> -> vector<16x16xf32>
    %18 = arith.addf %12, %17 : vector<16x16xf32>
    %c0_18 = arith.constant 0 : index
    %c0_19 = arith.constant 0 : index
    %19 = vector.load %arg6[%c0_18, %c0_19] : memref<1x16xf32, #tpu.memory_space<vmem>>, vector<1x16xf32>
    %20 = vector.broadcast %19 : vector<1x16xf32> to vector<16x16xf32>
    %21 = arith.mulf %18, %20 : vector<16x16xf32>
    %cst_20 = arith.constant dense<0.000000e+00> : vector<16xf32>
    %22 = vector.multi_reduction <add>, %21, %cst_20 [1] : vector<16x16xf32> to vector<16xf32>
    %23 = vector.shape_cast %22 : vector<16xf32> to vector<16x1xf32>
    %24 = arith.mulf %21, %18 : vector<16x16xf32>
    %cst_21 = arith.constant dense<0.000000e+00> : vector<16xf32>
    %25 = vector.multi_reduction <add>, %24, %cst_21 [1] : vector<16x16xf32> to vector<16xf32>
    %26 = vector.shape_cast %25 : vector<16xf32> to vector<16x1xf32>
    %c0_22 = arith.constant 0 : index
    %c0_23 = arith.constant 0 : index
    %27 = vector.load %arg5[%c0_22, %c0_23] : memref<16x16xf32, #tpu.memory_space<vmem>>, vector<16x16xf32>
    %cst_24 = arith.constant dense<0.000000e+00> : vector<16x1xf32>
    %28 = tpu.matmul %27, %23, %cst_24 {dimension_numbers = #tpu.dot_dimension_numbers<[1], [0], [0], [1], [0, 0, 1, 1], [], []>} : vector<16x16xf32>, vector<16x1xf32>, vector<16x1xf32> -> vector<16x1xf32>
    %c0_25 = arith.constant 0 : index
    %c0_26 = arith.constant 0 : index
    %29 = vector.load %arg5[%c0_25, %c0_26] : memref<16x16xf32, #tpu.memory_space<vmem>>, vector<16x16xf32>
    %cst_27 = arith.constant dense<0.000000e+00> : vector<16x1xf32>
    %30 = tpu.matmul %29, %26, %cst_27 {dimension_numbers = #tpu.dot_dimension_numbers<[1], [0], [0], [1], [0, 0, 1, 1], [], []>} : vector<16x16xf32>, vector<16x1xf32>, vector<16x1xf32> -> vector<16x1xf32>
    %31 = arith.mulf %28, %28 : vector<16x1xf32>
    %32 = arith.subf %30, %31 : vector<16x1xf32>
    %cst_28 = arith.constant 9.99999974E-6 : f32
    %33 = vector.broadcast %cst_28 : f32 to vector<16x1xf32>
    %34 = arith.addf %32, %33 : vector<16x1xf32>
    %35 = math.rsqrt %34 : vector<16x1xf32>
    %c0_29 = arith.constant 0 : index
    %c0_30 = arith.constant 0 : index
    %36 = vector.load %arg3[%c0_29, %c0_30] : memref<16x1xf32, #tpu.memory_space<vmem>>, vector<16x1xf32>
    %37 = arith.mulf %35, %36 : vector<16x1xf32>
    %c0_31 = arith.constant 0 : index
    %c0_32 = arith.constant 0 : index
    %38 = vector.load %arg4[%c0_31, %c0_32] : memref<16x1xf32, #tpu.memory_space<vmem>>, vector<16x1xf32>
    %39 = arith.mulf %28, %37 : vector<16x1xf32>
    %40 = arith.subf %38, %39 : vector<16x1xf32>
    %41 = vector.broadcast %37 : vector<16x1xf32> to vector<16x16xf32>
    %42 = arith.mulf %18, %41 : vector<16x16xf32>
    %43 = vector.broadcast %40 : vector<16x1xf32> to vector<16x16xf32>
    %44 = arith.addf %42, %43 : vector<16x16xf32>
    %cst_33 = arith.constant 0.000000e+00 : f32
    %45 = vector.broadcast %cst_33 : f32 to vector<16x16xf32>
    %46 = arith.maximumf %44, %45 : vector<16x16xf32>
    %47 = arith.truncf %46 : vector<16x16xf32> to vector<16x16xbf16>
    %c0_34 = arith.constant 0 : index
    %c0_35 = arith.constant 0 : index
    %c0_36 = arith.constant 0 : index
    %48 = vector.load %arg7[%c0_34, %c0_35, %c0_36] : memref<1x16x16xbf16, #tpu.memory_space<vmem>>, vector<1x16x16xbf16>
    %49 = vector.shape_cast %48 : vector<1x16x16xbf16> to vector<16x16xbf16>
    %50 = vector.shape_cast %47 : vector<16x16xbf16> to vector<1x16x16xbf16>
    tpu.vector_store %arg7[%c0_34, %c0_35, %c0_36], %50 {strides = array<i32>} : memref<1x16x16xbf16, #tpu.memory_space<vmem>>, vector<1x16x16xbf16>,
    return
  }
  func.func @transform_0(%arg0: i32) -> (i32, i32, i32) {
    %c0_i32 = arith.constant 0 : i32
    %c0_i32_0 = arith.constant 0 : i32
    %c0_i32_1 = arith.constant 0 : i32
    return %arg0, %c0_i32, %c0_i32_0 : i32, i32, i32
  }
  func.func @transform_1(%arg0: i32) -> (i32, i32, i32) {
    %c0_i32 = arith.constant 0 : i32
    %c0_i32_0 = arith.constant 0 : i32
    %c0_i32_1 = arith.constant 0 : i32
    %c0_i32_2 = arith.constant 0 : i32
    return %c0_i32, %c0_i32_0, %c0_i32_1 : i32, i32, i32
  }
  func.func @transform_2(%arg0: i32) -> (i32, i32) {
    %c0_i32 = arith.constant 0 : i32
    %c0_i32_0 = arith.constant 0 : i32
    %c0_i32_1 = arith.constant 0 : i32
    return %c0_i32, %c0_i32_0 : i32, i32
  }
  func.func @transform_3(%arg0: i32) -> (i32, i32) {
    %c0_i32 = arith.constant 0 : i32
    %c0_i32_0 = arith.constant 0 : i32
    %c0_i32_1 = arith.constant 0 : i32
    return %c0_i32, %c0_i32_0 : i32, i32
  }
  func.func @transform_4(%arg0: i32) -> (i32, i32) {
    %c0_i32 = arith.constant 0 : i32
    %c0_i32_0 = arith.constant 0 : i32
    %c0_i32_1 = arith.constant 0 : i32
    return %c0_i32, %c0_i32_0 : i32, i32
  }
  func.func @transform_5(%arg0: i32) -> (i32, i32) {
    %c0_i32 = arith.constant 0 : i32
    %c0_i32_0 = arith.constant 0 : i32
    %c0_i32_1 = arith.constant 0 : i32
    return %c0_i32, %c0_i32_0 : i32, i32
  }
  func.func @transform_6(%arg0: i32) -> (i32, i32, i32) {
    %c0_i32 = arith.constant 0 : i32
    %c0_i32_0 = arith.constant 0 : i32
    %c0_i32_1 = arith.constant 0 : i32
    return %arg0, %c0_i32, %c0_i32_0 : i32, i32, i32
  }
}

module attributes {stable_mosaic.version = 11 : i64} {
  func.func @mlp_kernel(%arg0: memref<2x64xbf16, #tpu.memory_space<vmem>>, %arg1: memref<64x128xbf16, #tpu.memory_space<vmem>>, %arg2: memref<1x128xf32, #tpu.memory_space<vmem>>, %arg3: memref<128x128xbf16, #tpu.memory_space<vmem>>, %arg4: memref<1x128xf32, #tpu.memory_space<vmem>>, %arg5: memref<128x64xbf16, #tpu.memory_space<vmem>>, %arg6: memref<1x64xf32, #tpu.memory_space<vmem>>, %arg7: memref<2x64xf32, #tpu.memory_space<vmem>>) attributes {dimension_semantics = [], scalar_prefetch = 0 : i64, scratch_operands = 0 : i64, tpu.core_type = #tpu.core_type<tc>} {
    %c0 = arith.constant 0 : index
    %c0_0 = arith.constant 0 : index
    %0 = vector.load %arg0[%c0, %c0_0] : memref<2x64xbf16, #tpu.memory_space<vmem>>, vector<2x64xbf16>
    %c0_1 = arith.constant 0 : index
    %c0_2 = arith.constant 0 : index
    %1 = vector.load %arg1[%c0_1, %c0_2] : memref<64x128xbf16, #tpu.memory_space<vmem>>, vector<64x128xbf16>
    %cst = arith.constant dense<0.000000e+00> : vector<2x128xf32>
    %2 = tpu.matmul %0, %1, %cst {dimension_numbers = #tpu.dot_dimension_numbers<[1], [0], [0], [1], [0, 0, 1, 1], [], []>} : vector<2x64xbf16>, vector<64x128xbf16>, vector<2x128xf32> -> vector<2x128xf32>
    %c0_3 = arith.constant 0 : index
    %c0_4 = arith.constant 0 : index
    %3 = vector.load %arg2[%c0_3, %c0_4] : memref<1x128xf32, #tpu.memory_space<vmem>>, vector<1x128xf32>
    %4 = vector.broadcast %3 : vector<1x128xf32> to vector<2x128xf32>
    %5 = arith.addf %2, %4 : vector<2x128xf32>
    %cst_5 = arith.constant 0.000000e+00 : f32
    %6 = vector.broadcast %cst_5 : f32 to vector<2x128xf32>
    %7 = arith.maximumf %5, %6 : vector<2x128xf32>
    %8 = arith.truncf %7 : vector<2x128xf32> to vector<2x128xbf16>
    %c0_6 = arith.constant 0 : index
    %c0_7 = arith.constant 0 : index
    %9 = vector.load %arg3[%c0_6, %c0_7] : memref<128x128xbf16, #tpu.memory_space<vmem>>, vector<128x128xbf16>
    %cst_8 = arith.constant dense<0.000000e+00> : vector<2x128xf32>
    %10 = tpu.matmul %8, %9, %cst_8 {dimension_numbers = #tpu.dot_dimension_numbers<[1], [0], [0], [1], [0, 0, 1, 1], [], []>} : vector<2x128xbf16>, vector<128x128xbf16>, vector<2x128xf32> -> vector<2x128xf32>
    %c0_9 = arith.constant 0 : index
    %c0_10 = arith.constant 0 : index
    %11 = vector.load %arg4[%c0_9, %c0_10] : memref<1x128xf32, #tpu.memory_space<vmem>>, vector<1x128xf32>
    %12 = vector.broadcast %11 : vector<1x128xf32> to vector<2x128xf32>
    %13 = arith.addf %10, %12 : vector<2x128xf32>
    %cst_11 = arith.constant 0.000000e+00 : f32
    %14 = vector.broadcast %cst_11 : f32 to vector<2x128xf32>
    %15 = arith.maximumf %13, %14 : vector<2x128xf32>
    %16 = arith.truncf %15 : vector<2x128xf32> to vector<2x128xbf16>
    %c0_12 = arith.constant 0 : index
    %c0_13 = arith.constant 0 : index
    %17 = vector.load %arg5[%c0_12, %c0_13] : memref<128x64xbf16, #tpu.memory_space<vmem>>, vector<128x64xbf16>
    %cst_14 = arith.constant dense<0.000000e+00> : vector<2x64xf32>
    %18 = tpu.matmul %16, %17, %cst_14 {dimension_numbers = #tpu.dot_dimension_numbers<[1], [0], [0], [1], [0, 0, 1, 1], [], []>} : vector<2x128xbf16>, vector<128x64xbf16>, vector<2x64xf32> -> vector<2x64xf32>
    %c0_15 = arith.constant 0 : index
    %c0_16 = arith.constant 0 : index
    %19 = vector.load %arg6[%c0_15, %c0_16] : memref<1x64xf32, #tpu.memory_space<vmem>>, vector<1x64xf32>
    %20 = vector.broadcast %19 : vector<1x64xf32> to vector<2x64xf32>
    %21 = arith.addf %18, %20 : vector<2x64xf32>
    %cst_17 = arith.constant 0.000000e+00 : f32
    %22 = vector.broadcast %cst_17 : f32 to vector<2x64xf32>
    %23 = arith.maximumf %21, %22 : vector<2x64xf32>
    %c0_18 = arith.constant 0 : index
    %c0_19 = arith.constant 0 : index
    %24 = vector.load %arg7[%c0_18, %c0_19] : memref<2x64xf32, #tpu.memory_space<vmem>>, vector<2x64xf32>
    tpu.vector_store %arg7[%c0_18, %c0_19], %23 {strides = array<i32>} : memref<2x64xf32, #tpu.memory_space<vmem>>, vector<2x64xf32>,
    return
  }
}

module attributes {stable_mosaic.version = 11 : i64} {
  func.func @conv_gn_relu_kernel(%arg0: i32, %arg1: memref<1x48x18xbf16, #tpu.memory_space<vmem>>, %arg2: memref<1x48x18xbf16, #tpu.memory_space<vmem>>, %arg3: memref<3x16x48xbf16, #tpu.memory_space<vmem>>, %arg4: memref<3x16x48xbf16, #tpu.memory_space<vmem>>, %arg5: memref<16x1xf32, #tpu.memory_space<vmem>>, %arg6: memref<16x1xf32, #tpu.memory_space<vmem>>, %arg7: memref<16x16xf32, #tpu.memory_space<vmem>>, %arg8: memref<1x16xf32, #tpu.memory_space<vmem>>, %arg9: memref<1x16x16xbf16, #tpu.memory_space<vmem>>) attributes {dimension_semantics = [#tpu.dimension_semantics<parallel>], iteration_bounds = array<i64: 2>, scalar_prefetch = 0 : i64, scratch_operands = 0 : i64, tpu.core_type = #tpu.core_type<tc>, window_params = [{transform_indices = @transform_0, window_bounds = array<i64: 1, 48, 18>}, {transform_indices = @transform_1, window_bounds = array<i64: 1, 48, 18>}, {pipeline_mode = #tpu.pipeline_mode<synchronous>, transform_indices = @transform_2, window_bounds = array<i64: 3, 16, 48>}, {pipeline_mode = #tpu.pipeline_mode<synchronous>, transform_indices = @transform_3, window_bounds = array<i64: 3, 16, 48>}, {pipeline_mode = #tpu.pipeline_mode<synchronous>, transform_indices = @transform_4, window_bounds = array<i64: 16, 1>}, {pipeline_mode = #tpu.pipeline_mode<synchronous>, transform_indices = @transform_5, window_bounds = array<i64: 16, 1>}, {pipeline_mode = #tpu.pipeline_mode<synchronous>, transform_indices = @transform_6, window_bounds = array<i64: 16, 16>}, {pipeline_mode = #tpu.pipeline_mode<synchronous>, transform_indices = @transform_7, window_bounds = array<i64: 1, 16>}, {transform_indices = @transform_8, window_bounds = array<i64: 1, 16, 16>}]} {
    %cst = arith.constant 0.000000e+00 : f32
    %0 = vector.broadcast %cst : f32 to vector<16x16xf32>
    %c0 = arith.constant 0 : index
    %c0_0 = arith.constant 0 : index
    %c0_1 = arith.constant 0 : index
    %1 = vector.load %arg3[%c0, %c0_0, %c0_1] : memref<3x16x48xbf16, #tpu.memory_space<vmem>>, vector<1x16x48xbf16>
    %2 = vector.shape_cast %1 : vector<1x16x48xbf16> to vector<16x48xbf16>
    %c0_2 = arith.constant 0 : index
    %c0_3 = arith.constant 0 : index
    %c0_4 = arith.constant 0 : index
    %3 = vector.load %arg1[%c0_2, %c0_3, %c0_4] : memref<1x48x18xbf16, #tpu.memory_space<vmem>>, vector<1x48x16xbf16>
    %4 = vector.shape_cast %3 : vector<1x48x16xbf16> to vector<48x16xbf16>
    %cst_5 = arith.constant dense<0.000000e+00> : vector<16x16xf32>
    %5 = tpu.matmul %2, %4, %cst_5 {dimension_numbers = #tpu.dot_dimension_numbers<[1], [0], [0], [1], [0, 0, 1, 1], [], []>} : vector<16x48xbf16>, vector<48x16xbf16>, vector<16x16xf32> -> vector<16x16xf32>
    %6 = arith.addf %0, %5 : vector<16x16xf32>
    %c1 = arith.constant 1 : index
    %c0_6 = arith.constant 0 : index
    %c0_7 = arith.constant 0 : index
    %7 = vector.load %arg3[%c1, %c0_6, %c0_7] : memref<3x16x48xbf16, #tpu.memory_space<vmem>>, vector<1x16x48xbf16>
    %8 = vector.shape_cast %7 : vector<1x16x48xbf16> to vector<16x48xbf16>
    %c0_8 = arith.constant 0 : index
    %c0_9 = arith.constant 0 : index
    %c1_10 = arith.constant 1 : index
    %9 = vector.load %arg1[%c0_8, %c0_9, %c1_10] : memref<1x48x18xbf16, #tpu.memory_space<vmem>>, vector<1x48x16xbf16>
    %10 = vector.shape_cast %9 : vector<1x48x16xbf16> to vector<48x16xbf16>
    %cst_11 = arith.constant dense<0.000000e+00> : vector<16x16xf32>
    %11 = tpu.matmul %8, %10, %cst_11 {dimension_numbers = #tpu.dot_dimension_numbers<[1], [0], [0], [1], [0, 0, 1, 1], [], []>} : vector<16x48xbf16>, vector<48x16xbf16>, vector<16x16xf32> -> vector<16x16xf32>
    %12 = arith.addf %6, %11 : vector<16x16xf32>
    %c2 = arith.constant 2 : index
    %c0_12 = arith.constant 0 : index
    %c0_13 = arith.constant 0 : index
    %13 = vector.load %arg3[%c2, %c0_12, %c0_13] : memref<3x16x48xbf16, #tpu.memory_space<vmem>>, vector<1x16x48xbf16>
    %14 = vector.shape_cast %13 : vector<1x16x48xbf16> to vector<16x48xbf16>
    %c0_14 = arith.constant 0 : index
    %c0_15 = arith.constant 0 : index
    %c2_16 = arith.constant 2 : index
    %15 = vector.load %arg1[%c0_14, %c0_15, %c2_16] : memref<1x48x18xbf16, #tpu.memory_space<vmem>>, vector<1x48x16xbf16>
    %16 = vector.shape_cast %15 : vector<1x48x16xbf16> to vector<48x16xbf16>
    %cst_17 = arith.constant dense<0.000000e+00> : vector<16x16xf32>
    %17 = tpu.matmul %14, %16, %cst_17 {dimension_numbers = #tpu.dot_dimension_numbers<[1], [0], [0], [1], [0, 0, 1, 1], [], []>} : vector<16x48xbf16>, vector<48x16xbf16>, vector<16x16xf32> -> vector<16x16xf32>
    %18 = arith.addf %12, %17 : vector<16x16xf32>
    %c0_18 = arith.constant 0 : index
    %c0_19 = arith.constant 0 : index
    %c0_20 = arith.constant 0 : index
    %19 = vector.load %arg4[%c0_18, %c0_19, %c0_20] : memref<3x16x48xbf16, #tpu.memory_space<vmem>>, vector<1x16x48xbf16>
    %20 = vector.shape_cast %19 : vector<1x16x48xbf16> to vector<16x48xbf16>
    %c0_21 = arith.constant 0 : index
    %c0_22 = arith.constant 0 : index
    %c0_23 = arith.constant 0 : index
    %21 = vector.load %arg2[%c0_21, %c0_22, %c0_23] : memref<1x48x18xbf16, #tpu.memory_space<vmem>>, vector<1x48x16xbf16>
    %22 = vector.shape_cast %21 : vector<1x48x16xbf16> to vector<48x16xbf16>
    %cst_24 = arith.constant dense<0.000000e+00> : vector<16x16xf32>
    %23 = tpu.matmul %20, %22, %cst_24 {dimension_numbers = #tpu.dot_dimension_numbers<[1], [0], [0], [1], [0, 0, 1, 1], [], []>} : vector<16x48xbf16>, vector<48x16xbf16>, vector<16x16xf32> -> vector<16x16xf32>
    %24 = arith.addf %18, %23 : vector<16x16xf32>
    %c1_25 = arith.constant 1 : index
    %c0_26 = arith.constant 0 : index
    %c0_27 = arith.constant 0 : index
    %25 = vector.load %arg4[%c1_25, %c0_26, %c0_27] : memref<3x16x48xbf16, #tpu.memory_space<vmem>>, vector<1x16x48xbf16>
    %26 = vector.shape_cast %25 : vector<1x16x48xbf16> to vector<16x48xbf16>
    %c0_28 = arith.constant 0 : index
    %c0_29 = arith.constant 0 : index
    %c1_30 = arith.constant 1 : index
    %27 = vector.load %arg2[%c0_28, %c0_29, %c1_30] : memref<1x48x18xbf16, #tpu.memory_space<vmem>>, vector<1x48x16xbf16>
    %28 = vector.shape_cast %27 : vector<1x48x16xbf16> to vector<48x16xbf16>
    %cst_31 = arith.constant dense<0.000000e+00> : vector<16x16xf32>
    %29 = tpu.matmul %26, %28, %cst_31 {dimension_numbers = #tpu.dot_dimension_numbers<[1], [0], [0], [1], [0, 0, 1, 1], [], []>} : vector<16x48xbf16>, vector<48x16xbf16>, vector<16x16xf32> -> vector<16x16xf32>
    %30 = arith.addf %24, %29 : vector<16x16xf32>
    %c2_32 = arith.constant 2 : index
    %c0_33 = arith.constant 0 : index
    %c0_34 = arith.constant 0 : index
    %31 = vector.load %arg4[%c2_32, %c0_33, %c0_34] : memref<3x16x48xbf16, #tpu.memory_space<vmem>>, vector<1x16x48xbf16>
    %32 = vector.shape_cast %31 : vector<1x16x48xbf16> to vector<16x48xbf16>
    %c0_35 = arith.constant 0 : index
    %c0_36 = arith.constant 0 : index
    %c2_37 = arith.constant 2 : index
    %33 = vector.load %arg2[%c0_35, %c0_36, %c2_37] : memref<1x48x18xbf16, #tpu.memory_space<vmem>>, vector<1x48x16xbf16>
    %34 = vector.shape_cast %33 : vector<1x48x16xbf16> to vector<48x16xbf16>
    %cst_38 = arith.constant dense<0.000000e+00> : vector<16x16xf32>
    %35 = tpu.matmul %32, %34, %cst_38 {dimension_numbers = #tpu.dot_dimension_numbers<[1], [0], [0], [1], [0, 0, 1, 1], [], []>} : vector<16x48xbf16>, vector<48x16xbf16>, vector<16x16xf32> -> vector<16x16xf32>
    %36 = arith.addf %30, %35 : vector<16x16xf32>
    %c0_39 = arith.constant 0 : index
    %c0_40 = arith.constant 0 : index
    %37 = vector.load %arg8[%c0_39, %c0_40] : memref<1x16xf32, #tpu.memory_space<vmem>>, vector<1x16xf32>
    %38 = vector.broadcast %37 : vector<1x16xf32> to vector<16x16xf32>
    %39 = arith.mulf %36, %38 : vector<16x16xf32>
    %cst_41 = arith.constant dense<0.000000e+00> : vector<16xf32>
    %40 = vector.multi_reduction <add>, %39, %cst_41 [1] : vector<16x16xf32> to vector<16xf32>
    %41 = vector.shape_cast %40 : vector<16xf32> to vector<16x1xf32>
    %42 = arith.mulf %39, %36 : vector<16x16xf32>
    %cst_42 = arith.constant dense<0.000000e+00> : vector<16xf32>
    %43 = vector.multi_reduction <add>, %42, %cst_42 [1] : vector<16x16xf32> to vector<16xf32>
    %44 = vector.shape_cast %43 : vector<16xf32> to vector<16x1xf32>
    %c0_43 = arith.constant 0 : index
    %c0_44 = arith.constant 0 : index
    %45 = vector.load %arg7[%c0_43, %c0_44] : memref<16x16xf32, #tpu.memory_space<vmem>>, vector<16x16xf32>
    %cst_45 = arith.constant dense<0.000000e+00> : vector<16x1xf32>
    %46 = tpu.matmul %45, %41, %cst_45 {dimension_numbers = #tpu.dot_dimension_numbers<[1], [0], [0], [1], [0, 0, 1, 1], [], []>} : vector<16x16xf32>, vector<16x1xf32>, vector<16x1xf32> -> vector<16x1xf32>
    %c0_46 = arith.constant 0 : index
    %c0_47 = arith.constant 0 : index
    %47 = vector.load %arg7[%c0_46, %c0_47] : memref<16x16xf32, #tpu.memory_space<vmem>>, vector<16x16xf32>
    %cst_48 = arith.constant dense<0.000000e+00> : vector<16x1xf32>
    %48 = tpu.matmul %47, %44, %cst_48 {dimension_numbers = #tpu.dot_dimension_numbers<[1], [0], [0], [1], [0, 0, 1, 1], [], []>} : vector<16x16xf32>, vector<16x1xf32>, vector<16x1xf32> -> vector<16x1xf32>
    %49 = arith.mulf %46, %46 : vector<16x1xf32>
    %50 = arith.subf %48, %49 : vector<16x1xf32>
    %cst_49 = arith.constant 9.99999974E-6 : f32
    %51 = vector.broadcast %cst_49 : f32 to vector<16x1xf32>
    %52 = arith.addf %50, %51 : vector<16x1xf32>
    %53 = math.rsqrt %52 : vector<16x1xf32>
    %c0_50 = arith.constant 0 : index
    %c0_51 = arith.constant 0 : index
    %54 = vector.load %arg5[%c0_50, %c0_51] : memref<16x1xf32, #tpu.memory_space<vmem>>, vector<16x1xf32>
    %55 = arith.mulf %53, %54 : vector<16x1xf32>
    %c0_52 = arith.constant 0 : index
    %c0_53 = arith.constant 0 : index
    %56 = vector.load %arg6[%c0_52, %c0_53] : memref<16x1xf32, #tpu.memory_space<vmem>>, vector<16x1xf32>
    %57 = arith.mulf %46, %55 : vector<16x1xf32>
    %58 = arith.subf %56, %57 : vector<16x1xf32>
    %59 = vector.broadcast %55 : vector<16x1xf32> to vector<16x16xf32>
    %60 = arith.mulf %36, %59 : vector<16x16xf32>
    %61 = vector.broadcast %58 : vector<16x1xf32> to vector<16x16xf32>
    %62 = arith.addf %60, %61 : vector<16x16xf32>
    %cst_54 = arith.constant 0.000000e+00 : f32
    %63 = vector.broadcast %cst_54 : f32 to vector<16x16xf32>
    %64 = arith.maximumf %62, %63 : vector<16x16xf32>
    %65 = arith.truncf %64 : vector<16x16xf32> to vector<16x16xbf16>
    %c0_55 = arith.constant 0 : index
    %c0_56 = arith.constant 0 : index
    %c0_57 = arith.constant 0 : index
    %66 = vector.load %arg9[%c0_55, %c0_56, %c0_57] : memref<1x16x16xbf16, #tpu.memory_space<vmem>>, vector<1x16x16xbf16>
    %67 = vector.shape_cast %66 : vector<1x16x16xbf16> to vector<16x16xbf16>
    %68 = vector.shape_cast %65 : vector<16x16xbf16> to vector<1x16x16xbf16>
    tpu.vector_store %arg9[%c0_55, %c0_56, %c0_57], %68 {strides = array<i32>} : memref<1x16x16xbf16, #tpu.memory_space<vmem>>, vector<1x16x16xbf16>,
    return
  }
  func.func @transform_0(%arg0: i32) -> (i32, i32, i32) {
    %c0_i32 = arith.constant 0 : i32
    %c0_i32_0 = arith.constant 0 : i32
    %c0_i32_1 = arith.constant 0 : i32
    return %arg0, %c0_i32, %c0_i32_0 : i32, i32, i32
  }
  func.func @transform_1(%arg0: i32) -> (i32, i32, i32) {
    %c0_i32 = arith.constant 0 : i32
    %c0_i32_0 = arith.constant 0 : i32
    %c0_i32_1 = arith.constant 0 : i32
    return %arg0, %c0_i32, %c0_i32_0 : i32, i32, i32
  }
  func.func @transform_2(%arg0: i32) -> (i32, i32, i32) {
    %c0_i32 = arith.constant 0 : i32
    %c0_i32_0 = arith.constant 0 : i32
    %c0_i32_1 = arith.constant 0 : i32
    %c0_i32_2 = arith.constant 0 : i32
    return %c0_i32, %c0_i32_0, %c0_i32_1 : i32, i32, i32
  }
  func.func @transform_3(%arg0: i32) -> (i32, i32, i32) {
    %c0_i32 = arith.constant 0 : i32
    %c0_i32_0 = arith.constant 0 : i32
    %c0_i32_1 = arith.constant 0 : i32
    %c0_i32_2 = arith.constant 0 : i32
    return %c0_i32, %c0_i32_0, %c0_i32_1 : i32, i32, i32
  }
  func.func @transform_4(%arg0: i32) -> (i32, i32) {
    %c0_i32 = arith.constant 0 : i32
    %c0_i32_0 = arith.constant 0 : i32
    %c0_i32_1 = arith.constant 0 : i32
    return %c0_i32, %c0_i32_0 : i32, i32
  }
  func.func @transform_5(%arg0: i32) -> (i32, i32) {
    %c0_i32 = arith.constant 0 : i32
    %c0_i32_0 = arith.constant 0 : i32
    %c0_i32_1 = arith.constant 0 : i32
    return %c0_i32, %c0_i32_0 : i32, i32
  }
  func.func @transform_6(%arg0: i32) -> (i32, i32) {
    %c0_i32 = arith.constant 0 : i32
    %c0_i32_0 = arith.constant 0 : i32
    %c0_i32_1 = arith.constant 0 : i32
    return %c0_i32, %c0_i32_0 : i32, i32
  }
  func.func @transform_7(%arg0: i32) -> (i32, i32) {
    %c0_i32 = arith.constant 0 : i32
    %c0_i32_0 = arith.constant 0 : i32
    %c0_i32_1 = arith.constant 0 : i32
    return %c0_i32, %c0_i32_0 : i32, i32
  }
  func.func @transform_8(%arg0: i32) -> (i32, i32, i32) {
    %c0_i32 = arith.constant 0 : i32
    %c0_i32_0 = arith.constant 0 : i32
    %c0_i32_1 = arith.constant 0 : i32
    return %arg0, %c0_i32, %c0_i32_0 : i32, i32, i32
  }
}

module attributes {stable_mosaic.version = 11 : i64} {
  func.func @conv_gn_relu_kernel(%arg0: i32, %arg1: memref<1x48x38xbf16, #tpu.memory_space<vmem>>, %arg2: memref<1x48x38xbf16, #tpu.memory_space<vmem>>, %arg3: memref<3x16x48xbf16, #tpu.memory_space<vmem>>, %arg4: memref<3x16x48xbf16, #tpu.memory_space<vmem>>, %arg5: memref<16x1xf32, #tpu.memory_space<vmem>>, %arg6: memref<16x1xf32, #tpu.memory_space<vmem>>, %arg7: memref<16x16xf32, #tpu.memory_space<vmem>>, %arg8: memref<1x36xf32, #tpu.memory_space<vmem>>, %arg9: memref<1x16x36xbf16, #tpu.memory_space<vmem>>) attributes {dimension_semantics = [#tpu.dimension_semantics<parallel>], iteration_bounds = array<i64: 2>, scalar_prefetch = 0 : i64, scratch_operands = 0 : i64, tpu.core_type = #tpu.core_type<tc>, window_params = [{transform_indices = @transform_0, window_bounds = array<i64: 1, 48, 38>}, {transform_indices = @transform_1, window_bounds = array<i64: 1, 48, 38>}, {pipeline_mode = #tpu.pipeline_mode<synchronous>, transform_indices = @transform_2, window_bounds = array<i64: 3, 16, 48>}, {pipeline_mode = #tpu.pipeline_mode<synchronous>, transform_indices = @transform_3, window_bounds = array<i64: 3, 16, 48>}, {pipeline_mode = #tpu.pipeline_mode<synchronous>, transform_indices = @transform_4, window_bounds = array<i64: 16, 1>}, {pipeline_mode = #tpu.pipeline_mode<synchronous>, transform_indices = @transform_5, window_bounds = array<i64: 16, 1>}, {pipeline_mode = #tpu.pipeline_mode<synchronous>, transform_indices = @transform_6, window_bounds = array<i64: 16, 16>}, {pipeline_mode = #tpu.pipeline_mode<synchronous>, transform_indices = @transform_7, window_bounds = array<i64: 1, 36>}, {transform_indices = @transform_8, window_bounds = array<i64: 1, 16, 36>}]} {
    %cst = arith.constant 0.000000e+00 : f32
    %0 = vector.broadcast %cst : f32 to vector<16x36xf32>
    %c0 = arith.constant 0 : index
    %c0_0 = arith.constant 0 : index
    %c0_1 = arith.constant 0 : index
    %1 = vector.load %arg3[%c0, %c0_0, %c0_1] : memref<3x16x48xbf16, #tpu.memory_space<vmem>>, vector<1x16x48xbf16>
    %2 = vector.shape_cast %1 : vector<1x16x48xbf16> to vector<16x48xbf16>
    %c0_2 = arith.constant 0 : index
    %c0_3 = arith.constant 0 : index
    %c0_4 = arith.constant 0 : index
    %3 = vector.load %arg1[%c0_2, %c0_3, %c0_4] : memref<1x48x38xbf16, #tpu.memory_space<vmem>>, vector<1x48x36xbf16>
    %4 = vector.shape_cast %3 : vector<1x48x36xbf16> to vector<48x36xbf16>
    %cst_5 = arith.constant dense<0.000000e+00> : vector<16x36xf32>
    %5 = tpu.matmul %2, %4, %cst_5 {dimension_numbers = #tpu.dot_dimension_numbers<[1], [0], [0], [1], [0, 0, 1, 1], [], []>} : vector<16x48xbf16>, vector<48x36xbf16>, vector<16x36xf32> -> vector<16x36xf32>
    %6 = arith.addf %0, %5 : vector<16x36xf32>
    %c1 = arith.constant 1 : index
    %c0_6 = arith.constant 0 : index
    %c0_7 = arith.constant 0 : index
    %7 = vector.load %arg3[%c1, %c0_6, %c0_7] : memref<3x16x48xbf16, #tpu.memory_space<vmem>>, vector<1x16x48xbf16>
    %8 = vector.shape_cast %7 : vector<1x16x48xbf16> to vector<16x48xbf16>
    %c0_8 = arith.constant 0 : index
    %c0_9 = arith.constant 0 : index
    %c1_10 = arith.constant 1 : index
    %9 = vector.load %arg1[%c0_8, %c0_9, %c1_10] : memref<1x48x38xbf16, #tpu.memory_space<vmem>>, vector<1x48x36xbf16>
    %10 = vector.shape_cast %9 : vector<1x48x36xbf16> to vector<48x36xbf16>
    %cst_11 = arith.constant dense<0.000000e+00> : vector<16x36xf32>
    %11 = tpu.matmul %8, %10, %cst_11 {dimension_numbers = #tpu.dot_dimension_numbers<[1], [0], [0], [1], [0, 0, 1, 1], [], []>} : vector<16x48xbf16>, vector<48x36xbf16>, vector<16x36xf32> -> vector<16x36xf32>
    %12 = arith.addf %6, %11 : vector<16x36xf32>
    %c2 = arith.constant 2 : index
    %c0_12 = arith.constant 0 : index
    %c0_13 = arith.constant 0 : index
    %13 = vector.load %arg3[%c2, %c0_12, %c0_13] : memref<3x16x48xbf16, #tpu.memory_space<vmem>>, vector<1x16x48xbf16>
    %14 = vector.shape_cast %13 : vector<1x16x48xbf16> to vector<16x48xbf16>
    %c0_14 = arith.constant 0 : index
    %c0_15 = arith.constant 0 : index
    %c2_16 = arith.constant 2 : index
    %15 = vector.load %arg1[%c0_14, %c0_15, %c2_16] : memref<1x48x38xbf16, #tpu.memory_space<vmem>>, vector<1x48x36xbf16>
    %16 = vector.shape_cast %15 : vector<1x48x36xbf16> to vector<48x36xbf16>
    %cst_17 = arith.constant dense<0.000000e+00> : vector<16x36xf32>
    %17 = tpu.matmul %14, %16, %cst_17 {dimension_numbers = #tpu.dot_dimension_numbers<[1], [0], [0], [1], [0, 0, 1, 1], [], []>} : vector<16x48xbf16>, vector<48x36xbf16>, vector<16x36xf32> -> vector<16x36xf32>
    %18 = arith.addf %12, %17 : vector<16x36xf32>
    %c0_18 = arith.constant 0 : index
    %c0_19 = arith.constant 0 : index
    %c0_20 = arith.constant 0 : index
    %19 = vector.load %arg4[%c0_18, %c0_19, %c0_20] : memref<3x16x48xbf16, #tpu.memory_space<vmem>>, vector<1x16x48xbf16>
    %20 = vector.shape_cast %19 : vector<1x16x48xbf16> to vector<16x48xbf16>
    %c0_21 = arith.constant 0 : index
    %c0_22 = arith.constant 0 : index
    %c0_23 = arith.constant 0 : index
    %21 = vector.load %arg2[%c0_21, %c0_22, %c0_23] : memref<1x48x38xbf16, #tpu.memory_space<vmem>>, vector<1x48x36xbf16>
    %22 = vector.shape_cast %21 : vector<1x48x36xbf16> to vector<48x36xbf16>
    %cst_24 = arith.constant dense<0.000000e+00> : vector<16x36xf32>
    %23 = tpu.matmul %20, %22, %cst_24 {dimension_numbers = #tpu.dot_dimension_numbers<[1], [0], [0], [1], [0, 0, 1, 1], [], []>} : vector<16x48xbf16>, vector<48x36xbf16>, vector<16x36xf32> -> vector<16x36xf32>
    %24 = arith.addf %18, %23 : vector<16x36xf32>
    %c1_25 = arith.constant 1 : index
    %c0_26 = arith.constant 0 : index
    %c0_27 = arith.constant 0 : index
    %25 = vector.load %arg4[%c1_25, %c0_26, %c0_27] : memref<3x16x48xbf16, #tpu.memory_space<vmem>>, vector<1x16x48xbf16>
    %26 = vector.shape_cast %25 : vector<1x16x48xbf16> to vector<16x48xbf16>
    %c0_28 = arith.constant 0 : index
    %c0_29 = arith.constant 0 : index
    %c1_30 = arith.constant 1 : index
    %27 = vector.load %arg2[%c0_28, %c0_29, %c1_30] : memref<1x48x38xbf16, #tpu.memory_space<vmem>>, vector<1x48x36xbf16>
    %28 = vector.shape_cast %27 : vector<1x48x36xbf16> to vector<48x36xbf16>
    %cst_31 = arith.constant dense<0.000000e+00> : vector<16x36xf32>
    %29 = tpu.matmul %26, %28, %cst_31 {dimension_numbers = #tpu.dot_dimension_numbers<[1], [0], [0], [1], [0, 0, 1, 1], [], []>} : vector<16x48xbf16>, vector<48x36xbf16>, vector<16x36xf32> -> vector<16x36xf32>
    %30 = arith.addf %24, %29 : vector<16x36xf32>
    %c2_32 = arith.constant 2 : index
    %c0_33 = arith.constant 0 : index
    %c0_34 = arith.constant 0 : index
    %31 = vector.load %arg4[%c2_32, %c0_33, %c0_34] : memref<3x16x48xbf16, #tpu.memory_space<vmem>>, vector<1x16x48xbf16>
    %32 = vector.shape_cast %31 : vector<1x16x48xbf16> to vector<16x48xbf16>
    %c0_35 = arith.constant 0 : index
    %c0_36 = arith.constant 0 : index
    %c2_37 = arith.constant 2 : index
    %33 = vector.load %arg2[%c0_35, %c0_36, %c2_37] : memref<1x48x38xbf16, #tpu.memory_space<vmem>>, vector<1x48x36xbf16>
    %34 = vector.shape_cast %33 : vector<1x48x36xbf16> to vector<48x36xbf16>
    %cst_38 = arith.constant dense<0.000000e+00> : vector<16x36xf32>
    %35 = tpu.matmul %32, %34, %cst_38 {dimension_numbers = #tpu.dot_dimension_numbers<[1], [0], [0], [1], [0, 0, 1, 1], [], []>} : vector<16x48xbf16>, vector<48x36xbf16>, vector<16x36xf32> -> vector<16x36xf32>
    %36 = arith.addf %30, %35 : vector<16x36xf32>
    %c0_39 = arith.constant 0 : index
    %c0_40 = arith.constant 0 : index
    %37 = vector.load %arg8[%c0_39, %c0_40] : memref<1x36xf32, #tpu.memory_space<vmem>>, vector<1x36xf32>
    %38 = vector.broadcast %37 : vector<1x36xf32> to vector<16x36xf32>
    %39 = arith.mulf %36, %38 : vector<16x36xf32>
    %cst_41 = arith.constant dense<0.000000e+00> : vector<16xf32>
    %40 = vector.multi_reduction <add>, %39, %cst_41 [1] : vector<16x36xf32> to vector<16xf32>
    %41 = vector.shape_cast %40 : vector<16xf32> to vector<16x1xf32>
    %42 = arith.mulf %39, %36 : vector<16x36xf32>
    %cst_42 = arith.constant dense<0.000000e+00> : vector<16xf32>
    %43 = vector.multi_reduction <add>, %42, %cst_42 [1] : vector<16x36xf32> to vector<16xf32>
    %44 = vector.shape_cast %43 : vector<16xf32> to vector<16x1xf32>
    %c0_43 = arith.constant 0 : index
    %c0_44 = arith.constant 0 : index
    %45 = vector.load %arg7[%c0_43, %c0_44] : memref<16x16xf32, #tpu.memory_space<vmem>>, vector<16x16xf32>
    %cst_45 = arith.constant dense<0.000000e+00> : vector<16x1xf32>
    %46 = tpu.matmul %45, %41, %cst_45 {dimension_numbers = #tpu.dot_dimension_numbers<[1], [0], [0], [1], [0, 0, 1, 1], [], []>} : vector<16x16xf32>, vector<16x1xf32>, vector<16x1xf32> -> vector<16x1xf32>
    %c0_46 = arith.constant 0 : index
    %c0_47 = arith.constant 0 : index
    %47 = vector.load %arg7[%c0_46, %c0_47] : memref<16x16xf32, #tpu.memory_space<vmem>>, vector<16x16xf32>
    %cst_48 = arith.constant dense<0.000000e+00> : vector<16x1xf32>
    %48 = tpu.matmul %47, %44, %cst_48 {dimension_numbers = #tpu.dot_dimension_numbers<[1], [0], [0], [1], [0, 0, 1, 1], [], []>} : vector<16x16xf32>, vector<16x1xf32>, vector<16x1xf32> -> vector<16x1xf32>
    %49 = arith.mulf %46, %46 : vector<16x1xf32>
    %50 = arith.subf %48, %49 : vector<16x1xf32>
    %cst_49 = arith.constant 9.99999974E-6 : f32
    %51 = vector.broadcast %cst_49 : f32 to vector<16x1xf32>
    %52 = arith.addf %50, %51 : vector<16x1xf32>
    %53 = math.rsqrt %52 : vector<16x1xf32>
    %c0_50 = arith.constant 0 : index
    %c0_51 = arith.constant 0 : index
    %54 = vector.load %arg5[%c0_50, %c0_51] : memref<16x1xf32, #tpu.memory_space<vmem>>, vector<16x1xf32>
    %55 = arith.mulf %53, %54 : vector<16x1xf32>
    %c0_52 = arith.constant 0 : index
    %c0_53 = arith.constant 0 : index
    %56 = vector.load %arg6[%c0_52, %c0_53] : memref<16x1xf32, #tpu.memory_space<vmem>>, vector<16x1xf32>
    %57 = arith.mulf %46, %55 : vector<16x1xf32>
    %58 = arith.subf %56, %57 : vector<16x1xf32>
    %59 = vector.broadcast %55 : vector<16x1xf32> to vector<16x36xf32>
    %60 = arith.mulf %36, %59 : vector<16x36xf32>
    %61 = vector.broadcast %58 : vector<16x1xf32> to vector<16x36xf32>
    %62 = arith.addf %60, %61 : vector<16x36xf32>
    %cst_54 = arith.constant 0.000000e+00 : f32
    %63 = vector.broadcast %cst_54 : f32 to vector<16x36xf32>
    %64 = arith.maximumf %62, %63 : vector<16x36xf32>
    %65 = arith.truncf %64 : vector<16x36xf32> to vector<16x36xbf16>
    %c0_55 = arith.constant 0 : index
    %c0_56 = arith.constant 0 : index
    %c0_57 = arith.constant 0 : index
    %66 = vector.load %arg9[%c0_55, %c0_56, %c0_57] : memref<1x16x36xbf16, #tpu.memory_space<vmem>>, vector<1x16x36xbf16>
    %67 = vector.shape_cast %66 : vector<1x16x36xbf16> to vector<16x36xbf16>
    %68 = vector.shape_cast %65 : vector<16x36xbf16> to vector<1x16x36xbf16>
    tpu.vector_store %arg9[%c0_55, %c0_56, %c0_57], %68 {strides = array<i32>} : memref<1x16x36xbf16, #tpu.memory_space<vmem>>, vector<1x16x36xbf16>,
    return
  }
  func.func @transform_0(%arg0: i32) -> (i32, i32, i32) {
    %c0_i32 = arith.constant 0 : i32
    %c0_i32_0 = arith.constant 0 : i32
    %c0_i32_1 = arith.constant 0 : i32
    return %arg0, %c0_i32, %c0_i32_0 : i32, i32, i32
  }
  func.func @transform_1(%arg0: i32) -> (i32, i32, i32) {
    %c0_i32 = arith.constant 0 : i32
    %c0_i32_0 = arith.constant 0 : i32
    %c0_i32_1 = arith.constant 0 : i32
    return %arg0, %c0_i32, %c0_i32_0 : i32, i32, i32
  }
  func.func @transform_2(%arg0: i32) -> (i32, i32, i32) {
    %c0_i32 = arith.constant 0 : i32
    %c0_i32_0 = arith.constant 0 : i32
    %c0_i32_1 = arith.constant 0 : i32
    %c0_i32_2 = arith.constant 0 : i32
    return %c0_i32, %c0_i32_0, %c0_i32_1 : i32, i32, i32
  }
  func.func @transform_3(%arg0: i32) -> (i32, i32, i32) {
    %c0_i32 = arith.constant 0 : i32
    %c0_i32_0 = arith.constant 0 : i32
    %c0_i32_1 = arith.constant 0 : i32
    %c0_i32_2 = arith.constant 0 : i32
    return %c0_i32, %c0_i32_0, %c0_i32_1 : i32, i32, i32
  }
  func.func @transform_4(%arg0: i32) -> (i32, i32) {
    %c0_i32 = arith.constant 0 : i32
    %c0_i32_0 = arith.constant 0 : i32
    %c0_i32_1 = arith.constant 0 : i32
    return %c0_i32, %c0_i32_0 : i32, i32
  }
  func.func @transform_5(%arg0: i32) -> (i32, i32) {
    %c0_i32 = arith.constant 0 : i32
    %c0_i32_0 = arith.constant 0 : i32
    %c0_i32_1 = arith.constant 0 : i32
    return %c0_i32, %c0_i32_0 : i32, i32
  }
  func.func @transform_6(%arg0: i32) -> (i32, i32) {
    %c0_i32 = arith.constant 0 : i32
    %c0_i32_0 = arith.constant 0 : i32
    %c0_i32_1 = arith.constant 0 : i32
    return %c0_i32, %c0_i32_0 : i32, i32
  }
  func.func @transform_7(%arg0: i32) -> (i32, i32) {
    %c0_i32 = arith.constant 0 : i32
    %c0_i32_0 = arith.constant 0 : i32
    %c0_i32_1 = arith.constant 0 : i32
    return %c0_i32, %c0_i32_0 : i32, i32
  }
  func.func @transform_8(%arg0: i32) -> (i32, i32, i32) {
    %c0_i32 = arith.constant 0 : i32
    %c0_i32_0 = arith.constant 0 : i32
    %c0_i32_1 = arith.constant 0 : i32
    return %arg0, %c0_i32, %c0_i32_0 : i32, i32, i32
  }
}

module attributes {stable_mosaic.version = 11 : i64} {
  func.func @conv_gn_relu_kernel(%arg0: i32, %arg1: memref<1x48x102xbf16, #tpu.memory_space<vmem>>, %arg2: memref<1x48x102xbf16, #tpu.memory_space<vmem>>, %arg3: memref<3x8x48xbf16, #tpu.memory_space<vmem>>, %arg4: memref<3x8x48xbf16, #tpu.memory_space<vmem>>, %arg5: memref<8x1xf32, #tpu.memory_space<vmem>>, %arg6: memref<8x1xf32, #tpu.memory_space<vmem>>, %arg7: memref<8x8xf32, #tpu.memory_space<vmem>>, %arg8: memref<1x100xf32, #tpu.memory_space<vmem>>, %arg9: memref<1x8x100xbf16, #tpu.memory_space<vmem>>) attributes {dimension_semantics = [#tpu.dimension_semantics<parallel>], iteration_bounds = array<i64: 2>, scalar_prefetch = 0 : i64, scratch_operands = 0 : i64, tpu.core_type = #tpu.core_type<tc>, window_params = [{transform_indices = @transform_0, window_bounds = array<i64: 1, 48, 102>}, {transform_indices = @transform_1, window_bounds = array<i64: 1, 48, 102>}, {pipeline_mode = #tpu.pipeline_mode<synchronous>, transform_indices = @transform_2, window_bounds = array<i64: 3, 8, 48>}, {pipeline_mode = #tpu.pipeline_mode<synchronous>, transform_indices = @transform_3, window_bounds = array<i64: 3, 8, 48>}, {pipeline_mode = #tpu.pipeline_mode<synchronous>, transform_indices = @transform_4, window_bounds = array<i64: 8, 1>}, {pipeline_mode = #tpu.pipeline_mode<synchronous>, transform_indices = @transform_5, window_bounds = array<i64: 8, 1>}, {pipeline_mode = #tpu.pipeline_mode<synchronous>, transform_indices = @transform_6, window_bounds = array<i64: 8, 8>}, {pipeline_mode = #tpu.pipeline_mode<synchronous>, transform_indices = @transform_7, window_bounds = array<i64: 1, 100>}, {transform_indices = @transform_8, window_bounds = array<i64: 1, 8, 100>}]} {
    %cst = arith.constant 0.000000e+00 : f32
    %0 = vector.broadcast %cst : f32 to vector<8x100xf32>
    %c0 = arith.constant 0 : index
    %c0_0 = arith.constant 0 : index
    %c0_1 = arith.constant 0 : index
    %1 = vector.load %arg3[%c0, %c0_0, %c0_1] : memref<3x8x48xbf16, #tpu.memory_space<vmem>>, vector<1x8x48xbf16>
    %2 = vector.shape_cast %1 : vector<1x8x48xbf16> to vector<8x48xbf16>
    %c0_2 = arith.constant 0 : index
    %c0_3 = arith.constant 0 : index
    %c0_4 = arith.constant 0 : index
    %3 = vector.load %arg1[%c0_2, %c0_3, %c0_4] : memref<1x48x102xbf16, #tpu.memory_space<vmem>>, vector<1x48x100xbf16>
    %4 = vector.shape_cast %3 : vector<1x48x100xbf16> to vector<48x100xbf16>
    %cst_5 = arith.constant dense<0.000000e+00> : vector<8x100xf32>
    %5 = tpu.matmul %2, %4, %cst_5 {dimension_numbers = #tpu.dot_dimension_numbers<[1], [0], [0], [1], [0, 0, 1, 1], [], []>} : vector<8x48xbf16>, vector<48x100xbf16>, vector<8x100xf32> -> vector<8x100xf32>
    %6 = arith.addf %0, %5 : vector<8x100xf32>
    %c1 = arith.constant 1 : index
    %c0_6 = arith.constant 0 : index
    %c0_7 = arith.constant 0 : index
    %7 = vector.load %arg3[%c1, %c0_6, %c0_7] : memref<3x8x48xbf16, #tpu.memory_space<vmem>>, vector<1x8x48xbf16>
    %8 = vector.shape_cast %7 : vector<1x8x48xbf16> to vector<8x48xbf16>
    %c0_8 = arith.constant 0 : index
    %c0_9 = arith.constant 0 : index
    %c1_10 = arith.constant 1 : index
    %9 = vector.load %arg1[%c0_8, %c0_9, %c1_10] : memref<1x48x102xbf16, #tpu.memory_space<vmem>>, vector<1x48x100xbf16>
    %10 = vector.shape_cast %9 : vector<1x48x100xbf16> to vector<48x100xbf16>
    %cst_11 = arith.constant dense<0.000000e+00> : vector<8x100xf32>
    %11 = tpu.matmul %8, %10, %cst_11 {dimension_numbers = #tpu.dot_dimension_numbers<[1], [0], [0], [1], [0, 0, 1, 1], [], []>} : vector<8x48xbf16>, vector<48x100xbf16>, vector<8x100xf32> -> vector<8x100xf32>
    %12 = arith.addf %6, %11 : vector<8x100xf32>
    %c2 = arith.constant 2 : index
    %c0_12 = arith.constant 0 : index
    %c0_13 = arith.constant 0 : index
    %13 = vector.load %arg3[%c2, %c0_12, %c0_13] : memref<3x8x48xbf16, #tpu.memory_space<vmem>>, vector<1x8x48xbf16>
    %14 = vector.shape_cast %13 : vector<1x8x48xbf16> to vector<8x48xbf16>
    %c0_14 = arith.constant 0 : index
    %c0_15 = arith.constant 0 : index
    %c2_16 = arith.constant 2 : index
    %15 = vector.load %arg1[%c0_14, %c0_15, %c2_16] : memref<1x48x102xbf16, #tpu.memory_space<vmem>>, vector<1x48x100xbf16>
    %16 = vector.shape_cast %15 : vector<1x48x100xbf16> to vector<48x100xbf16>
    %cst_17 = arith.constant dense<0.000000e+00> : vector<8x100xf32>
    %17 = tpu.matmul %14, %16, %cst_17 {dimension_numbers = #tpu.dot_dimension_numbers<[1], [0], [0], [1], [0, 0, 1, 1], [], []>} : vector<8x48xbf16>, vector<48x100xbf16>, vector<8x100xf32> -> vector<8x100xf32>
    %18 = arith.addf %12, %17 : vector<8x100xf32>
    %c0_18 = arith.constant 0 : index
    %c0_19 = arith.constant 0 : index
    %c0_20 = arith.constant 0 : index
    %19 = vector.load %arg4[%c0_18, %c0_19, %c0_20] : memref<3x8x48xbf16, #tpu.memory_space<vmem>>, vector<1x8x48xbf16>
    %20 = vector.shape_cast %19 : vector<1x8x48xbf16> to vector<8x48xbf16>
    %c0_21 = arith.constant 0 : index
    %c0_22 = arith.constant 0 : index
    %c0_23 = arith.constant 0 : index
    %21 = vector.load %arg2[%c0_21, %c0_22, %c0_23] : memref<1x48x102xbf16, #tpu.memory_space<vmem>>, vector<1x48x100xbf16>
    %22 = vector.shape_cast %21 : vector<1x48x100xbf16> to vector<48x100xbf16>
    %cst_24 = arith.constant dense<0.000000e+00> : vector<8x100xf32>
    %23 = tpu.matmul %20, %22, %cst_24 {dimension_numbers = #tpu.dot_dimension_numbers<[1], [0], [0], [1], [0, 0, 1, 1], [], []>} : vector<8x48xbf16>, vector<48x100xbf16>, vector<8x100xf32> -> vector<8x100xf32>
    %24 = arith.addf %18, %23 : vector<8x100xf32>
    %c1_25 = arith.constant 1 : index
    %c0_26 = arith.constant 0 : index
    %c0_27 = arith.constant 0 : index
    %25 = vector.load %arg4[%c1_25, %c0_26, %c0_27] : memref<3x8x48xbf16, #tpu.memory_space<vmem>>, vector<1x8x48xbf16>
    %26 = vector.shape_cast %25 : vector<1x8x48xbf16> to vector<8x48xbf16>
    %c0_28 = arith.constant 0 : index
    %c0_29 = arith.constant 0 : index
    %c1_30 = arith.constant 1 : index
    %27 = vector.load %arg2[%c0_28, %c0_29, %c1_30] : memref<1x48x102xbf16, #tpu.memory_space<vmem>>, vector<1x48x100xbf16>
    %28 = vector.shape_cast %27 : vector<1x48x100xbf16> to vector<48x100xbf16>
    %cst_31 = arith.constant dense<0.000000e+00> : vector<8x100xf32>
    %29 = tpu.matmul %26, %28, %cst_31 {dimension_numbers = #tpu.dot_dimension_numbers<[1], [0], [0], [1], [0, 0, 1, 1], [], []>} : vector<8x48xbf16>, vector<48x100xbf16>, vector<8x100xf32> -> vector<8x100xf32>
    %30 = arith.addf %24, %29 : vector<8x100xf32>
    %c2_32 = arith.constant 2 : index
    %c0_33 = arith.constant 0 : index
    %c0_34 = arith.constant 0 : index
    %31 = vector.load %arg4[%c2_32, %c0_33, %c0_34] : memref<3x8x48xbf16, #tpu.memory_space<vmem>>, vector<1x8x48xbf16>
    %32 = vector.shape_cast %31 : vector<1x8x48xbf16> to vector<8x48xbf16>
    %c0_35 = arith.constant 0 : index
    %c0_36 = arith.constant 0 : index
    %c2_37 = arith.constant 2 : index
    %33 = vector.load %arg2[%c0_35, %c0_36, %c2_37] : memref<1x48x102xbf16, #tpu.memory_space<vmem>>, vector<1x48x100xbf16>
    %34 = vector.shape_cast %33 : vector<1x48x100xbf16> to vector<48x100xbf16>
    %cst_38 = arith.constant dense<0.000000e+00> : vector<8x100xf32>
    %35 = tpu.matmul %32, %34, %cst_38 {dimension_numbers = #tpu.dot_dimension_numbers<[1], [0], [0], [1], [0, 0, 1, 1], [], []>} : vector<8x48xbf16>, vector<48x100xbf16>, vector<8x100xf32> -> vector<8x100xf32>
    %36 = arith.addf %30, %35 : vector<8x100xf32>
    %c0_39 = arith.constant 0 : index
    %c0_40 = arith.constant 0 : index
    %37 = vector.load %arg8[%c0_39, %c0_40] : memref<1x100xf32, #tpu.memory_space<vmem>>, vector<1x100xf32>
    %38 = vector.broadcast %37 : vector<1x100xf32> to vector<8x100xf32>
    %39 = arith.mulf %36, %38 : vector<8x100xf32>
    %cst_41 = arith.constant dense<0.000000e+00> : vector<8xf32>
    %40 = vector.multi_reduction <add>, %39, %cst_41 [1] : vector<8x100xf32> to vector<8xf32>
    %41 = vector.shape_cast %40 : vector<8xf32> to vector<8x1xf32>
    %42 = arith.mulf %39, %36 : vector<8x100xf32>
    %cst_42 = arith.constant dense<0.000000e+00> : vector<8xf32>
    %43 = vector.multi_reduction <add>, %42, %cst_42 [1] : vector<8x100xf32> to vector<8xf32>
    %44 = vector.shape_cast %43 : vector<8xf32> to vector<8x1xf32>
    %c0_43 = arith.constant 0 : index
    %c0_44 = arith.constant 0 : index
    %45 = vector.load %arg7[%c0_43, %c0_44] : memref<8x8xf32, #tpu.memory_space<vmem>>, vector<8x8xf32>
    %cst_45 = arith.constant dense<0.000000e+00> : vector<8x1xf32>
    %46 = tpu.matmul %45, %41, %cst_45 {dimension_numbers = #tpu.dot_dimension_numbers<[1], [0], [0], [1], [0, 0, 1, 1], [], []>} : vector<8x8xf32>, vector<8x1xf32>, vector<8x1xf32> -> vector<8x1xf32>
    %c0_46 = arith.constant 0 : index
    %c0_47 = arith.constant 0 : index
    %47 = vector.load %arg7[%c0_46, %c0_47] : memref<8x8xf32, #tpu.memory_space<vmem>>, vector<8x8xf32>
    %cst_48 = arith.constant dense<0.000000e+00> : vector<8x1xf32>
    %48 = tpu.matmul %47, %44, %cst_48 {dimension_numbers = #tpu.dot_dimension_numbers<[1], [0], [0], [1], [0, 0, 1, 1], [], []>} : vector<8x8xf32>, vector<8x1xf32>, vector<8x1xf32> -> vector<8x1xf32>
    %49 = arith.mulf %46, %46 : vector<8x1xf32>
    %50 = arith.subf %48, %49 : vector<8x1xf32>
    %cst_49 = arith.constant 9.99999974E-6 : f32
    %51 = vector.broadcast %cst_49 : f32 to vector<8x1xf32>
    %52 = arith.addf %50, %51 : vector<8x1xf32>
    %53 = math.rsqrt %52 : vector<8x1xf32>
    %c0_50 = arith.constant 0 : index
    %c0_51 = arith.constant 0 : index
    %54 = vector.load %arg5[%c0_50, %c0_51] : memref<8x1xf32, #tpu.memory_space<vmem>>, vector<8x1xf32>
    %55 = arith.mulf %53, %54 : vector<8x1xf32>
    %c0_52 = arith.constant 0 : index
    %c0_53 = arith.constant 0 : index
    %56 = vector.load %arg6[%c0_52, %c0_53] : memref<8x1xf32, #tpu.memory_space<vmem>>, vector<8x1xf32>
    %57 = arith.mulf %46, %55 : vector<8x1xf32>
    %58 = arith.subf %56, %57 : vector<8x1xf32>
    %59 = vector.broadcast %55 : vector<8x1xf32> to vector<8x100xf32>
    %60 = arith.mulf %36, %59 : vector<8x100xf32>
    %61 = vector.broadcast %58 : vector<8x1xf32> to vector<8x100xf32>
    %62 = arith.addf %60, %61 : vector<8x100xf32>
    %cst_54 = arith.constant 0.000000e+00 : f32
    %63 = vector.broadcast %cst_54 : f32 to vector<8x100xf32>
    %64 = arith.maximumf %62, %63 : vector<8x100xf32>
    %65 = arith.truncf %64 : vector<8x100xf32> to vector<8x100xbf16>
    %c0_55 = arith.constant 0 : index
    %c0_56 = arith.constant 0 : index
    %c0_57 = arith.constant 0 : index
    %66 = vector.load %arg9[%c0_55, %c0_56, %c0_57] : memref<1x8x100xbf16, #tpu.memory_space<vmem>>, vector<1x8x100xbf16>
    %67 = vector.shape_cast %66 : vector<1x8x100xbf16> to vector<8x100xbf16>
    %68 = vector.shape_cast %65 : vector<8x100xbf16> to vector<1x8x100xbf16>
    tpu.vector_store %arg9[%c0_55, %c0_56, %c0_57], %68 {strides = array<i32>} : memref<1x8x100xbf16, #tpu.memory_space<vmem>>, vector<1x8x100xbf16>,
    return
  }
  func.func @transform_0(%arg0: i32) -> (i32, i32, i32) {
    %c0_i32 = arith.constant 0 : i32
    %c0_i32_0 = arith.constant 0 : i32
    %c0_i32_1 = arith.constant 0 : i32
    return %arg0, %c0_i32, %c0_i32_0 : i32, i32, i32
  }
  func.func @transform_1(%arg0: i32) -> (i32, i32, i32) {
    %c0_i32 = arith.constant 0 : i32
    %c0_i32_0 = arith.constant 0 : i32
    %c0_i32_1 = arith.constant 0 : i32
    return %arg0, %c0_i32, %c0_i32_0 : i32, i32, i32
  }
  func.func @transform_2(%arg0: i32) -> (i32, i32, i32) {
    %c0_i32 = arith.constant 0 : i32
    %c0_i32_0 = arith.constant 0 : i32
    %c0_i32_1 = arith.constant 0 : i32
    %c0_i32_2 = arith.constant 0 : i32
    return %c0_i32, %c0_i32_0, %c0_i32_1 : i32, i32, i32
  }
  func.func @transform_3(%arg0: i32) -> (i32, i32, i32) {
    %c0_i32 = arith.constant 0 : i32
    %c0_i32_0 = arith.constant 0 : i32
    %c0_i32_1 = arith.constant 0 : i32
    %c0_i32_2 = arith.constant 0 : i32
    return %c0_i32, %c0_i32_0, %c0_i32_1 : i32, i32, i32
  }
  func.func @transform_4(%arg0: i32) -> (i32, i32) {
    %c0_i32 = arith.constant 0 : i32
    %c0_i32_0 = arith.constant 0 : i32
    %c0_i32_1 = arith.constant 0 : i32
    return %c0_i32, %c0_i32_0 : i32, i32
  }
  func.func @transform_5(%arg0: i32) -> (i32, i32) {
    %c0_i32 = arith.constant 0 : i32
    %c0_i32_0 = arith.constant 0 : i32
    %c0_i32_1 = arith.constant 0 : i32
    return %c0_i32, %c0_i32_0 : i32, i32
  }
  func.func @transform_6(%arg0: i32) -> (i32, i32) {
    %c0_i32 = arith.constant 0 : i32
    %c0_i32_0 = arith.constant 0 : i32
    %c0_i32_1 = arith.constant 0 : i32
    return %c0_i32, %c0_i32_0 : i32, i32
  }
  func.func @transform_7(%arg0: i32) -> (i32, i32) {
    %c0_i32 = arith.constant 0 : i32
    %c0_i32_0 = arith.constant 0 : i32
    %c0_i32_1 = arith.constant 0 : i32
    return %c0_i32, %c0_i32_0 : i32, i32
  }
  func.func @transform_8(%arg0: i32) -> (i32, i32, i32) {
    %c0_i32 = arith.constant 0 : i32
    %c0_i32_0 = arith.constant 0 : i32
    %c0_i32_1 = arith.constant 0 : i32
    return %arg0, %c0_i32, %c0_i32_0 : i32, i32, i32
  }
}

module attributes {stable_mosaic.version = 11 : i64} {
  func.func @conv_gn_relu_kernel(%arg0: i32, %arg1: memref<1x24x326xbf16, #tpu.memory_space<vmem>>, %arg2: memref<1x24x326xbf16, #tpu.memory_space<vmem>>, %arg3: memref<3x8x24xbf16, #tpu.memory_space<vmem>>, %arg4: memref<3x8x24xbf16, #tpu.memory_space<vmem>>, %arg5: memref<8x1xf32, #tpu.memory_space<vmem>>, %arg6: memref<8x1xf32, #tpu.memory_space<vmem>>, %arg7: memref<8x8xf32, #tpu.memory_space<vmem>>, %arg8: memref<1x324xf32, #tpu.memory_space<vmem>>, %arg9: memref<1x8x324xf32, #tpu.memory_space<vmem>>) attributes {dimension_semantics = [#tpu.dimension_semantics<parallel>], iteration_bounds = array<i64: 2>, scalar_prefetch = 0 : i64, scratch_operands = 0 : i64, tpu.core_type = #tpu.core_type<tc>, window_params = [{transform_indices = @transform_0, window_bounds = array<i64: 1, 24, 326>}, {transform_indices = @transform_1, window_bounds = array<i64: 1, 24, 326>}, {pipeline_mode = #tpu.pipeline_mode<synchronous>, transform_indices = @transform_2, window_bounds = array<i64: 3, 8, 24>}, {pipeline_mode = #tpu.pipeline_mode<synchronous>, transform_indices = @transform_3, window_bounds = array<i64: 3, 8, 24>}, {pipeline_mode = #tpu.pipeline_mode<synchronous>, transform_indices = @transform_4, window_bounds = array<i64: 8, 1>}, {pipeline_mode = #tpu.pipeline_mode<synchronous>, transform_indices = @transform_5, window_bounds = array<i64: 8, 1>}, {pipeline_mode = #tpu.pipeline_mode<synchronous>, transform_indices = @transform_6, window_bounds = array<i64: 8, 8>}, {pipeline_mode = #tpu.pipeline_mode<synchronous>, transform_indices = @transform_7, window_bounds = array<i64: 1, 324>}, {transform_indices = @transform_8, window_bounds = array<i64: 1, 8, 324>}]} {
    %cst = arith.constant 0.000000e+00 : f32
    %0 = vector.broadcast %cst : f32 to vector<8x324xf32>
    %c0 = arith.constant 0 : index
    %c0_0 = arith.constant 0 : index
    %c0_1 = arith.constant 0 : index
    %1 = vector.load %arg3[%c0, %c0_0, %c0_1] : memref<3x8x24xbf16, #tpu.memory_space<vmem>>, vector<1x8x24xbf16>
    %2 = vector.shape_cast %1 : vector<1x8x24xbf16> to vector<8x24xbf16>
    %c0_2 = arith.constant 0 : index
    %c0_3 = arith.constant 0 : index
    %c0_4 = arith.constant 0 : index
    %3 = vector.load %arg1[%c0_2, %c0_3, %c0_4] : memref<1x24x326xbf16, #tpu.memory_space<vmem>>, vector<1x24x324xbf16>
    %4 = vector.shape_cast %3 : vector<1x24x324xbf16> to vector<24x324xbf16>
    %cst_5 = arith.constant dense<0.000000e+00> : vector<8x324xf32>
    %5 = tpu.matmul %2, %4, %cst_5 {dimension_numbers = #tpu.dot_dimension_numbers<[1], [0], [0], [1], [0, 0, 1, 1], [], []>} : vector<8x24xbf16>, vector<24x324xbf16>, vector<8x324xf32> -> vector<8x324xf32>
    %6 = arith.addf %0, %5 : vector<8x324xf32>
    %c1 = arith.constant 1 : index
    %c0_6 = arith.constant 0 : index
    %c0_7 = arith.constant 0 : index
    %7 = vector.load %arg3[%c1, %c0_6, %c0_7] : memref<3x8x24xbf16, #tpu.memory_space<vmem>>, vector<1x8x24xbf16>
    %8 = vector.shape_cast %7 : vector<1x8x24xbf16> to vector<8x24xbf16>
    %c0_8 = arith.constant 0 : index
    %c0_9 = arith.constant 0 : index
    %c1_10 = arith.constant 1 : index
    %9 = vector.load %arg1[%c0_8, %c0_9, %c1_10] : memref<1x24x326xbf16, #tpu.memory_space<vmem>>, vector<1x24x324xbf16>
    %10 = vector.shape_cast %9 : vector<1x24x324xbf16> to vector<24x324xbf16>
    %cst_11 = arith.constant dense<0.000000e+00> : vector<8x324xf32>
    %11 = tpu.matmul %8, %10, %cst_11 {dimension_numbers = #tpu.dot_dimension_numbers<[1], [0], [0], [1], [0, 0, 1, 1], [], []>} : vector<8x24xbf16>, vector<24x324xbf16>, vector<8x324xf32> -> vector<8x324xf32>
    %12 = arith.addf %6, %11 : vector<8x324xf32>
    %c2 = arith.constant 2 : index
    %c0_12 = arith.constant 0 : index
    %c0_13 = arith.constant 0 : index
    %13 = vector.load %arg3[%c2, %c0_12, %c0_13] : memref<3x8x24xbf16, #tpu.memory_space<vmem>>, vector<1x8x24xbf16>
    %14 = vector.shape_cast %13 : vector<1x8x24xbf16> to vector<8x24xbf16>
    %c0_14 = arith.constant 0 : index
    %c0_15 = arith.constant 0 : index
    %c2_16 = arith.constant 2 : index
    %15 = vector.load %arg1[%c0_14, %c0_15, %c2_16] : memref<1x24x326xbf16, #tpu.memory_space<vmem>>, vector<1x24x324xbf16>
    %16 = vector.shape_cast %15 : vector<1x24x324xbf16> to vector<24x324xbf16>
    %cst_17 = arith.constant dense<0.000000e+00> : vector<8x324xf32>
    %17 = tpu.matmul %14, %16, %cst_17 {dimension_numbers = #tpu.dot_dimension_numbers<[1], [0], [0], [1], [0, 0, 1, 1], [], []>} : vector<8x24xbf16>, vector<24x324xbf16>, vector<8x324xf32> -> vector<8x324xf32>
    %18 = arith.addf %12, %17 : vector<8x324xf32>
    %c0_18 = arith.constant 0 : index
    %c0_19 = arith.constant 0 : index
    %c0_20 = arith.constant 0 : index
    %19 = vector.load %arg4[%c0_18, %c0_19, %c0_20] : memref<3x8x24xbf16, #tpu.memory_space<vmem>>, vector<1x8x24xbf16>
    %20 = vector.shape_cast %19 : vector<1x8x24xbf16> to vector<8x24xbf16>
    %c0_21 = arith.constant 0 : index
    %c0_22 = arith.constant 0 : index
    %c0_23 = arith.constant 0 : index
    %21 = vector.load %arg2[%c0_21, %c0_22, %c0_23] : memref<1x24x326xbf16, #tpu.memory_space<vmem>>, vector<1x24x324xbf16>
    %22 = vector.shape_cast %21 : vector<1x24x324xbf16> to vector<24x324xbf16>
    %cst_24 = arith.constant dense<0.000000e+00> : vector<8x324xf32>
    %23 = tpu.matmul %20, %22, %cst_24 {dimension_numbers = #tpu.dot_dimension_numbers<[1], [0], [0], [1], [0, 0, 1, 1], [], []>} : vector<8x24xbf16>, vector<24x324xbf16>, vector<8x324xf32> -> vector<8x324xf32>
    %24 = arith.addf %18, %23 : vector<8x324xf32>
    %c1_25 = arith.constant 1 : index
    %c0_26 = arith.constant 0 : index
    %c0_27 = arith.constant 0 : index
    %25 = vector.load %arg4[%c1_25, %c0_26, %c0_27] : memref<3x8x24xbf16, #tpu.memory_space<vmem>>, vector<1x8x24xbf16>
    %26 = vector.shape_cast %25 : vector<1x8x24xbf16> to vector<8x24xbf16>
    %c0_28 = arith.constant 0 : index
    %c0_29 = arith.constant 0 : index
    %c1_30 = arith.constant 1 : index
    %27 = vector.load %arg2[%c0_28, %c0_29, %c1_30] : memref<1x24x326xbf16, #tpu.memory_space<vmem>>, vector<1x24x324xbf16>
    %28 = vector.shape_cast %27 : vector<1x24x324xbf16> to vector<24x324xbf16>
    %cst_31 = arith.constant dense<0.000000e+00> : vector<8x324xf32>
    %29 = tpu.matmul %26, %28, %cst_31 {dimension_numbers = #tpu.dot_dimension_numbers<[1], [0], [0], [1], [0, 0, 1, 1], [], []>} : vector<8x24xbf16>, vector<24x324xbf16>, vector<8x324xf32> -> vector<8x324xf32>
    %30 = arith.addf %24, %29 : vector<8x324xf32>
    %c2_32 = arith.constant 2 : index
    %c0_33 = arith.constant 0 : index
    %c0_34 = arith.constant 0 : index
    %31 = vector.load %arg4[%c2_32, %c0_33, %c0_34] : memref<3x8x24xbf16, #tpu.memory_space<vmem>>, vector<1x8x24xbf16>
    %32 = vector.shape_cast %31 : vector<1x8x24xbf16> to vector<8x24xbf16>
    %c0_35 = arith.constant 0 : index
    %c0_36 = arith.constant 0 : index
    %c2_37 = arith.constant 2 : index
    %33 = vector.load %arg2[%c0_35, %c0_36, %c2_37] : memref<1x24x326xbf16, #tpu.memory_space<vmem>>, vector<1x24x324xbf16>
    %34 = vector.shape_cast %33 : vector<1x24x324xbf16> to vector<24x324xbf16>
    %cst_38 = arith.constant dense<0.000000e+00> : vector<8x324xf32>
    %35 = tpu.matmul %32, %34, %cst_38 {dimension_numbers = #tpu.dot_dimension_numbers<[1], [0], [0], [1], [0, 0, 1, 1], [], []>} : vector<8x24xbf16>, vector<24x324xbf16>, vector<8x324xf32> -> vector<8x324xf32>
    %36 = arith.addf %30, %35 : vector<8x324xf32>
    %c0_39 = arith.constant 0 : index
    %c0_40 = arith.constant 0 : index
    %37 = vector.load %arg8[%c0_39, %c0_40] : memref<1x324xf32, #tpu.memory_space<vmem>>, vector<1x324xf32>
    %38 = vector.broadcast %37 : vector<1x324xf32> to vector<8x324xf32>
    %39 = arith.mulf %36, %38 : vector<8x324xf32>
    %cst_41 = arith.constant dense<0.000000e+00> : vector<8xf32>
    %40 = vector.multi_reduction <add>, %39, %cst_41 [1] : vector<8x324xf32> to vector<8xf32>
    %41 = vector.shape_cast %40 : vector<8xf32> to vector<8x1xf32>
    %42 = arith.mulf %39, %36 : vector<8x324xf32>
    %cst_42 = arith.constant dense<0.000000e+00> : vector<8xf32>
    %43 = vector.multi_reduction <add>, %42, %cst_42 [1] : vector<8x324xf32> to vector<8xf32>
    %44 = vector.shape_cast %43 : vector<8xf32> to vector<8x1xf32>
    %c0_43 = arith.constant 0 : index
    %c0_44 = arith.constant 0 : index
    %45 = vector.load %arg7[%c0_43, %c0_44] : memref<8x8xf32, #tpu.memory_space<vmem>>, vector<8x8xf32>
    %cst_45 = arith.constant dense<0.000000e+00> : vector<8x1xf32>
    %46 = tpu.matmul %45, %41, %cst_45 {dimension_numbers = #tpu.dot_dimension_numbers<[1], [0], [0], [1], [0, 0, 1, 1], [], []>} : vector<8x8xf32>, vector<8x1xf32>, vector<8x1xf32> -> vector<8x1xf32>
    %c0_46 = arith.constant 0 : index
    %c0_47 = arith.constant 0 : index
    %47 = vector.load %arg7[%c0_46, %c0_47] : memref<8x8xf32, #tpu.memory_space<vmem>>, vector<8x8xf32>
    %cst_48 = arith.constant dense<0.000000e+00> : vector<8x1xf32>
    %48 = tpu.matmul %47, %44, %cst_48 {dimension_numbers = #tpu.dot_dimension_numbers<[1], [0], [0], [1], [0, 0, 1, 1], [], []>} : vector<8x8xf32>, vector<8x1xf32>, vector<8x1xf32> -> vector<8x1xf32>
    %49 = arith.mulf %46, %46 : vector<8x1xf32>
    %50 = arith.subf %48, %49 : vector<8x1xf32>
    %cst_49 = arith.constant 9.99999974E-6 : f32
    %51 = vector.broadcast %cst_49 : f32 to vector<8x1xf32>
    %52 = arith.addf %50, %51 : vector<8x1xf32>
    %53 = math.rsqrt %52 : vector<8x1xf32>
    %c0_50 = arith.constant 0 : index
    %c0_51 = arith.constant 0 : index
    %54 = vector.load %arg5[%c0_50, %c0_51] : memref<8x1xf32, #tpu.memory_space<vmem>>, vector<8x1xf32>
    %55 = arith.mulf %53, %54 : vector<8x1xf32>
    %c0_52 = arith.constant 0 : index
    %c0_53 = arith.constant 0 : index
    %56 = vector.load %arg6[%c0_52, %c0_53] : memref<8x1xf32, #tpu.memory_space<vmem>>, vector<8x1xf32>
    %57 = arith.mulf %46, %55 : vector<8x1xf32>
    %58 = arith.subf %56, %57 : vector<8x1xf32>
    %59 = vector.broadcast %55 : vector<8x1xf32> to vector<8x324xf32>
    %60 = arith.mulf %36, %59 : vector<8x324xf32>
    %61 = vector.broadcast %58 : vector<8x1xf32> to vector<8x324xf32>
    %62 = arith.addf %60, %61 : vector<8x324xf32>
    %cst_54 = arith.constant 0.000000e+00 : f32
    %63 = vector.broadcast %cst_54 : f32 to vector<8x324xf32>
    %64 = arith.maximumf %62, %63 : vector<8x324xf32>
    %c0_55 = arith.constant 0 : index
    %c0_56 = arith.constant 0 : index
    %c0_57 = arith.constant 0 : index
    %65 = vector.load %arg9[%c0_55, %c0_56, %c0_57] : memref<1x8x324xf32, #tpu.memory_space<vmem>>, vector<1x8x324xf32>
    %66 = vector.shape_cast %65 : vector<1x8x324xf32> to vector<8x324xf32>
    %67 = vector.shape_cast %64 : vector<8x324xf32> to vector<1x8x324xf32>
    tpu.vector_store %arg9[%c0_55, %c0_56, %c0_57], %67 {strides = array<i32>} : memref<1x8x324xf32, #tpu.memory_space<vmem>>, vector<1x8x324xf32>,
    return
  }
  func.func @transform_0(%arg0: i32) -> (i32, i32, i32) {
    %c0_i32 = arith.constant 0 : i32
    %c0_i32_0 = arith.constant 0 : i32
    %c0_i32_1 = arith.constant 0 : i32
    return %arg0, %c0_i32, %c0_i32_0 : i32, i32, i32
  }
  func.func @transform_1(%arg0: i32) -> (i32, i32, i32) {
    %c0_i32 = arith.constant 0 : i32
    %c0_i32_0 = arith.constant 0 : i32
    %c0_i32_1 = arith.constant 0 : i32
    return %arg0, %c0_i32, %c0_i32_0 : i32, i32, i32
  }
  func.func @transform_2(%arg0: i32) -> (i32, i32, i32) {
    %c0_i32 = arith.constant 0 : i32
    %c0_i32_0 = arith.constant 0 : i32
    %c0_i32_1 = arith.constant 0 : i32
    %c0_i32_2 = arith.constant 0 : i32
    return %c0_i32, %c0_i32_0, %c0_i32_1 : i32, i32, i32
  }
  func.func @transform_3(%arg0: i32) -> (i32, i32, i32) {
    %c0_i32 = arith.constant 0 : i32
    %c0_i32_0 = arith.constant 0 : i32
    %c0_i32_1 = arith.constant 0 : i32
    %c0_i32_2 = arith.constant 0 : i32
    return %c0_i32, %c0_i32_0, %c0_i32_1 : i32, i32, i32
  }
  func.func @transform_4(%arg0: i32) -> (i32, i32) {
    %c0_i32 = arith.constant 0 : i32
    %c0_i32_0 = arith.constant 0 : i32
    %c0_i32_1 = arith.constant 0 : i32
    return %c0_i32, %c0_i32_0 : i32, i32
  }
  func.func @transform_5(%arg0: i32) -> (i32, i32) {
    %c0_i32 = arith.constant 0 : i32
    %c0_i32_0 = arith.constant 0 : i32
    %c0_i32_1 = arith.constant 0 : i32
    return %c0_i32, %c0_i32_0 : i32, i32
  }
  func.func @transform_6(%arg0: i32) -> (i32, i32) {
    %c0_i32 = arith.constant 0 : i32
    %c0_i32_0 = arith.constant 0 : i32
    %c0_i32_1 = arith.constant 0 : i32
    return %c0_i32, %c0_i32_0 : i32, i32
  }
  func.func @transform_7(%arg0: i32) -> (i32, i32) {
    %c0_i32 = arith.constant 0 : i32
    %c0_i32_0 = arith.constant 0 : i32
    %c0_i32_1 = arith.constant 0 : i32
    return %c0_i32, %c0_i32_0 : i32, i32
  }
  func.func @transform_8(%arg0: i32) -> (i32, i32, i32) {
    %c0_i32 = arith.constant 0 : i32
    %c0_i32_0 = arith.constant 0 : i32
    %c0_i32_1 = arith.constant 0 : i32
    return %arg0, %c0_i32, %c0_i32_0 : i32, i32, i32
  }
}

</mosaic_0001>

<bundles_post_ra>
// kernel: unet_forward.9
= control target key start
LH: loop header
LB: loop body
LE: loop exit
PB: predicated region body
PF: predicated region fallthrough
CT: control target
= control target key end

     0   :  { %s993_s21 = smov 0   ;;  %s1065_s0 = inlined_call_operand.vmem [shape: bf16[2,12,326], index: 0, kind: input, shape index: {}]   ;;  %s1066_s1 = inlined_call_operand.vmem [shape: bf16[3,8,12], index: 1, kind: input, shape index: {}]   ;;  %s1067_s2 = inlined_call_operand.vmem [shape: f32[8,1], index: 2, kind: input, shape index: {}]   ;;  %s1068_s3 = inlined_call_operand.vmem [shape: f32[8,1], index: 3, kind: input, shape index: {}]   ;;  %s1069_s4 = inlined_call_operand.vmem [shape: f32[8,8], index: 4, kind: input, shape index: {}]   ;;  %s1070_s5 = inlined_call_operand.vmem [shape: f32[1,324], index: 5, kind: input, shape index: {}]   ;;  %s1071_s6 = inlined_call_operand.vmem [shape: bf16[2,8,324], index: 6, kind: output, shape index: {}]  }
   0x1 LB: > { %s855_s22 = sadd.s32 4294967295, %s951_s21   ;;  %p859_p0 = scmp.ge.s32.totalorder %s951_s21, 1  ;;  %s951_s21 = sphi %s993_s21, %s16_s21  }
   0x2   : > { %p212_p1 = scmp.lt.s32.totalorder %s951_s21, 3 }
   0x4   : > { %p213_p2 = pnand %p859_p0, %p212_p1 }
   0x5   : > { %p242_p3 = scmp.lt.s32.totalorder (!%p213_p2), %s855_s22, 1  ;;  %s956_s27 = smov (!%p213_p2), 127  }
   0x6   : > { %216 = sbr.rel (%p213_p2) target bundleno = 849 (0x351), region = 44  ;;  %s957_s28 = smov (!%p213_p2), 126  }
   0xb   : > { %v953_v0 = vmov 0.0   ;;  %vm954_vm0 = vmmov 0   ;;  %s1073_s22 = smov (!%p242_p3, %s855_s22), 1  ;;  %v955_v1 = vmov 0   ;;  %vm286_vm1 = vcmask 1045504  }
   0xc   : > { %894 = vmatprep.subr.bf16.mxu1 %v953_v0  ;;  %896 = vmatprep.mubr.msk.bf16.mxu1 %vm954_vm0, %v953_v0  ;;  %s922_s23 = smul.u32 24, %s1073_s22  ;;  %v862_v8 = vld [vmem:[%s1066_s1 + $0x4] sm:$0xf]  ;;  %vm282_vm2 = vcmask 97280   ;;  %vm279_vm3 = vcmask 1039360   ;;  %vm478_vm4 = vcmask 1031168   ;;  %v579_v31 = vlaneseq }
   0xd   : > { %328 = vmatprep.mubr.bf16.mxu0 %v955_v1  ;;  %937 = vset.pattern.permute.xlu0 %v955_v1  ;;  %v253_v18 = vld [vmem:[%s1066_s1] sm:$0xf]  ;;  %v872_v23 = vld [vmem:[%s1066_s1 + $0x8] sm:$0xf]  ;;  %vm598_vm5 = vcmask 556032   ;;  %vm612_vm6 = vcmask 64512  }
   0xe   : > { %s246_s26 = scalar_lea.vmem %s1065_s0, %s922_s23  ;;  %938 = vset.pattern.permute.xlu1 %v955_v1  ;;  %v580_v36 = vshrl.u32 %v579_v31, 7  ;;  %v577_v42 = vld [vmem:[%s1070_s5] sm:$0x7]  ;;  %s923_s19 = smul.u32 12, %s1073_s22  ;;  %vm798_vm7 = vcmask 551936  }
   0xf   : > { %v939_v2 = vld [vmem:[%s246_s26 + $0x8] ss:$12 sps:$4 sm:$0x3f]   ;;  %v940_v3 = vld [vmem:[%s246_s26] ss:$12 sps:$4 sm:$0x3f]  }
  0x10   : > { %277 = vrot.lane.b32.xlu1 %v939_v2, %s956_s27  ;;  %273 = vrot.lane.b32.xlu0 %v940_v3, %s956_s27  ;;  %v942_v4 = vld [vmem:[%s246_s26 + $0x4] ss:$12 sps:$4 sm:$0x3f]   ;;  %v387_v9 = vsel %vm286_vm1, %v939_v2, 0  ;;  %v381_v16 = vsel %vm286_vm1, %v940_v3, 0  ;;  %v589_v41 = vsub.s32 2, %v580_v36  ;;  %s251_s24 = scalar_lea.vmem %s1071_s6, %s923_s19 }
  0x11   : > { %v581_v43 = vsub.s32 0, %v580_v36  ;;  %v585_v47 = vsub.s32 1, %v580_v36 }
  0x12   : > { %v590_v51 = vrot.slane %v577_v42, %v589_v41 }
  0x13   : > { %v582_v53 = vrot.slane %v577_v42, %v581_v43  ;;  %v586_v58 = vrot.slane %v577_v42, %v585_v47 }
  0x14   : > { %472 = vrot.lane.b32.xlu1 %v940_v3, %s957_s28  ;;  %275 = vrot.lane.b32.xlu0 %v942_v4, %s956_s27 }
  0x18   : > { %476 = vrot.lane.b32.xlu1 %v939_v2, %s957_s28  ;;  %474 = vrot.lane.b32.xlu0 %v942_v4, %s957_s28 }
  0x82   : > { %v278_v5 = vpop.permute.xlu1 %277  ;;  %v274_v6 = vpop.permute.xlu0 %273 }
  0x83   : > { %v294_v7 = vsel %vm286_vm1, %v278_v5, 0 }
  0x84   : > { %895 = vmatpush3.bf16.msra.mxu1 %v294_v7 }
  0x85   : > { %900 = vmatprep.subr.bf16.mxu1 %v953_v0 }
  0x86   : > { %v473_v10 = vpop.permute.xlu1 %472  ;;  %v276_v11 = vpop.permute.xlu0 %275 }
  0x87   : > { %897 = vmatmul.mubr.msk.bf16.vlgmr.msra.gmra.mxu1 %vm282_vm2, %v862_v8  ;;  %v281_v12 = vsel %vm279_vm3, %v276_v11, %v278_v5  ;;  %v280_v13 = vsel %vm279_vm3, %v274_v6, %v276_v11  ;;  %v611_v11 = vld [vmem:[%s1069_s4] sm:$0xff] }
  0x88   : > { %901 = vmatpush3.bf16.msra.mxu1 %v387_v9  ;;  %902 = vmatprep.mubr.msk.bf16.mxu1 %vm954_vm0, %v953_v0  ;;  %v288_v14 = vsel %vm286_vm1, %v280_v13, 0 }
  0x89   : > { %866 = vmatprep.subr.msk.bf16.mxu0 %vm286_vm1, %v281_v12  ;;  %906 = vmatprep.subr.bf16.mxu1 %v953_v0 }
  0x8a   : > { %311 = vmatpush1.bf16.msra.mxu0 %v288_v14  ;;  %v477_v15 = vpop.permute.xlu1 %476  ;;  %v475_v17 = vpop.permute.xlu0 %474 }
  0x8b   : > { %869 = vmatprep.subr.msk.bf16.mxu0 %vm286_vm1, %v942_v4  ;;  %v480_v19 = vsel %vm478_vm4, %v475_v17, %v477_v15  ;;  %v491_v20 = vsel %vm286_vm1, %v477_v15, 0  ;;  %v479_v21 = vsel %vm478_vm4, %v473_v10, %v475_v17 }
  0x8c   : > { %v485_v22 = vsel %vm286_vm1, %v479_v21, 0  ;;  %v760_v21 = vld [vmem:[%s1067_s2] sm:$0xff] }
  0x8d   : > { %867 = vmatmul.mubr.msk.bf16.vlgmr.msra.gmra.mxu0 %vm282_vm2, %v862_v8 }
  0x8e   : > { %404 = vmatpush1.bf16.msra.mxu0 %v381_v16  ;;  %421 = vmatprep.mubr.bf16.mxu0 %v955_v1 }
  0x8f   : > { %903 = vmatmul.mubr.msk.bf16.vlgmr.msra.gmra.mxu1 %vm282_vm2, %v253_v18  ;;  %873 = vmatprep.subr.msk.bf16.mxu0 %vm286_vm1, %v480_v19 }
  0x90   : > { %907 = vmatpush3.bf16.msra.mxu1 %v491_v20  ;;  %908 = vmatprep.mubr.msk.bf16.mxu1 %vm954_vm0, %v953_v0 }
  0x91   : > { %917 = vmatprep.subr.mxu1 %v953_v0 }
  0x95   : > { %870 = vmatmul.mubr.msk.bf16.vlgmr.msra.gmra.mxu0 %vm282_vm2, %v253_v18 }
  0x96   : > { %508 = vmatpush1.bf16.msra.mxu0 %v485_v22  ;;  %525 = vmatprep.mubr.bf16.mxu0 %v955_v1 }
  0x97   : > { %909 = vmatmul.mubr.msk.bf16.vlgmr.msra.gmra.mxu1 %vm282_vm2, %v872_v23  ;;  %912 = vmatprep.subr.mxu0 %v953_v0 }
  0x98   : > { %919 = vmatprep.mubr.msk.f32.mxu1 %vm954_vm0, %v953_v0 }
  0x9d   : > { %874 = vmatmul.mubr.msk.bf16.vlgmr.msra.gmra.mxu0 %vm282_vm2, %v872_v23 }
  0x9e   : > { %914 = vmatprep.mubr.msk.f32.mxu0 %vm954_vm0, %v953_v0 }
 0x147   : > { %v371_v24 = vpop.f32.mrf.mxu1 }
 0x149   : > { %v898_v25 = vpop.f32.mrf.mxu1 }
 0x14b   : > { %v374_v26 = vpop.f32.mrf.mxu1 }
 0x14d   : > { %v330_v27 = vpop.f32.mrf.mxu0  ;;  %v899_v28 = vpop.f32.mrf.mxu1 }
 0x14f   : > { %v332_v29 = vpop.f32.mrf.mxu0  ;;  %v464_v30 = vpop.f32.mrf.mxu1 }
 0x150   : > { %v465_v44 = vadd.f32 %v464_v30, %v371_v24  ;;  %v762_v24 = vld [vmem:[%s1068_s3] sm:$0xff] }
 0x151   : > { %v334_v32 = vpop.f32.mrf.mxu0  ;;  %v904_v33 = vpop.f32.mrf.mxu1 }
 0x153   : > { %v335_v34 = vpop.f32.mrf.mxu0  ;;  %v467_v35 = vpop.f32.mrf.mxu1 }
 0x155   : > { %v423_v37 = vpop.f32.mrf.mxu0  ;;  %v905_v38 = vpop.f32.mrf.mxu1 }
 0x156   : > { %v424_v52 = vadd.f32 %v423_v37, %v330_v27 }
 0x157   : > { %v425_v39 = vpop.f32.mrf.mxu0  ;;  %v568_v40 = vpop.f32.mrf.mxu1 }
 0x158   : > { %v576_v48 = vadd.f32 %v568_v40, %v465_v44  ;;  %v426_v56 = vadd.f32 %v425_v39, %v332_v29 }
 0x159   : > { %v427_v45 = vpop.f32.mrf.mxu0  ;;  %v910_v46 = vpop.f32.mrf.mxu1 }
 0x15a   : > { %v596_v60 = vmul.f32 %v590_v51, %v576_v48 }
 0x15b   : > { %v428_v49 = vpop.f32.mrf.mxu0  ;;  %v571_v50 = vpop.f32.mrf.mxu1 }
 0x15c   : > { %v605_v2 = vmul.f32 %v596_v60, %v576_v48  ;;  %v599_v6 = vsel %vm598_vm5, %v596_v60, 0.0 }
 0x15d   : > { %v527_v54 = vpop.f32.mrf.mxu0  ;;  %v911_v55 = vpop.f32.mrf.mxu1 }
 0x15e   : > { %v574_v57 = vadd.f32 %v527_v54, %v424_v52  ;;  %v607_v9 = vsel %vm598_vm5, %v605_v2, 0.0 }
 0x15f   : > { %v529_v59 = vpop.f32.mrf.mxu0 }
 0x160   : > { %v594_v61 = vmul.f32 %v582_v53, %v574_v57  ;;  %v575_v62 = vadd.f32 %v529_v59, %v426_v56 }
 0x161   : > { %v531_v63 = vpop.f32.mrf.mxu0 }
 0x162   : > { %v595_v0 = vmul.f32 %v586_v58, %v575_v62  ;;  %v603_v3 = vmul.f32 %v594_v61, %v574_v57 }
 0x163   : > { %v532_v1 = vpop.f32.mrf.mxu0 }
 0x164   : > { %v604_v4 = vmul.f32 %v595_v0, %v575_v62  ;;  %v597_v5 = vadd.f32 %v595_v0, %v594_v61 }
 0x166   : > { %v600_v7 = vadd.f32 %v599_v6, %v597_v5  ;;  %v606_v8 = vadd.f32 %v604_v4, %v603_v3 }
 0x168   : > { %601 = vadd.xlane.f32.xlu0 %v600_v7  ;;  %v608_v10 = vadd.f32 %v607_v9, %v606_v8 }
 0x16a   : > { %609 = vadd.xlane.f32.xlu1 %v608_v10 }
 0x1f1   : > { %v602_v12 = vpop.xlane.xlu0 %601 }
 0x1f2   : > { %913 = vmatpush3.msra.mxu0 %v602_v12 }
 0x1f3   : > { %v610_v13 = vpop.xlane.xlu1 %609  ;;  %915 = vmatmul.mubr.msk.f32.vlgmr.msra.gmra.mxu0 %vm612_vm6, %v611_v11 }
 0x1f4   : > { %918 = vmatpush3.msra.mxu1 %v610_v13 }
 0x1f5   : > { %920 = vmatmul.mubr.msk.f32.vlgmr.msra.gmra.mxu1 %vm612_vm6, %v611_v11 }
 0x2b3   : > { %v682_v14 = vpop.f32.mrf.mxu0 }
 0x2b4   : > { %v756_v15 = vmul.f32 %v682_v14, %v682_v14 }
 0x2b5   : > { %v752_v16 = vpop.f32.mrf.mxu1  ;;  %v916_v17 = vpop.f32.mrf.mxu0 }
 0x2b6   : > { %v757_v18 = vsub.f32 %v752_v16, %v756_v15 }
 0x2b7   : > { %v921_v19 = vpop.f32.mrf.mxu1 }
 0x2b8   : > { %v758_v20 = vadd.f32 1e-05, %v757_v18 }
 0x2ba   : > { %943 = vrsqrt.f32 %v758_v20 }
 0x2c7   : > { %v944_v22 = vpop.eup %943 }
 0x2c8   : > { %v761_v23 = vmul.f32 %v944_v22, %v760_v21 }
 0x2ca   : > { %767 = vperm.xlu0 %937, %v761_v23   ;;  %v763_v25 = vmul.f32 %v761_v23, %v682_v14 }
 0x2cc   : > { %v764_v26 = vsub.f32 %v762_v24, %v763_v25 }
 0x2ce   : > { %775 = vperm.xlu1 %938, %v764_v26  }
 0x345   : > { %v768_v27 = vpop.permute.xlu0 %767 }
 0x346   : > { %v770_v28 = vmul.f32 %v768_v27, %v574_v57  ;;  %v771_v29 = vmul.f32 %v768_v27, %v575_v62  ;;  %v772_v30 = vmul.f32 %v768_v27, %v576_v48 }
 0x349   : > { %v776_v31 = vpop.permute.xlu1 %775 }
 0x34a   : > { %v778_v32 = vadd.f32 %v776_v31, %v770_v28  ;;  %v779_v33 = vadd.f32 %v776_v31, %v771_v29  ;;  %v780_v34 = vadd.f32 %v776_v31, %v772_v30 }
 0x34c   : > { %v781_v35 = vmax.f32 %v778_v32, 0.0  ;;  %v782_v36 = vmax.f32 %v779_v33, 0.0  ;;  %v783_v37 = vmax.f32 %v780_v34, 0.0 }
 0x34e   : > { %v882_v38 = vpack.c.bf16 %v782_v36, %v781_v35  ;;  %v883_v39 = vpack.c.bf16 %v783_v37, %v783_v37 }
 0x350   : > { %797 = vst [vmem:[%s251_s24] sm:$0xff] %v882_v38  ;;  %799 = vst.msk [vmem:[%s251_s24 + $0x8] sm:$0xf] %vm798_vm7, %v883_v39 }
 0x351 PF: > { %s16_s21 = sadd.s32 1, %s951_s21  }
 0x352   : > { %p13_p4 = scmp.ge.s32.totalorder %s16_s21, 4  }
 0x354   :  { %15 = sbr.rel (!%p13_p4) target bundleno = 1 (0x1), region = 76 }

// kernel: unet_forward.10
= control target key start
LH: loop header
LB: loop body
LE: loop exit
PB: predicated region body
PF: predicated region fallthrough
CT: control target
= control target key end

     0   :  { %s896_s21 = smov 0   ;;  %s970_s0 = inlined_call_operand.vmem [shape: bf16[2,24,102], index: 0, kind: input, shape index: {}]   ;;  %s971_s1 = inlined_call_operand.vmem [shape: bf16[3,16,24], index: 1, kind: input, shape index: {}]   ;;  %s972_s2 = inlined_call_operand.vmem [shape: f32[16,1], index: 2, kind: input, shape index: {}]   ;;  %s973_s3 = inlined_call_operand.vmem [shape: f32[16,1], index: 3, kind: input, shape index: {}]   ;;  %s974_s4 = inlined_call_operand.vmem [shape: f32[16,16], index: 4, kind: input, shape index: {}]   ;;  %s975_s5 = inlined_call_operand.vmem [shape: f32[1,100], index: 5, kind: input, shape index: {}]   ;;  %s976_s6 = inlined_call_operand.vmem [shape: bf16[2,16,100], index: 6, kind: output, shape index: {}]  }
   0x1 LB: > { %s736_s22 = sadd.s32 4294967295, %s854_s21   ;;  %p740_p0 = scmp.ge.s32.totalorder %s854_s21, 1  ;;  %s854_s21 = sphi %s896_s21, %s16_s21  }
   0x2   : > { %p212_p1 = scmp.lt.s32.totalorder %s854_s21, 3 }
   0x4   : > { %p213_p2 = pnand %p740_p0, %p212_p1 }
   0x5   : > { %p242_p3 = scmp.lt.s32.totalorder (!%p213_p2), %s736_s22, 1  ;;  %s858_s27 = smov (!%p213_p2), 127  }
   0x6   : > { %216 = sbr.rel (%p213_p2) target bundleno = 851 (0x353), region = 44  ;;  %s859_s28 = smov (!%p213_p2), 126  }
   0xb   : > { %v856_v0 = vmov 0.0   ;;  %s978_s22 = smov (!%p242_p3, %s736_s22), 1  ;;  %vm857_vm0 = vmmov 0   ;;  %vm283_vm1 = vcmask 1043456   ;;  %v842_v4 = vld [vmem:[%s971_s1] sm:$0xff]   ;;  %vm279_vm2 = vcmask 195584  }
   0xc   : > { %785 = vmatprep.subr.bf16.mxu0 %v856_v0  ;;  %793 = vmatprep.subr.bf16.mxu1 %v856_v0  ;;  %s823_s23 = smul.u32 12, %s978_s22  ;;  %v841_v9 = vld [vmem:[%s971_s1 + $0x8] sm:$0xff]   ;;  %v843_v12 = vld [vmem:[%s971_s1 + $0x10] sm:$0xff]   ;;  %v756_v23 = vld [vmem:[%s975_s5] ss:$0 sm:$0xff]  ;;  %vm452_vm3 = vcmask 818176  }
   0xd   : > { %789 = vmatprep.mubr.msk.bf16.mxu0 %vm857_vm0, %v856_v0  ;;  %797 = vmatprep.mubr.msk.bf16.mxu1 %vm857_vm0, %v856_v0  ;;  %v467_v38 = vld [vmem:[%s974_s4] sm:$0xff]  ;;  %vm469_vm4 = vcmask 130048   ;;  %v468_v41 = vld [vmem:[%s974_s4 + $0x8] sm:$0xff]  ;;  %v860_v44 = vmov 0   ;;  %vm678_vm5 = vcmask 814080  }
   0xe   : > { %s246_s26 = scalar_lea.vmem %s970_s0, %s823_s23  ;;  %838 = vset.pattern.permute.xlu0 %v860_v44  ;;  %837 = vset.pattern.permute.xlu1 %v860_v44  ;;  %v635_v55 = vld [vmem:[%s972_s2 + $0x8] sm:$0xff]  ;;  %v634_v57 = vld [vmem:[%s972_s2] sm:$0xff] }
   0xf   : > { %v839_v1 = vld [vmem:[%s246_s26 + $0x8] ss:$0 sps:$4 sm:$0xff]   ;;  %v840_v2 = vld [vmem:[%s246_s26] sm:$0xff]  }
  0x10   : > { %276 = vrot.lane.b32.xlu0 %v839_v1, %s858_s27  ;;  %391 = vrot.lane.b32.xlu1 %v839_v1, %s859_s28  ;;  %v338_v3 = vsel %vm283_vm1, %v839_v1, 0  ;;  %v638_v61 = vld [vmem:[%s973_s3] sm:$0xff]  ;;  %v639_v1 = vld [vmem:[%s973_s3 + $0x8] sm:$0xff] }
  0x11   : > { %794 = vmatpush3.bf16.msra.mxu1 %v338_v3 }
  0x12   : > { %795 = vmatprep.subr.bf16.mxu1 %v856_v0 }
  0x14   : > { %274 = vrot.lane.b32.xlu0 %v840_v2, %s858_s27  ;;  %389 = vrot.lane.b32.xlu1 %v840_v2, %s859_s28  ;;  %s765_s27 = sshll.u32 %s978_s22, 3 }
  0x15   : > { %796 = vmatpush3.bf16.msra.mxu1 %v840_v2  ;;  %s251_s30 = scalar_lea.vmem %s976_s6, %s765_s27 }
  0x18   : > { %798 = vmatmul.mubr.msk.bf16.vlgmr.msra.gmra.mxu1 %vm279_vm2, %v842_v4 }
  0x19   : > { %813 = vmatprep.mubr.msk.f32.mxu1 %vm469_vm4, %v467_v38 }
  0x82   : > { %v277_v5 = vpop.permute.xlu0 %276  ;;  %v392_v8 = vpop.permute.xlu1 %391 }
  0x83   : > { %v285_v6 = vsel %vm283_vm1, %v277_v5, 0  ;;  %v398_v10 = vsel %vm283_vm1, %v392_v8, 0 }
  0x84   : > { %786 = vmatpush3.bf16.msra.mxu0 %v285_v6 }
  0x85   : > { %787 = vmatprep.subr.bf16.mxu0 %v856_v0 }
  0x86   : > { %v275_v7 = vpop.permute.xlu0 %274  ;;  %v390_v11 = vpop.permute.xlu1 %389 }
  0x88   : > { %788 = vmatpush3.bf16.msra.mxu0 %v275_v7 }
  0x89   : > { %801 = vmatprep.subr.bf16.mxu0 %v856_v0 }
  0x8b   : > { %790 = vmatmul.mubr.msk.bf16.vlgmr.msra.gmra.mxu0 %vm279_vm2, %v841_v9 }
  0x8c   : > { %802 = vmatpush3.bf16.msra.mxu0 %v398_v10  ;;  %805 = vmatprep.mubr.msk.bf16.mxu0 %vm857_vm0, %v856_v0 }
  0x8d   : > { %803 = vmatprep.subr.bf16.mxu0 %v856_v0 }
  0x90   : > { %804 = vmatpush3.bf16.msra.mxu0 %v390_v11 }
  0x93   : > { %806 = vmatmul.mubr.msk.bf16.vlgmr.msra.gmra.mxu0 %vm279_vm2, %v843_v12 }
  0xd8   : > { %v374_v13 = vpop.f32.mrf.mxu1 }
  0xda   : > { %v799_v14 = vpop.f32.mrf.mxu1 }
  0xdc   : > { %v377_v15 = vpop.f32.mrf.mxu1 }
  0xde   : > { %v800_v16 = vpop.f32.mrf.mxu1 }
 0x14b   : > { %v321_v17 = vpop.f32.mrf.mxu0 }
 0x14c   : > { %v375_v21 = vadd.f32 %v374_v13, %v321_v17 }
 0x14d   : > { %v791_v18 = vpop.f32.mrf.mxu0 }
 0x14f   : > { %v324_v19 = vpop.f32.mrf.mxu0 }
 0x150   : > { %v378_v26 = vadd.f32 %v377_v15, %v324_v19 }
 0x151   : > { %v792_v20 = vpop.f32.mrf.mxu0 }
 0x153   : > { %v434_v22 = vpop.f32.mrf.mxu0 }
 0x154   : > { %v931_v24 = vadd.f32 %v434_v22, %v375_v21 }
 0x155   : > { %v807_v25 = vpop.f32.mrf.mxu0 }
 0x156   : > { %v450_v27 = vmul.f32 %v756_v23, %v931_v24 }
 0x157   : > { %v437_v28 = vpop.f32.mrf.mxu0 }
 0x158   : > { %v934_v29 = vadd.f32 %v437_v28, %v378_v26  ;;  %v453_v30 = vsel %vm452_vm3, %v450_v27, 0.0  ;;  %v459_v36 = vmul.f32 %v450_v27, %v931_v24 }
 0x159   : > { %v808_v31 = vpop.f32.mrf.mxu0  ;;  %454 = vadd.xlane.f32.xlu1 %v453_v30 }
 0x15a   : > { %v451_v32 = vmul.f32 %v756_v23, %v934_v29  ;;  %v461_v37 = vsel %vm452_vm3, %v459_v36, 0.0 }
 0x15c   : > { %v456_v33 = vsel %vm452_vm3, %v451_v32, 0.0  ;;  %v460_v34 = vmul.f32 %v451_v32, %v934_v29 }
 0x15d   : > { %457 = vadd.xlane.f32.xlu0 %v456_v33 }
 0x15e   : > { %v464_v35 = vsel %vm452_vm3, %v460_v34, 0.0 }
 0x161   : > { %465 = vadd.xlane.f32.xlu0 %v464_v35 }
 0x165   : > { %462 = vadd.xlane.f32.xlu0 %v461_v37 }
 0x1e2   : > { %v455_v40 = vpop.xlane.xlu1 %454 }
 0x1e6   : > { %v458_v39 = vpop.xlane.xlu0 %457 }
 0x1e7   : > { %809 = vmatprep.subr.mxu1 %v458_v39 }
 0x1e8   : > { %810 = vmatpush3.msra.mxu1 %v458_v39 }
 0x1e9   : > { %811 = vmatprep.subr.mxu1 %v455_v40 }
 0x1ea   : > { %812 = vmatpush3.msra.mxu1 %v455_v40  ;;  %v466_v42 = vpop.xlane.xlu0 %465 }
 0x1eb   : > { %816 = vmatprep.subr.mxu1 %v466_v42  ;;  %814 = vmatmul.mubr.msk.f32.vlgmr.msra.gmra.mxu1 %vm469_vm4, %v468_v41 }
 0x1ec   : > { %817 = vmatpush3.msra.mxu1 %v466_v42  ;;  %820 = vmatprep.mubr.msk.f32.mxu1 %vm469_vm4, %v467_v38 }
 0x1ee   : > { %v463_v43 = vpop.xlane.xlu0 %462 }
 0x1ef   : > { %818 = vmatprep.subr.mxu1 %v463_v43 }
 0x1f0   : > { %819 = vmatpush3.msra.mxu1 %v463_v43 }
 0x1f1   : > { %821 = vmatmul.mubr.msk.f32.vlgmr.msra.gmra.mxu1 %vm469_vm4, %v468_v41 }
 0x2ab   : > { %v815_v45 = vpop.f32.mrf.mxu1 }
 0x2ac   : > { %v627_v47 = vmul.f32 %v815_v45, %v815_v45 }
 0x2ad   : > { %v542_v46 = vpop.f32.mrf.mxu1 }
 0x2ae   : > { %v626_v49 = vmul.f32 %v542_v46, %v542_v46 }
 0x2b1   : > { %v822_v48 = vpop.f32.mrf.mxu1 }
 0x2b2   : > { %v629_v50 = vsub.f32 %v822_v48, %v627_v47 }
 0x2b3   : > { %v617_v51 = vpop.f32.mrf.mxu1 }
 0x2b4   : > { %v631_v52 = vadd.f32 1e-05, %v629_v50  ;;  %v628_v53 = vsub.f32 %v617_v51, %v626_v49 }
 0x2b6   : > { %844 = vrsqrt.f32 %v631_v52  ;;  %v630_v54 = vadd.f32 1e-05, %v628_v53 }
 0x2b8   : > { %846 = vrsqrt.f32 %v630_v54 }
 0x2c3   : > { %v845_v56 = vpop.eup %844 }
 0x2c4   : > { %v637_v58 = vmul.f32 %v845_v56, %v635_v55 }
 0x2c5   : > { %v847_v59 = vpop.eup %846 }
 0x2c6   : > { %651 = vperm.xlu0 %838, %v637_v58   ;;  %v636_v60 = vmul.f32 %v847_v59, %v634_v57  ;;  %v641_v0 = vmul.f32 %v815_v45, %v637_v58 }
 0x2c8   : > { %646 = vperm.xlu1 %837, %v636_v60   ;;  %v640_v62 = vmul.f32 %v636_v60, %v542_v46  ;;  %v643_v2 = vsub.f32 %v639_v1, %v641_v0 }
 0x2ca   : > { %v642_v63 = vsub.f32 %v638_v61, %v640_v62 }
 0x2cc   : > { %658 = vperm.xlu1 %837, %v642_v63  }
 0x2d0   : > { %663 = vperm.xlu1 %837, %v643_v2  }
 0x341   : > { %v652_v5 = vpop.permute.xlu0 %651 }
 0x342   : > { %v655_v8 = vmul.f32 %v652_v5, %v934_v29 }
 0x343   : > { %v647_v3 = vpop.permute.xlu1 %646 }
 0x344   : > { %v654_v4 = vmul.f32 %v647_v3, %v931_v24 }
 0x347   : > { %v659_v6 = vpop.permute.xlu1 %658 }
 0x348   : > { %v666_v7 = vadd.f32 %v659_v6, %v654_v4 }
 0x34a   : > { %v668_v9 = vmax.f32 %v666_v7, 0.0 }
 0x34b   : > { %v664_v10 = vpop.permute.xlu1 %663 }
 0x34c   : > { %v766_v11 = vpack.c.bf16 %v668_v9, %v668_v9  ;;  %v667_v12 = vadd.f32 %v664_v10, %v655_v8 }
 0x34e   : > { %679 = vst.msk [vmem:[%s251_s30] sm:$0xf] %vm678_vm5, %v766_v11  ;;  %v669_v13 = vmax.f32 %v667_v12, 0.0 }
 0x350   : > { %v767_v14 = vpack.c.bf16 %v669_v13, %v669_v13 }
 0x352   : > { %680 = vst.msk [vmem:[%s251_s30 + $0x4] sm:$0xf] %vm678_vm5, %v767_v14 }
 0x353 PF: > { %s16_s21 = sadd.s32 1, %s854_s21  }
 0x354   : > { %p13_p4 = scmp.ge.s32.totalorder %s16_s21, 4  }
 0x356   :  { %15 = sbr.rel (!%p13_p4) target bundleno = 1 (0x1), region = 76 }

// kernel: unet_forward.11
= control target key start
LH: loop header
LB: loop body
LE: loop exit
PB: predicated region body
PF: predicated region fallthrough
CT: control target
= control target key end

     0   :  { %s917_s21 = smov 0   ;;  %s988_s0 = inlined_call_operand.vmem [shape: bf16[2,48,38], index: 0, kind: input, shape index: {}]   ;;  %s989_s1 = inlined_call_operand.vmem [shape: bf16[3,16,48], index: 1, kind: input, shape index: {}]   ;;  %s990_s2 = inlined_call_operand.vmem [shape: f32[16,1], index: 2, kind: input, shape index: {}]   ;;  %s991_s3 = inlined_call_operand.vmem [shape: f32[16,1], index: 3, kind: input, shape index: {}]   ;;  %s992_s4 = inlined_call_operand.vmem [shape: f32[16,16], index: 4, kind: input, shape index: {}]   ;;  %s993_s5 = inlined_call_operand.vmem [shape: f32[1,36], index: 5, kind: input, shape index: {}]   ;;  %s994_s6 = inlined_call_operand.vmem [shape: bf16[2,16,36], index: 6, kind: output, shape index: {}]  }
   0x1 LB: > { %s746_s22 = sadd.s32 4294967295, %s875_s21   ;;  %p750_p0 = scmp.ge.s32.totalorder %s875_s21, 1  ;;  %s875_s21 = sphi %s917_s21, %s16_s21  }
   0x2   : > { %p212_p1 = scmp.lt.s32.totalorder %s875_s21, 3 }
   0x4   : > { %p213_p2 = pnand %p750_p0, %p212_p1 }
   0x5   : > { %p242_p3 = scmp.lt.s32.totalorder (!%p213_p2), %s746_s22, 1  ;;  %s879_s27 = smov (!%p213_p2), 127  }
   0x6   : > { %216 = sbr.rel (%p213_p2) target bundleno = 858 (0x35a), region = 44  ;;  %s880_s28 = smov (!%p213_p2), 126  }
   0xb   : > { %v877_v0 = vmov 0.0   ;;  %s996_s22 = smov (!%p242_p3, %s746_s22), 1  ;;  %vm878_vm0 = vmmov 0   ;;  %v863_v4 = vld [vmem:[%s989_s1] sm:$0xff]   ;;  %vm293_vm1 = vcmask 392192   ;;  %v862_v8 = vld [vmem:[%s989_s1 + $0x8] sm:$0xff]  }
   0xc   : > { %799 = vmatprep.subr.bf16.mxu0 %v877_v0  ;;  %809 = vmatprep.subr.bf16.mxu1 %v877_v0  ;;  %s843_s23 = smul.u32 24, %s996_s22  ;;  %v864_v12 = vld [vmem:[%s989_s1 + $0x10] sm:$0xff]   ;;  %v767_v23 = vld [vmem:[%s993_s5] ss:$0 sm:$0xff]  ;;  %vm462_vm2 = vcmask 293888   ;;  %vm479_vm3 = vcmask 130048  }
   0xd   : > { %805 = vmatprep.mubr.msk.bf16.mxu0 %vm878_vm0, %v877_v0  ;;  %815 = vmatprep.mubr.msk.bf16.mxu1 %vm878_vm0, %v877_v0  ;;  %v477_v38 = vld [vmem:[%s992_s4] sm:$0xff]  ;;  %v478_v41 = vld [vmem:[%s992_s4 + $0x8] sm:$0xff]  ;;  %v881_v44 = vmov 0   ;;  %vm688_vm4 = vcmask 289792  }
   0xe   : > { %s246_s26 = scalar_lea.vmem %s988_s0, %s843_s23  ;;  %858 = vset.pattern.permute.xlu0 %v881_v44  ;;  %857 = vset.pattern.permute.xlu1 %v881_v44  ;;  %v645_v55 = vld [vmem:[%s990_s2 + $0x8] sm:$0xff]  ;;  %v644_v57 = vld [vmem:[%s990_s2] sm:$0xff] }
   0xf   : > { %v859_v1 = vld [vmem:[%s246_s26 + $0x10] sm:$0xff]   ;;  %v860_v2 = vld [vmem:[%s246_s26 + $0x8] sm:$0xff]   ;;  %v861_v3 = vld [vmem:[%s246_s26] sm:$0xff]  }
  0x10   : > { %288 = vrot.lane.b32.xlu0 %v859_v1, %s879_s27  ;;  %810 = vmatpush3.bf16.msra.mxu1 %v859_v1  ;;  %v648_v61 = vld [vmem:[%s991_s3] sm:$0xff] }
  0x11   : > { %811 = vmatprep.subr.bf16.mxu1 %v877_v0  ;;  %284 = vrot.lane.b32.xlu1 %v861_v3, %s879_s27 }
  0x14   : > { %286 = vrot.lane.b32.xlu0 %v860_v2, %s879_s27  ;;  %812 = vmatpush3.bf16.msra.mxu1 %v860_v2  ;;  %s776_s27 = sshll.u32 %s996_s22, 3 }
  0x15   : > { %813 = vmatprep.subr.bf16.mxu1 %v877_v0  ;;  %402 = vrot.lane.b32.xlu1 %v859_v1, %s880_s28  ;;  %v649_v1 = vld [vmem:[%s991_s3 + $0x8] sm:$0xff]  ;;  %s251_s30 = scalar_lea.vmem %s994_s6, %s776_s27 }
  0x18   : > { %400 = vrot.lane.b32.xlu0 %v860_v2, %s880_s28  ;;  %814 = vmatpush3.bf16.msra.mxu1 %v861_v3 }
  0x19   : > { %398 = vrot.lane.b32.xlu1 %v861_v3, %s880_s28 }
  0x1b   : > { %816 = vmatmul.mubr.msk.bf16.vlgmr.msra.gmra.mxu1 %vm293_vm1, %v863_v4 }
  0x1c   : > { %833 = vmatprep.mubr.msk.f32.mxu1 %vm479_vm3, %v477_v38 }
  0x82   : > { %v289_v5 = vpop.permute.xlu0 %288 }
  0x83   : > { %800 = vmatpush3.bf16.msra.mxu0 %v289_v5  ;;  %v285_v7 = vpop.permute.xlu1 %284 }
  0x84   : > { %801 = vmatprep.subr.bf16.mxu0 %v877_v0 }
  0x86   : > { %v287_v6 = vpop.permute.xlu0 %286 }
  0x87   : > { %802 = vmatpush3.bf16.msra.mxu0 %v287_v6  ;;  %v403_v9 = vpop.permute.xlu1 %402 }
  0x88   : > { %803 = vmatprep.subr.bf16.mxu0 %v877_v0 }
  0x8a   : > { %v401_v10 = vpop.permute.xlu0 %400 }
  0x8b   : > { %804 = vmatpush3.bf16.msra.mxu0 %v285_v7  ;;  %v399_v11 = vpop.permute.xlu1 %398 }
  0x8c   : > { %819 = vmatprep.subr.bf16.mxu0 %v877_v0 }
  0x8e   : > { %806 = vmatmul.mubr.msk.bf16.vlgmr.msra.gmra.mxu0 %vm293_vm1, %v862_v8 }
  0x8f   : > { %820 = vmatpush3.bf16.msra.mxu0 %v403_v9  ;;  %825 = vmatprep.mubr.msk.bf16.mxu0 %vm878_vm0, %v877_v0 }
  0x90   : > { %821 = vmatprep.subr.bf16.mxu0 %v877_v0 }
  0x93   : > { %822 = vmatpush3.bf16.msra.mxu0 %v401_v10 }
  0x94   : > { %823 = vmatprep.subr.bf16.mxu0 %v877_v0 }
  0x97   : > { %824 = vmatpush3.bf16.msra.mxu0 %v399_v11 }
  0x9a   : > { %826 = vmatmul.mubr.msk.bf16.vlgmr.msra.gmra.mxu0 %vm293_vm1, %v864_v12 }
  0xdb   : > { %v383_v13 = vpop.f32.mrf.mxu1 }
  0xdd   : > { %v817_v14 = vpop.f32.mrf.mxu1 }
  0xdf   : > { %v386_v15 = vpop.f32.mrf.mxu1 }
  0xe1   : > { %v818_v16 = vpop.f32.mrf.mxu1 }
 0x14e   : > { %v331_v17 = vpop.f32.mrf.mxu0 }
 0x14f   : > { %v384_v21 = vadd.f32 %v383_v13, %v331_v17 }
 0x150   : > { %v807_v18 = vpop.f32.mrf.mxu0 }
 0x152   : > { %v334_v19 = vpop.f32.mrf.mxu0 }
 0x153   : > { %v387_v26 = vadd.f32 %v386_v15, %v334_v19 }
 0x154   : > { %v808_v20 = vpop.f32.mrf.mxu0 }
 0x15a   : > { %v444_v22 = vpop.f32.mrf.mxu0 }
 0x15b   : > { %v949_v24 = vadd.f32 %v444_v22, %v384_v21 }
 0x15c   : > { %v827_v25 = vpop.f32.mrf.mxu0 }
 0x15d   : > { %v460_v27 = vmul.f32 %v767_v23, %v949_v24 }
 0x15e   : > { %v447_v28 = vpop.f32.mrf.mxu0 }
 0x15f   : > { %v952_v29 = vadd.f32 %v447_v28, %v387_v26  ;;  %v463_v30 = vsel %vm462_vm2, %v460_v27, 0.0  ;;  %v469_v36 = vmul.f32 %v460_v27, %v949_v24 }
 0x160   : > { %v828_v31 = vpop.f32.mrf.mxu0  ;;  %464 = vadd.xlane.f32.xlu1 %v463_v30 }
 0x161   : > { %v461_v32 = vmul.f32 %v767_v23, %v952_v29  ;;  %v471_v37 = vsel %vm462_vm2, %v469_v36, 0.0 }
 0x163   : > { %v466_v33 = vsel %vm462_vm2, %v461_v32, 0.0  ;;  %v470_v34 = vmul.f32 %v461_v32, %v952_v29 }
 0x164   : > { %467 = vadd.xlane.f32.xlu0 %v466_v33 }
 0x165   : > { %v474_v35 = vsel %vm462_vm2, %v470_v34, 0.0 }
 0x168   : > { %475 = vadd.xlane.f32.xlu0 %v474_v35 }
 0x16c   : > { %472 = vadd.xlane.f32.xlu0 %v471_v37 }
 0x1e9   : > { %v465_v40 = vpop.xlane.xlu1 %464 }
 0x1ed   : > { %v468_v39 = vpop.xlane.xlu0 %467 }
 0x1ee   : > { %829 = vmatprep.subr.mxu1 %v468_v39 }
 0x1ef   : > { %830 = vmatpush3.msra.mxu1 %v468_v39 }
 0x1f0   : > { %831 = vmatprep.subr.mxu1 %v465_v40 }
 0x1f1   : > { %832 = vmatpush3.msra.mxu1 %v465_v40  ;;  %v476_v42 = vpop.xlane.xlu0 %475 }
 0x1f2   : > { %836 = vmatprep.subr.mxu1 %v476_v42  ;;  %834 = vmatmul.mubr.msk.f32.vlgmr.msra.gmra.mxu1 %vm479_vm3, %v478_v41 }
 0x1f3   : > { %837 = vmatpush3.msra.mxu1 %v476_v42  ;;  %840 = vmatprep.mubr.msk.f32.mxu1 %vm479_vm3, %v477_v38 }
 0x1f5   : > { %v473_v43 = vpop.xlane.xlu0 %472 }
 0x1f6   : > { %838 = vmatprep.subr.mxu1 %v473_v43 }
 0x1f7   : > { %839 = vmatpush3.msra.mxu1 %v473_v43 }
 0x1f8   : > { %841 = vmatmul.mubr.msk.f32.vlgmr.msra.gmra.mxu1 %vm479_vm3, %v478_v41 }
 0x2b2   : > { %v835_v45 = vpop.f32.mrf.mxu1 }
 0x2b3   : > { %v637_v47 = vmul.f32 %v835_v45, %v835_v45 }
 0x2b4   : > { %v552_v46 = vpop.f32.mrf.mxu1 }
 0x2b5   : > { %v636_v49 = vmul.f32 %v552_v46, %v552_v46 }
 0x2b8   : > { %v842_v48 = vpop.f32.mrf.mxu1 }
 0x2b9   : > { %v639_v50 = vsub.f32 %v842_v48, %v637_v47 }
 0x2ba   : > { %v627_v51 = vpop.f32.mrf.mxu1 }
 0x2bb   : > { %v641_v52 = vadd.f32 1e-05, %v639_v50  ;;  %v638_v53 = vsub.f32 %v627_v51, %v636_v49 }
 0x2bd   : > { %865 = vrsqrt.f32 %v641_v52  ;;  %v640_v54 = vadd.f32 1e-05, %v638_v53 }
 0x2bf   : > { %867 = vrsqrt.f32 %v640_v54 }
 0x2ca   : > { %v866_v56 = vpop.eup %865 }
 0x2cb   : > { %v647_v58 = vmul.f32 %v866_v56, %v645_v55 }
 0x2cc   : > { %v868_v59 = vpop.eup %867 }
 0x2cd   : > { %661 = vperm.xlu0 %858, %v647_v58   ;;  %v646_v60 = vmul.f32 %v868_v59, %v644_v57  ;;  %v651_v0 = vmul.f32 %v835_v45, %v647_v58 }
 0x2cf   : > { %656 = vperm.xlu1 %857, %v646_v60   ;;  %v650_v62 = vmul.f32 %v646_v60, %v552_v46  ;;  %v653_v2 = vsub.f32 %v649_v1, %v651_v0 }
 0x2d1   : > { %v652_v63 = vsub.f32 %v648_v61, %v650_v62 }
 0x2d3   : > { %668 = vperm.xlu1 %857, %v652_v63  }
 0x2d7   : > { %673 = vperm.xlu1 %857, %v653_v2  }
 0x348   : > { %v662_v5 = vpop.permute.xlu0 %661 }
 0x349   : > { %v665_v8 = vmul.f32 %v662_v5, %v952_v29 }
 0x34a   : > { %v657_v3 = vpop.permute.xlu1 %656 }
 0x34b   : > { %v664_v4 = vmul.f32 %v657_v3, %v949_v24 }
 0x34e   : > { %v669_v6 = vpop.permute.xlu1 %668 }
 0x34f   : > { %v676_v7 = vadd.f32 %v669_v6, %v664_v4 }
 0x351   : > { %v678_v9 = vmax.f32 %v676_v7, 0.0 }
 0x352   : > { %v674_v10 = vpop.permute.xlu1 %673 }
 0x353   : > { %v777_v11 = vpack.c.bf16 %v678_v9, %v678_v9  ;;  %v677_v12 = vadd.f32 %v674_v10, %v665_v8 }
 0x355   : > { %689 = vst.msk [vmem:[%s251_s30] sm:$0xf] %vm688_vm4, %v777_v11  ;;  %v679_v13 = vmax.f32 %v677_v12, 0.0 }
 0x357   : > { %v778_v14 = vpack.c.bf16 %v679_v13, %v679_v13 }
 0x359   : > { %690 = vst.msk [vmem:[%s251_s30 + $0x4] sm:$0xf] %vm688_vm4, %v778_v14 }
 0x35a PF: > { %s16_s21 = sadd.s32 1, %s875_s21  }
 0x35b   : > { %p13_p4 = scmp.ge.s32.totalorder %s16_s21, 4  }
 0x35d   :  { %15 = sbr.rel (!%p13_p4) target bundleno = 1 (0x1), region = 76 }

// kernel: unet_forward.12
= control target key start
LH: loop header
LB: loop body
LE: loop exit
PB: predicated region body
PF: predicated region fallthrough
CT: control target
= control target key end

     0   :  { %s916_s21 = smov 0   ;;  %s991_s0 = inlined_call_operand.vmem [shape: bf16[2,48,18], index: 0, kind: input, shape index: {}]   ;;  %s992_s1 = inlined_call_operand.vmem [shape: bf16[3,16,48], index: 1, kind: input, shape index: {}]   ;;  %s993_s2 = inlined_call_operand.vmem [shape: f32[16,1], index: 2, kind: input, shape index: {}]   ;;  %s994_s3 = inlined_call_operand.vmem [shape: f32[16,1], index: 3, kind: input, shape index: {}]   ;;  %s995_s4 = inlined_call_operand.vmem [shape: f32[16,16], index: 4, kind: input, shape index: {}]   ;;  %s996_s5 = inlined_call_operand.vmem [shape: f32[1,16], index: 5, kind: input, shape index: {}]   ;;  %s997_s6 = inlined_call_operand.vmem [shape: bf16[2,16,16], index: 6, kind: output, shape index: {}]  }
   0x1 LB: > { %s745_s22 = sadd.s32 4294967295, %s874_s21   ;;  %p749_p0 = scmp.ge.s32.totalorder %s874_s21, 1  ;;  %s874_s21 = sphi %s916_s21, %s16_s21  }
   0x2   : > { %p212_p1 = scmp.lt.s32.totalorder %s874_s21, 3 }
   0x4   : > { %p213_p2 = pnand %p749_p0, %p212_p1 }
   0x5   : > { %p242_p3 = scmp.lt.s32.totalorder (!%p213_p2), %s745_s22, 1  ;;  %s878_s27 = smov (!%p213_p2), 127  }
   0x6   : > { %216 = sbr.rel (%p213_p2) target bundleno = 858 (0x35a), region = 44  ;;  %s879_s28 = smov (!%p213_p2), 126  }
   0xb   : > { %v876_v0 = vmov 0.0   ;;  %s999_s22 = smov (!%p242_p3, %s745_s22), 1  ;;  %vm877_vm0 = vmmov 0   ;;  %v862_v4 = vld [vmem:[%s992_s1] sm:$0xff]   ;;  %vm293_vm1 = vcmask 392192   ;;  %v861_v8 = vld [vmem:[%s992_s1 + $0x8] sm:$0xff]  }
   0xc   : > { %798 = vmatprep.subr.bf16.mxu0 %v876_v0  ;;  %808 = vmatprep.subr.bf16.mxu1 %v876_v0  ;;  %s842_s23 = smul.u32 24, %s999_s22  ;;  %v863_v12 = vld [vmem:[%s992_s1 + $0x10] sm:$0xff]   ;;  %v766_v23 = vld [vmem:[%s996_s5] ss:$0 sm:$0xff]  ;;  %vm462_vm2 = vcmask 130048   ;;  %v478_v41 = vld [vmem:[%s995_s4 + $0x8] sm:$0xff] }
   0xd   : > { %804 = vmatprep.mubr.msk.bf16.mxu0 %vm877_vm0, %v876_v0  ;;  %814 = vmatprep.mubr.msk.bf16.mxu1 %vm877_vm0, %v876_v0  ;;  %v477_v38 = vld [vmem:[%s995_s4] sm:$0xff]  ;;  %v880_v44 = vmov 0   ;;  %v644_v55 = vld [vmem:[%s993_s2 + $0x8] sm:$0xff]  ;;  %vm687_vm3 = vcmask 125952  }
   0xe   : > { %s246_s26 = scalar_lea.vmem %s991_s0, %s842_s23  ;;  %857 = vset.pattern.permute.xlu0 %v880_v44  ;;  %856 = vset.pattern.permute.xlu1 %v880_v44  ;;  %v643_v57 = vld [vmem:[%s993_s2] sm:$0xff] }
   0xf   : > { %v858_v1 = vld [vmem:[%s246_s26 + $0x10] sm:$0xff]   ;;  %v859_v2 = vld [vmem:[%s246_s26 + $0x8] sm:$0xff]   ;;  %v860_v3 = vld [vmem:[%s246_s26] sm:$0xff]  }
  0x10   : > { %288 = vrot.lane.b32.xlu0 %v858_v1, %s878_s27  ;;  %809 = vmatpush3.bf16.msra.mxu1 %v858_v1  ;;  %v647_v61 = vld [vmem:[%s994_s3] sm:$0xff] }
  0x11   : > { %810 = vmatprep.subr.bf16.mxu1 %v876_v0  ;;  %284 = vrot.lane.b32.xlu1 %v860_v3, %s878_s27 }
  0x14   : > { %286 = vrot.lane.b32.xlu0 %v859_v2, %s878_s27  ;;  %811 = vmatpush3.bf16.msra.mxu1 %v859_v2  ;;  %s775_s27 = sshll.u32 %s999_s22, 3 }
  0x15   : > { %812 = vmatprep.subr.bf16.mxu1 %v876_v0  ;;  %402 = vrot.lane.b32.xlu1 %v858_v1, %s879_s28  ;;  %v648_v1 = vld [vmem:[%s994_s3 + $0x8] sm:$0xff]  ;;  %s251_s30 = scalar_lea.vmem %s997_s6, %s775_s27 }
  0x18   : > { %400 = vrot.lane.b32.xlu0 %v859_v2, %s879_s28  ;;  %813 = vmatpush3.bf16.msra.mxu1 %v860_v3 }
  0x19   : > { %398 = vrot.lane.b32.xlu1 %v860_v3, %s879_s28 }
  0x1b   : > { %815 = vmatmul.mubr.msk.bf16.vlgmr.msra.gmra.mxu1 %vm293_vm1, %v862_v4 }
  0x1c   : > { %832 = vmatprep.mubr.msk.f32.mxu1 %vm462_vm2, %v477_v38 }
  0x82   : > { %v289_v5 = vpop.permute.xlu0 %288 }
  0x83   : > { %799 = vmatpush3.bf16.msra.mxu0 %v289_v5  ;;  %v285_v7 = vpop.permute.xlu1 %284 }
  0x84   : > { %800 = vmatprep.subr.bf16.mxu0 %v876_v0 }
  0x86   : > { %v287_v6 = vpop.permute.xlu0 %286 }
  0x87   : > { %801 = vmatpush3.bf16.msra.mxu0 %v287_v6  ;;  %v403_v9 = vpop.permute.xlu1 %402 }
  0x88   : > { %802 = vmatprep.subr.bf16.mxu0 %v876_v0 }
  0x8a   : > { %v401_v10 = vpop.permute.xlu0 %400 }
  0x8b   : > { %803 = vmatpush3.bf16.msra.mxu0 %v285_v7  ;;  %v399_v11 = vpop.permute.xlu1 %398 }
  0x8c   : > { %818 = vmatprep.subr.bf16.mxu0 %v876_v0 }
  0x8e   : > { %805 = vmatmul.mubr.msk.bf16.vlgmr.msra.gmra.mxu0 %vm293_vm1, %v861_v8 }
  0x8f   : > { %819 = vmatpush3.bf16.msra.mxu0 %v403_v9  ;;  %824 = vmatprep.mubr.msk.bf16.mxu0 %vm877_vm0, %v876_v0 }
  0x90   : > { %820 = vmatprep.subr.bf16.mxu0 %v876_v0 }
  0x93   : > { %821 = vmatpush3.bf16.msra.mxu0 %v401_v10 }
  0x94   : > { %822 = vmatprep.subr.bf16.mxu0 %v876_v0 }
  0x97   : > { %823 = vmatpush3.bf16.msra.mxu0 %v399_v11 }
  0x9a   : > { %825 = vmatmul.mubr.msk.bf16.vlgmr.msra.gmra.mxu0 %vm293_vm1, %v863_v12 }
  0xdb   : > { %v383_v13 = vpop.f32.mrf.mxu1 }
  0xdd   : > { %v816_v14 = vpop.f32.mrf.mxu1 }
  0xdf   : > { %v386_v15 = vpop.f32.mrf.mxu1 }
  0xe1   : > { %v817_v16 = vpop.f32.mrf.mxu1 }
 0x14e   : > { %v331_v17 = vpop.f32.mrf.mxu0 }
 0x14f   : > { %v384_v21 = vadd.f32 %v383_v13, %v331_v17 }
 0x150   : > { %v806_v18 = vpop.f32.mrf.mxu0 }
 0x152   : > { %v334_v19 = vpop.f32.mrf.mxu0 }
 0x153   : > { %v387_v26 = vadd.f32 %v386_v15, %v334_v19 }
 0x154   : > { %v807_v20 = vpop.f32.mrf.mxu0 }
 0x15a   : > { %v444_v22 = vpop.f32.mrf.mxu0 }
 0x15b   : > { %v948_v24 = vadd.f32 %v444_v22, %v384_v21 }
 0x15c   : > { %v826_v25 = vpop.f32.mrf.mxu0 }
 0x15d   : > { %v460_v27 = vmul.f32 %v766_v23, %v948_v24 }
 0x15e   : > { %v447_v28 = vpop.f32.mrf.mxu0 }
 0x15f   : > { %v951_v29 = vadd.f32 %v447_v28, %v387_v26  ;;  %v463_v30 = vsel %vm462_vm2, %v460_v27, 0.0  ;;  %v469_v36 = vmul.f32 %v460_v27, %v948_v24 }
 0x160   : > { %v827_v31 = vpop.f32.mrf.mxu0  ;;  %464 = vadd.xlane.f32.xlu1 %v463_v30 }
 0x161   : > { %v461_v32 = vmul.f32 %v766_v23, %v951_v29  ;;  %v471_v37 = vsel %vm462_vm2, %v469_v36, 0.0 }
 0x163   : > { %v466_v33 = vsel %vm462_vm2, %v461_v32, 0.0  ;;  %v470_v34 = vmul.f32 %v461_v32, %v951_v29 }
 0x164   : > { %467 = vadd.xlane.f32.xlu0 %v466_v33 }
 0x165   : > { %v474_v35 = vsel %vm462_vm2, %v470_v34, 0.0 }
 0x168   : > { %475 = vadd.xlane.f32.xlu0 %v474_v35 }
 0x16c   : > { %472 = vadd.xlane.f32.xlu0 %v471_v37 }
 0x1e9   : > { %v465_v40 = vpop.xlane.xlu1 %464 }
 0x1ed   : > { %v468_v39 = vpop.xlane.xlu0 %467 }
 0x1ee   : > { %828 = vmatprep.subr.mxu1 %v468_v39 }
 0x1ef   : > { %829 = vmatpush3.msra.mxu1 %v468_v39 }
 0x1f0   : > { %830 = vmatprep.subr.mxu1 %v465_v40 }
 0x1f1   : > { %831 = vmatpush3.msra.mxu1 %v465_v40  ;;  %v476_v42 = vpop.xlane.xlu0 %475 }
 0x1f2   : > { %835 = vmatprep.subr.mxu1 %v476_v42  ;;  %833 = vmatmul.mubr.msk.f32.vlgmr.msra.gmra.mxu1 %vm462_vm2, %v478_v41 }
 0x1f3   : > { %836 = vmatpush3.msra.mxu1 %v476_v42  ;;  %839 = vmatprep.mubr.msk.f32.mxu1 %vm462_vm2, %v477_v38 }
 0x1f5   : > { %v473_v43 = vpop.xlane.xlu0 %472 }
 0x1f6   : > { %837 = vmatprep.subr.mxu1 %v473_v43 }
 0x1f7   : > { %838 = vmatpush3.msra.mxu1 %v473_v43 }
 0x1f8   : > { %840 = vmatmul.mubr.msk.f32.vlgmr.msra.gmra.mxu1 %vm462_vm2, %v478_v41 }
 0x2b2   : > { %v834_v45 = vpop.f32.mrf.mxu1 }
 0x2b3   : > { %v636_v47 = vmul.f32 %v834_v45, %v834_v45 }
 0x2b4   : > { %v551_v46 = vpop.f32.mrf.mxu1 }
 0x2b5   : > { %v635_v49 = vmul.f32 %v551_v46, %v551_v46 }
 0x2b8   : > { %v841_v48 = vpop.f32.mrf.mxu1 }
 0x2b9   : > { %v638_v50 = vsub.f32 %v841_v48, %v636_v47 }
 0x2ba   : > { %v626_v51 = vpop.f32.mrf.mxu1 }
 0x2bb   : > { %v640_v52 = vadd.f32 1e-05, %v638_v50  ;;  %v637_v53 = vsub.f32 %v626_v51, %v635_v49 }
 0x2bd   : > { %864 = vrsqrt.f32 %v640_v52  ;;  %v639_v54 = vadd.f32 1e-05, %v637_v53 }
 0x2bf   : > { %866 = vrsqrt.f32 %v639_v54 }
 0x2ca   : > { %v865_v56 = vpop.eup %864 }
 0x2cb   : > { %v646_v58 = vmul.f32 %v865_v56, %v644_v55 }
 0x2cc   : > { %v867_v59 = vpop.eup %866 }
 0x2cd   : > { %660 = vperm.xlu0 %857, %v646_v58   ;;  %v645_v60 = vmul.f32 %v867_v59, %v643_v57  ;;  %v650_v0 = vmul.f32 %v834_v45, %v646_v58 }
 0x2cf   : > { %655 = vperm.xlu1 %856, %v645_v60   ;;  %v649_v62 = vmul.f32 %v645_v60, %v551_v46  ;;  %v652_v2 = vsub.f32 %v648_v1, %v650_v0 }
 0x2d1   : > { %v651_v63 = vsub.f32 %v647_v61, %v649_v62 }
 0x2d3   : > { %667 = vperm.xlu1 %856, %v651_v63  }
 0x2d7   : > { %672 = vperm.xlu1 %856, %v652_v2  }
 0x348   : > { %v661_v5 = vpop.permute.xlu0 %660 }
 0x349   : > { %v664_v8 = vmul.f32 %v661_v5, %v951_v29 }
 0x34a   : > { %v656_v3 = vpop.permute.xlu1 %655 }
 0x34b   : > { %v663_v4 = vmul.f32 %v656_v3, %v948_v24 }
 0x34e   : > { %v668_v6 = vpop.permute.xlu1 %667 }
 0x34f   : > { %v675_v7 = vadd.f32 %v668_v6, %v663_v4 }
 0x351   : > { %v677_v9 = vmax.f32 %v675_v7, 0.0 }
 0x352   : > { %v673_v10 = vpop.permute.xlu1 %672 }
 0x353   : > { %v776_v11 = vpack.c.bf16 %v677_v9, %v677_v9  ;;  %v676_v12 = vadd.f32 %v673_v10, %v664_v8 }
 0x355   : > { %688 = vst.msk [vmem:[%s251_s30] sm:$0xf] %vm687_vm3, %v776_v11  ;;  %v678_v13 = vmax.f32 %v676_v12, 0.0 }
 0x357   : > { %v777_v14 = vpack.c.bf16 %v678_v13, %v678_v13 }
 0x359   : > { %689 = vst.msk [vmem:[%s251_s30 + $0x4] sm:$0xf] %vm687_vm3, %v777_v14 }
 0x35a PF: > { %s16_s21 = sadd.s32 1, %s874_s21  }
 0x35b   : > { %p13_p4 = scmp.ge.s32.totalorder %s16_s21, 4  }
 0x35d   :  { %15 = sbr.rel (!%p13_p4) target bundleno = 1 (0x1), region = 76 }

// kernel: unet_forward.13
= control target key start
LH: loop header
LB: loop body
LE: loop exit
PB: predicated region body
PF: predicated region fallthrough
CT: control target
= control target key end

     0   :  { %v465_v0 = vmov 0.0   ;;  %vm466_vm0 = vmmov 0   ;;  %vm67_vm1 = vcmask 523264   ;;  %vm338_vm2 = vcmask 517120   ;;  %s608_s1 = inlined_call_operand.vmem [shape: bf16[64,128], index: 1, kind: input, shape index: {}]   ;;  %s609_s3 = inlined_call_operand.vmem [shape: bf16[128,128], index: 3, kind: input, shape index: {}]   ;;  %s610_s0 = inlined_call_operand.vmem [shape: bf16[2,64], index: 0, kind: input, shape index: {}]   ;;  %s611_s5 = inlined_call_operand.vmem [shape: bf16[128,64], index: 5, kind: input, shape index: {}]   ;;  %s612_s2 = inlined_call_operand.vmem [shape: f32[1,128], index: 2, kind: input, shape index: {}]   ;;  %s613_s4 = inlined_call_operand.vmem [shape: f32[1,128], index: 4, kind: input, shape index: {}]   ;;  %s614_s6 = inlined_call_operand.vmem [shape: f32[1,64], index: 6, kind: input, shape index: {}]   ;;  %s615_s7 = inlined_call_operand.vmem [shape: f32[2,64], index: 7, kind: output, shape index: {}]  }
   0x1   :  { %391 = vmatprep.subr.bf16.mxu0 %v465_v0  ;;  %v445_v1 = vld [vmem:[%s608_s1 + $0x18] sm:$0xff]   ;;  %399 = vmatprep.mubr.msk.bf16.mxu0 %vm466_vm0, %v465_v0  ;;  %v446_v2 = vld [vmem:[%s608_s1 + $0x10] sm:$0xff]   ;;  %v447_v4 = vld [vmem:[%s608_s1 + $0x8] sm:$0xff]  }
   0x2   :  { %403 = vmatprep.subr.bf16.mxu1 %v465_v0  ;;  %419 = vmatprep.mubr.msk.bf16.mxu1 %vm466_vm0, %v465_v0  ;;  %v449_v3 = vld [vmem:[%s609_s3 + $0x38] sm:$0xff]   ;;  %v450_v5 = vld [vmem:[%s609_s3 + $0x30] sm:$0xff]   ;;  %v448_v6 = vld [vmem:[%s608_s1] sm:$0xff]  }
   0x3   :  { %392 = vmatpush3.bf16.msra.mxu0 %v445_v1  ;;  %404 = vmatpush3.bf16.msra.mxu1 %v449_v3  ;;  %v451_v7 = vld [vmem:[%s609_s3 + $0x28] sm:$0xff]   ;;  %v27_v8 = vld [vmem:[%s610_s0] sm:$0x1]  ;;  %v453_v10 = vld [vmem:[%s609_s3 + $0x18] sm:$0xff]  }
   0x4   :  { %393 = vmatprep.subr.bf16.mxu0 %v465_v0  ;;  %405 = vmatprep.subr.bf16.mxu1 %v465_v0  ;;  %v452_v9 = vld [vmem:[%s609_s3 + $0x20] sm:$0xff]   ;;  %v454_v11 = vld [vmem:[%s609_s3 + $0x10] sm:$0xff]   ;;  %v455_v12 = vld [vmem:[%s609_s3 + $0x8] sm:$0xff]  }
   0x5   :  { %v456_v13 = vld [vmem:[%s609_s3] sm:$0xff]   ;;  %v457_v14 = vld [vmem:[%s611_s5 + $0x38] sm:$0xff]   ;;  %v458_v15 = vld [vmem:[%s611_s5 + $0x30] sm:$0xff]  }
   0x6   :  { %v459_v16 = vld [vmem:[%s611_s5 + $0x28] sm:$0xff]   ;;  %v460_v17 = vld [vmem:[%s611_s5 + $0x20] sm:$0xff]   ;;  %v461_v18 = vld [vmem:[%s611_s5 + $0x18] sm:$0xff]  }
   0x7   :  { %394 = vmatpush3.bf16.msra.mxu0 %v446_v2  ;;  %406 = vmatpush3.bf16.msra.mxu1 %v450_v5  ;;  %v462_v19 = vld [vmem:[%s611_s5 + $0x10] sm:$0xff]   ;;  %v344_v20 = vld [vmem:[%s612_s2] ss:$0 sm:$0xff]  ;;  %v463_v28 = vld [vmem:[%s611_s5 + $0x8] sm:$0xff]  }
   0x8   :  { %395 = vmatprep.subr.bf16.mxu0 %v465_v0  ;;  %407 = vmatprep.subr.bf16.mxu1 %v465_v0  ;;  %v464_v29 = vld [vmem:[%s611_s5] sm:$0xff]  }
   0x9   :  { %v350_v30 = vld [vmem:[%s613_s4] ss:$0 sm:$0xff] }
   0xa   :  { %v359_v38 = vld [vmem:[%s614_s6] ss:$0 sm:$0xff] }
   0xb   :  { %396 = vmatpush3.bf16.msra.mxu0 %v447_v4  ;;  %408 = vmatpush3.bf16.msra.mxu1 %v451_v7 }
   0xc   :  { %397 = vmatprep.subr.bf16.mxu0 %v465_v0  ;;  %409 = vmatprep.subr.bf16.mxu1 %v465_v0 }
   0xf   :  { %398 = vmatpush3.bf16.msra.mxu0 %v448_v6  ;;  %410 = vmatpush3.bf16.msra.mxu1 %v452_v9 }
  0x10   :  { %423 = vmatprep.subr.bf16.mxu0 %v465_v0  ;;  %411 = vmatprep.subr.bf16.mxu1 %v465_v0 }
  0x12   :  { %400 = vmatmul.mubr.msk.bf16.vlgmr.msra.gmra.mxu0 %vm67_vm1, %v27_v8 }
  0x13   :  { %439 = vmatprep.mubr.msk.bf16.mxu0 %vm466_vm0, %v465_v0  ;;  %412 = vmatpush3.bf16.msra.mxu1 %v453_v10 }
  0x14   :  { %413 = vmatprep.subr.bf16.mxu1 %v465_v0  ;;  %424 = vmatpush3.bf16.msra.mxu0 %v457_v14 }
  0x15   :  { %425 = vmatprep.subr.bf16.mxu0 %v465_v0 }
  0x17   :  { %414 = vmatpush3.bf16.msra.mxu1 %v454_v11 }
  0x18   :  { %415 = vmatprep.subr.bf16.mxu1 %v465_v0  ;;  %426 = vmatpush3.bf16.msra.mxu0 %v458_v15 }
  0x19   :  { %427 = vmatprep.subr.bf16.mxu0 %v465_v0 }
  0x1b   :  { %416 = vmatpush3.bf16.msra.mxu1 %v455_v12 }
  0x1c   :  { %417 = vmatprep.subr.bf16.mxu1 %v465_v0  ;;  %428 = vmatpush3.bf16.msra.mxu0 %v459_v16 }
  0x1d   :  { %429 = vmatprep.subr.bf16.mxu0 %v465_v0 }
  0x1f   :  { %418 = vmatpush3.bf16.msra.mxu1 %v456_v13 }
  0x20   :  { %430 = vmatpush3.bf16.msra.mxu0 %v460_v17 }
  0x21   :  { %431 = vmatprep.subr.bf16.mxu0 %v465_v0 }
  0x24   :  { %432 = vmatpush3.bf16.msra.mxu0 %v461_v18 }
  0x25   :  { %433 = vmatprep.subr.bf16.mxu0 %v465_v0 }
  0x28   :  { %434 = vmatpush3.bf16.msra.mxu0 %v462_v19 }
  0x29   :  { %435 = vmatprep.subr.bf16.mxu0 %v465_v0 }
  0x2c   :  { %436 = vmatpush3.bf16.msra.mxu0 %v463_v28 }
  0x2d   :  { %437 = vmatprep.subr.bf16.mxu0 %v465_v0 }
  0x30   :  { %438 = vmatpush3.bf16.msra.mxu0 %v464_v29 }
  0xd2   :  { %v105_v21 = vpop.f32.mrf.mxu0 }
  0xd3   :  { %v106_v22 = vadd.f32 %v344_v20, %v105_v21 }
  0xd4   :  { %v401_v23 = vpop.f32.mrf.mxu0 }
  0xd5   :  { %v111_v24 = vmax.f32 %v106_v22, 0.0 }
  0xd6   :  { %v108_v25 = vpop.f32.mrf.mxu0 }
  0xd7   :  { %v112_v26 = vpack.c.bf16 %v111_v24, %v111_v24 }
  0xd8   :  { %v402_v27 = vpop.f32.mrf.mxu0 }
  0xd9   :  { %420 = vmatmul.mubr.bf16.vlgmr.msra.gmra.mxu1 %v112_v26 }
 0x199   :  { %v218_v31 = vpop.f32.mrf.mxu1 }
 0x19a   :  { %v219_v32 = vadd.f32 %v350_v30, %v218_v31 }
 0x19b   :  { %v421_v33 = vpop.f32.mrf.mxu1 }
 0x19c   :  { %v224_v34 = vmax.f32 %v219_v32, 0.0 }
 0x19d   :  { %v221_v35 = vpop.f32.mrf.mxu1 }
 0x19e   :  { %v225_v36 = vpack.c.bf16 %v224_v34, %v224_v34 }
 0x19f   :  { %v422_v37 = vpop.f32.mrf.mxu1 }
 0x1a0   :  { %440 = vmatmul.mubr.bf16.vlgmr.msra.gmra.mxu0 %v225_v36 }
 0x260   :  { %v331_v39 = vpop.f32.mrf.mxu0 }
 0x261   :  { %v332_v40 = vadd.f32 %v359_v38, %v331_v39 }
 0x262   :  { %v441_v41 = vpop.f32.mrf.mxu0 }
 0x263   :  { %v337_v42 = vmax.f32 %v332_v40, 0.0 }
 0x264   :  { %v334_v43 = vpop.f32.mrf.mxu0 }
 0x265   :  { %339 = vst.msk [vmem:[%s615_s7] sm:$0x3] %vm338_vm2, %v337_v42 }
 0x266   :  { %v442_v44 = vpop.f32.mrf.mxu0 }

// kernel: unet_forward.14
= control target key start
LH: loop header
LB: loop body
LE: loop exit
PB: predicated region body
PF: predicated region fallthrough
CT: control target
= control target key end

     0   :  { %s1277_s27 = smov 0   ;;  %s1400_s0 = inlined_call_operand.vmem [shape: bf16[2,48,18], index: 0, kind: input, shape index: {}]   ;;  %s1401_s1 = inlined_call_operand.vmem [shape: bf16[2,48,18], index: 1, kind: input, shape index: {}]   ;;  %s1402_s2 = inlined_call_operand.vmem [shape: bf16[3,16,48], index: 2, kind: input, shape index: {}]   ;;  %s1403_s3 = inlined_call_operand.vmem [shape: bf16[3,16,48], index: 3, kind: input, shape index: {}]   ;;  %s1404_s4 = inlined_call_operand.vmem [shape: f32[16,1], index: 4, kind: input, shape index: {}]   ;;  %s1405_s5 = inlined_call_operand.vmem [shape: f32[16,1], index: 5, kind: input, shape index: {}]   ;;  %s1406_s6 = inlined_call_operand.vmem [shape: f32[16,16], index: 6, kind: input, shape index: {}]   ;;  %s1407_s7 = inlined_call_operand.vmem [shape: f32[1,16], index: 7, kind: input, shape index: {}]   ;;  %s1408_s8 = inlined_call_operand.vmem [shape: bf16[2,16,16], index: 8, kind: output, shape index: {}]  }
   0x1 LB: > { %s1034_s28 = sadd.s32 4294967295, %s1225_s27   ;;  %p1038_p0 = scmp.ge.s32.totalorder %s1225_s27, 1  ;;  %s1225_s27 = sphi %s1277_s27, %s18_s27  }
   0x2   : > { %p272_p1 = scmp.lt.s32.totalorder %s1225_s27, 3 }
   0x4   : > { %p273_p2 = pnand %p1038_p0, %p272_p1 }
   0x5   : > { %p311_p3 = scmp.lt.s32.totalorder (!%p273_p2), %s1034_s28, 1  ;;  %s1229_s11 = smov (!%p273_p2), 127  }
   0x6   : > { %276 = sbr.rel (%p273_p2) target bundleno = 872 (0x368), region = 52  ;;  %s1230_s15 = smov (!%p273_p2), 126  }
   0xb   : > { %v1227_v0 = vmov 0.0   ;;  %s1410_s28 = smov (!%p311_p3, %s1034_s28), 1  ;;  %vm1228_vm0 = vmmov 0   ;;  %v1209_v4 = vld [vmem:[%s1402_s2] sm:$0xff]   ;;  %vm367_vm1 = vcmask 392192   ;;  %v1210_v13 = vld [vmem:[%s1402_s2 + $0x8] sm:$0xff]  }
   0xc   : > { %1123 = vmatprep.subr.bf16.mxu1 %v1227_v0  ;;  %1113 = vmatprep.subr.bf16.mxu0 %v1227_v0  ;;  %s1187_s29 = smul.u32 24, %s1410_s28  ;;  %v1211_v8 = vld [vmem:[%s1403_s3] sm:$0xff]   ;;  %v1212_v19 = vld [vmem:[%s1402_s2 + $0x10] sm:$0xff]   ;;  %v1214_v24 = vld [vmem:[%s1403_s3 + $0x8] sm:$0xff]   ;;  %vm739_vm2 = vcmask 130048   ;;  %s1078_s22 = sshll.u32 %s1410_s28, 3 }
   0xd   : > { %1129 = vmatprep.mubr.msk.bf16.mxu1 %vm1228_vm0, %v1227_v0  ;;  %1119 = vmatprep.mubr.msk.bf16.mxu0 %vm1228_vm0, %v1227_v0  ;;  %v1213_v21 = vld [vmem:[%s1403_s3 + $0x10] sm:$0xff]   ;;  %v1069_v53 = vld [vmem:[%s1407_s7] ss:$0 sm:$0xff]  ;;  %s325_s25 = scalar_lea.vmem %s1408_s8, %s1078_s22  ;;  %vm964_vm3 = vcmask 125952  }
   0xe   : > { %s315_s10 = scalar_lea.vmem %s1400_s0, %s1187_s29  ;;  %s320_s14 = scalar_lea.vmem %s1401_s1, %s1187_s29 }
   0xf   : > { %v1203_v1 = vld [vmem:[%s315_s10 + $0x10] sm:$0xff]   ;;  %v1204_v2 = vld [vmem:[%s315_s10 + $0x8] sm:$0xff]   ;;  %v1205_v3 = vld [vmem:[%s315_s10] sm:$0xff]  }
  0x10   : > { %362 = vrot.lane.b32.xlu0 %v1203_v1, %s1229_s11  ;;  %1124 = vmatpush3.bf16.msra.mxu1 %v1203_v1  ;;  %v1206_v5 = vld [vmem:[%s320_s14 + $0x10] sm:$0xff]   ;;  %v1207_v6 = vld [vmem:[%s320_s14 + $0x8] sm:$0xff]   ;;  %v1208_v7 = vld [vmem:[%s320_s14] sm:$0xff]  }
  0x11   : > { %1125 = vmatprep.subr.bf16.mxu1 %v1227_v0  ;;  %358 = vrot.lane.b32.xlu1 %v1205_v3, %s1229_s11 }
  0x14   : > { %360 = vrot.lane.b32.xlu0 %v1204_v2, %s1229_s11  ;;  %1126 = vmatpush3.bf16.msra.mxu1 %v1204_v2 }
  0x15   : > { %1127 = vmatprep.subr.bf16.mxu1 %v1227_v0  ;;  %476 = vrot.lane.b32.xlu1 %v1203_v1, %s1230_s15 }
  0x18   : > { %474 = vrot.lane.b32.xlu0 %v1204_v2, %s1230_s15  ;;  %1128 = vmatpush3.bf16.msra.mxu1 %v1205_v3 }
  0x19   : > { %1143 = vmatprep.subr.bf16.mxu1 %v1227_v0  ;;  %472 = vrot.lane.b32.xlu1 %v1205_v3, %s1230_s15 }
  0x1b   : > { %1130 = vmatmul.mubr.msk.bf16.vlgmr.msra.gmra.mxu1 %vm367_vm1, %v1209_v4  ;;  %v754_v4 = vld [vmem:[%s1406_s6] sm:$0xff] }
  0x1c   : > { %616 = vrot.lane.b32.xlu0 %v1206_v5, %s1229_s11  ;;  %1144 = vmatpush3.bf16.msra.mxu1 %v1206_v5 }
  0x1d   : > { %1145 = vmatprep.subr.bf16.mxu1 %v1227_v0  ;;  %1149 = vmatprep.mubr.msk.bf16.mxu1 %vm1228_vm0, %v1227_v0 }
  0x1e   : > { %679 = vrot.lane.b32.xlu1 %v1206_v5, %s1230_s15 }
  0x20   : > { %614 = vrot.lane.b32.xlu0 %v1207_v6, %s1229_s11  ;;  %1146 = vmatpush3.bf16.msra.mxu1 %v1207_v6 }
  0x21   : > { %1147 = vmatprep.subr.bf16.mxu1 %v1227_v0 }
  0x22   : > { %677 = vrot.lane.b32.xlu1 %v1207_v6, %s1230_s15 }
  0x24   : > { %612 = vrot.lane.b32.xlu0 %v1208_v7, %s1229_s11  ;;  %1148 = vmatpush3.bf16.msra.mxu1 %v1208_v7 }
  0x25   : > { %1163 = vmatprep.subr.bf16.mxu1 %v1227_v0 }
  0x26   : > { %675 = vrot.lane.b32.xlu1 %v1208_v7, %s1230_s15  ;;  %v755_v7 = vld [vmem:[%s1406_s6 + $0x8] sm:$0xff] }
  0x27   : > { %1150 = vmatmul.mubr.msk.bf16.vlgmr.msra.gmra.mxu1 %vm367_vm1, %v1211_v8 }
  0x28   : > { %1169 = vmatprep.mubr.msk.bf16.mxu1 %vm1228_vm0, %v1227_v0 }
  0x82   : > { %v363_v9 = vpop.permute.xlu0 %362 }
  0x83   : > { %1114 = vmatpush3.bf16.msra.mxu0 %v363_v9  ;;  %v359_v10 = vpop.permute.xlu1 %358 }
  0x84   : > { %1115 = vmatprep.subr.bf16.mxu0 %v1227_v0 }
  0x86   : > { %v361_v11 = vpop.permute.xlu0 %360 }
  0x87   : > { %1116 = vmatpush3.bf16.msra.mxu0 %v361_v11  ;;  %v477_v12 = vpop.permute.xlu1 %476 }
  0x88   : > { %1117 = vmatprep.subr.bf16.mxu0 %v1227_v0 }
  0x8a   : > { %v475_v15 = vpop.permute.xlu0 %474 }
  0x8b   : > { %1118 = vmatpush3.bf16.msra.mxu0 %v359_v10  ;;  %v473_v14 = vpop.permute.xlu1 %472  ;;  %v1231_v10 = vmov 0  }
  0x8c   : > { %1133 = vmatprep.subr.bf16.mxu0 %v1227_v0  ;;  %1202 = vset.pattern.permute.xlu0 %v1231_v10 }
  0x8d   : > { %1201 = vset.pattern.permute.xlu1 %v1231_v10 }
  0x8e   : > { %1120 = vmatmul.mubr.msk.bf16.vlgmr.msra.gmra.mxu0 %vm367_vm1, %v1210_v13  ;;  %v617_v17 = vpop.permute.xlu0 %616 }
  0x8f   : > { %1134 = vmatpush3.bf16.msra.mxu0 %v477_v12  ;;  %1139 = vmatprep.mubr.msk.bf16.mxu0 %vm1228_vm0, %v1227_v0 }
  0x90   : > { %1135 = vmatprep.subr.bf16.mxu0 %v1227_v0  ;;  %v680_v16 = vpop.permute.xlu1 %679 }
  0x91   : > { %1164 = vmatpush3.bf16.msra.mxu1 %v680_v16 }
  0x92   : > { %1165 = vmatprep.subr.bf16.mxu1 %v1227_v0  ;;  %v615_v22 = vpop.permute.xlu0 %614 }
  0x93   : > { %1136 = vmatpush3.bf16.msra.mxu0 %v475_v15 }
  0x94   : > { %1137 = vmatprep.subr.bf16.mxu0 %v1227_v0  ;;  %v678_v18 = vpop.permute.xlu1 %677 }
  0x95   : > { %1166 = vmatpush3.bf16.msra.mxu1 %v678_v18 }
  0x96   : > { %1167 = vmatprep.subr.bf16.mxu1 %v1227_v0  ;;  %v613_v23 = vpop.permute.xlu0 %612 }
  0x97   : > { %1138 = vmatpush3.bf16.msra.mxu0 %v473_v14 }
  0x98   : > { %1153 = vmatprep.subr.bf16.mxu0 %v1227_v0  ;;  %v676_v20 = vpop.permute.xlu1 %675 }
  0x99   : > { %1168 = vmatpush3.bf16.msra.mxu1 %v676_v20 }
  0x9a   : > { %1140 = vmatmul.mubr.msk.bf16.vlgmr.msra.gmra.mxu0 %vm367_vm1, %v1212_v19 }
  0x9b   : > { %1154 = vmatpush3.bf16.msra.mxu0 %v617_v17  ;;  %1159 = vmatprep.mubr.msk.bf16.mxu0 %vm1228_vm0, %v1227_v0 }
  0x9c   : > { %1155 = vmatprep.subr.bf16.mxu0 %v1227_v0  ;;  %1170 = vmatmul.mubr.msk.bf16.vlgmr.msra.gmra.mxu1 %vm367_vm1, %v1213_v21  ;;  %v921_v21 = vld [vmem:[%s1404_s4 + $0x8] sm:$0xff] }
  0x9d   : > { %1184 = vmatprep.mubr.msk.f32.mxu1 %vm739_vm2, %v754_v4 }
  0x9f   : > { %1156 = vmatpush3.bf16.msra.mxu0 %v615_v22 }
  0xa0   : > { %1157 = vmatprep.subr.bf16.mxu0 %v1227_v0 }
  0xa3   : > { %1158 = vmatpush3.bf16.msra.mxu0 %v613_v23  ;;  %v920_v23 = vld [vmem:[%s1404_s4] sm:$0xff] }
  0xa6   : > { %1160 = vmatmul.mubr.msk.bf16.vlgmr.msra.gmra.mxu0 %vm367_vm1, %v1214_v24 }
  0xa7   : > { %1177 = vmatprep.mubr.msk.f32.mxu0 %vm739_vm2, %v754_v4 }
  0xdb   : > { %v457_v25 = vpop.f32.mrf.mxu1 }
  0xdd   : > { %v1131_v26 = vpop.f32.mrf.mxu1 }
  0xdf   : > { %v460_v27 = vpop.f32.mrf.mxu1 }
  0xe1   : > { %v1132_v28 = vpop.f32.mrf.mxu1 }
  0xe7   : > { %v595_v29 = vpop.f32.mrf.mxu1 }
  0xe9   : > { %v1151_v30 = vpop.f32.mrf.mxu1 }
  0xeb   : > { %v598_v31 = vpop.f32.mrf.mxu1 }
  0xed   : > { %v1152_v32 = vpop.f32.mrf.mxu1 }
 0x14e   : > { %v405_v33 = vpop.f32.mrf.mxu0 }
 0x14f   : > { %v458_v42 = vadd.f32 %v457_v25, %v405_v33 }
 0x150   : > { %v1121_v34 = vpop.f32.mrf.mxu0 }
 0x152   : > { %v408_v35 = vpop.f32.mrf.mxu0 }
 0x153   : > { %v461_v47 = vadd.f32 %v460_v27, %v408_v35  ;;  %v924_v27 = vld [vmem:[%s1405_s5] sm:$0xff] }
 0x154   : > { %v1122_v36 = vpop.f32.mrf.mxu0 }
 0x15a   : > { %v518_v37 = vpop.f32.mrf.mxu0 }
 0x15b   : > { %v525_v45 = vadd.f32 %v518_v37, %v458_v42 }
 0x15c   : > { %v1141_v38 = vpop.f32.mrf.mxu0  ;;  %v721_v39 = vpop.f32.mrf.mxu1 }
 0x15d   : > { %v602_v49 = vadd.f32 %v595_v29, %v525_v45 }
 0x15e   : > { %v521_v40 = vpop.f32.mrf.mxu0  ;;  %v1171_v41 = vpop.f32.mrf.mxu1 }
 0x15f   : > { %v526_v48 = vadd.f32 %v521_v40, %v461_v47 }
 0x160   : > { %v1142_v43 = vpop.f32.mrf.mxu0  ;;  %v724_v44 = vpop.f32.mrf.mxu1 }
 0x161   : > { %v603_v55 = vadd.f32 %v598_v31, %v526_v48  ;;  %v925_v31 = vld [vmem:[%s1405_s5 + $0x8] sm:$0xff] }
 0x162   : > { %v1172_v46 = vpop.f32.mrf.mxu1 }
 0x166   : > { %v658_v50 = vpop.f32.mrf.mxu0 }
 0x167   : > { %v665_v51 = vadd.f32 %v658_v50, %v602_v49 }
 0x168   : > { %v1161_v52 = vpop.f32.mrf.mxu0 }
 0x169   : > { %v1357_v54 = vadd.f32 %v721_v39, %v665_v51 }
 0x16a   : > { %v661_v56 = vpop.f32.mrf.mxu0 }
 0x16b   : > { %v666_v57 = vadd.f32 %v661_v56, %v603_v55  ;;  %v737_v58 = vmul.f32 %v1069_v53, %v1357_v54 }
 0x16c   : > { %v1162_v59 = vpop.f32.mrf.mxu0 }
 0x16d   : > { %v1360_v60 = vadd.f32 %v724_v44, %v666_v57  ;;  %v740_v61 = vsel %vm739_vm2, %v737_v58, 0.0  ;;  %v746_v2 = vmul.f32 %v737_v58, %v1357_v54 }
 0x16e   : > { %741 = vadd.xlane.f32.xlu1 %v740_v61 }
 0x16f   : > { %v738_v62 = vmul.f32 %v1069_v53, %v1360_v60  ;;  %v748_v3 = vsel %vm739_vm2, %v746_v2, 0.0 }
 0x171   : > { %v743_v63 = vsel %vm739_vm2, %v738_v62, 0.0  ;;  %v747_v0 = vmul.f32 %v738_v62, %v1360_v60 }
 0x172   : > { %744 = vadd.xlane.f32.xlu0 %v743_v63 }
 0x173   : > { %v751_v1 = vsel %vm739_vm2, %v747_v0, 0.0 }
 0x176   : > { %752 = vadd.xlane.f32.xlu0 %v751_v1 }
 0x17a   : > { %749 = vadd.xlane.f32.xlu0 %v748_v3 }
 0x1f7   : > { %v742_v6 = vpop.xlane.xlu1 %741 }
 0x1fb   : > { %v745_v5 = vpop.xlane.xlu0 %744 }
 0x1fc   : > { %1173 = vmatprep.subr.mxu0 %v745_v5 }
 0x1fd   : > { %1174 = vmatpush3.msra.mxu0 %v745_v5 }
 0x1fe   : > { %1175 = vmatprep.subr.mxu0 %v742_v6 }
 0x1ff   : > { %1176 = vmatpush3.msra.mxu0 %v742_v6  ;;  %v753_v8 = vpop.xlane.xlu0 %752 }
 0x200   : > { %1180 = vmatprep.subr.mxu1 %v753_v8  ;;  %1178 = vmatmul.mubr.msk.f32.vlgmr.msra.gmra.mxu0 %vm739_vm2, %v755_v7 }
 0x201   : > { %1181 = vmatpush3.msra.mxu1 %v753_v8 }
 0x203   : > { %v750_v9 = vpop.xlane.xlu0 %749 }
 0x204   : > { %1182 = vmatprep.subr.mxu1 %v750_v9 }
 0x205   : > { %1183 = vmatpush3.msra.mxu1 %v750_v9 }
 0x206   : > { %1185 = vmatmul.mubr.msk.f32.vlgmr.msra.gmra.mxu1 %vm739_vm2, %v755_v7 }
 0x2c0   : > { %v1179_v11 = vpop.f32.mrf.mxu0 }
 0x2c1   : > { %v913_v12 = vmul.f32 %v1179_v11, %v1179_v11 }
 0x2c2   : > { %v828_v13 = vpop.f32.mrf.mxu0 }
 0x2c3   : > { %v912_v15 = vmul.f32 %v828_v13, %v828_v13 }
 0x2c6   : > { %v1186_v14 = vpop.f32.mrf.mxu1 }
 0x2c7   : > { %v915_v16 = vsub.f32 %v1186_v14, %v913_v12 }
 0x2c8   : > { %v903_v17 = vpop.f32.mrf.mxu1 }
 0x2c9   : > { %v917_v18 = vadd.f32 1e-05, %v915_v16  ;;  %v914_v19 = vsub.f32 %v903_v17, %v912_v15 }
 0x2cb   : > { %1215 = vrsqrt.f32 %v917_v18  ;;  %v916_v20 = vadd.f32 1e-05, %v914_v19 }
 0x2cd   : > { %1217 = vrsqrt.f32 %v916_v20 }
 0x2d8   : > { %v1216_v22 = vpop.eup %1215 }
 0x2d9   : > { %v923_v24 = vmul.f32 %v1216_v22, %v921_v21 }
 0x2da   : > { %v1218_v25 = vpop.eup %1217 }
 0x2db   : > { %937 = vperm.xlu0 %1202, %v923_v24   ;;  %v922_v26 = vmul.f32 %v1218_v25, %v920_v23  ;;  %v927_v30 = vmul.f32 %v1179_v11, %v923_v24 }
 0x2dd   : > { %932 = vperm.xlu1 %1201, %v922_v26   ;;  %v926_v28 = vmul.f32 %v922_v26, %v828_v13  ;;  %v929_v32 = vsub.f32 %v925_v31, %v927_v30 }
 0x2df   : > { %v928_v29 = vsub.f32 %v924_v27, %v926_v28 }
 0x2e1   : > { %944 = vperm.xlu1 %1201, %v928_v29  }
 0x2e5   : > { %949 = vperm.xlu1 %1201, %v929_v32  }
 0x356   : > { %v938_v35 = vpop.permute.xlu0 %937 }
 0x357   : > { %v941_v38 = vmul.f32 %v938_v35, %v1360_v60 }
 0x358   : > { %v933_v33 = vpop.permute.xlu1 %932 }
 0x359   : > { %v940_v34 = vmul.f32 %v933_v33, %v1357_v54 }
 0x35c   : > { %v945_v36 = vpop.permute.xlu1 %944 }
 0x35d   : > { %v952_v37 = vadd.f32 %v945_v36, %v940_v34 }
 0x35f   : > { %v954_v39 = vmax.f32 %v952_v37, 0.0 }
 0x360   : > { %v950_v40 = vpop.permute.xlu1 %949 }
 0x361   : > { %v1079_v41 = vpack.c.bf16 %v954_v39, %v954_v39  ;;  %v953_v42 = vadd.f32 %v950_v40, %v941_v38 }
 0x363   : > { %965 = vst.msk [vmem:[%s325_s25] sm:$0xf] %vm964_vm3, %v1079_v41  ;;  %v955_v43 = vmax.f32 %v953_v42, 0.0 }
 0x365   : > { %v1080_v44 = vpack.c.bf16 %v955_v43, %v955_v43 }
 0x367   : > { %966 = vst.msk [vmem:[%s325_s25 + $0x4] sm:$0xf] %vm964_vm3, %v1080_v44 }
 0x368 PF: > { %s18_s27 = sadd.s32 1, %s1225_s27  }
 0x369   : > { %p15_p4 = scmp.ge.s32.totalorder %s18_s27, 4  }
 0x36b   :  { %17 = sbr.rel (!%p15_p4) target bundleno = 1 (0x1), region = 89 }

// kernel: unet_forward.15
= control target key start
LH: loop header
LB: loop body
LE: loop exit
PB: predicated region body
PF: predicated region fallthrough
CT: control target
= control target key end

     0   :  { %s1278_s27 = smov 0   ;;  %s1397_s0 = inlined_call_operand.vmem [shape: bf16[2,48,38], index: 0, kind: input, shape index: {}]   ;;  %s1398_s1 = inlined_call_operand.vmem [shape: bf16[2,48,38], index: 1, kind: input, shape index: {}]   ;;  %s1399_s2 = inlined_call_operand.vmem [shape: bf16[3,16,48], index: 2, kind: input, shape index: {}]   ;;  %s1400_s3 = inlined_call_operand.vmem [shape: bf16[3,16,48], index: 3, kind: input, shape index: {}]   ;;  %s1401_s4 = inlined_call_operand.vmem [shape: f32[16,1], index: 4, kind: input, shape index: {}]   ;;  %s1402_s5 = inlined_call_operand.vmem [shape: f32[16,1], index: 5, kind: input, shape index: {}]   ;;  %s1403_s6 = inlined_call_operand.vmem [shape: f32[16,16], index: 6, kind: input, shape index: {}]   ;;  %s1404_s7 = inlined_call_operand.vmem [shape: f32[1,36], index: 7, kind: input, shape index: {}]   ;;  %s1405_s8 = inlined_call_operand.vmem [shape: bf16[2,16,36], index: 8, kind: output, shape index: {}]  }
   0x1 LB: > { %s1035_s28 = sadd.s32 4294967295, %s1226_s27   ;;  %p1039_p0 = scmp.ge.s32.totalorder %s1226_s27, 1  ;;  %s1226_s27 = sphi %s1278_s27, %s18_s27  }
   0x2   : > { %p272_p1 = scmp.lt.s32.totalorder %s1226_s27, 3 }
   0x4   : > { %p273_p2 = pnand %p1039_p0, %p272_p1 }
   0x5   : > { %p311_p3 = scmp.lt.s32.totalorder (!%p273_p2), %s1035_s28, 1  ;;  %s1230_s11 = smov (!%p273_p2), 127  }
   0x6   : > { %276 = sbr.rel (%p273_p2) target bundleno = 872 (0x368), region = 52  ;;  %s1231_s15 = smov (!%p273_p2), 126  }
   0xb   : > { %v1228_v0 = vmov 0.0   ;;  %s1407_s28 = smov (!%p311_p3, %s1035_s28), 1  ;;  %vm1229_vm0 = vmmov 0   ;;  %v1210_v4 = vld [vmem:[%s1399_s2] sm:$0xff]   ;;  %vm367_vm1 = vcmask 392192   ;;  %v1211_v13 = vld [vmem:[%s1399_s2 + $0x8] sm:$0xff]  }
   0xc   : > { %1124 = vmatprep.subr.bf16.mxu1 %v1228_v0  ;;  %1114 = vmatprep.subr.bf16.mxu0 %v1228_v0  ;;  %s1188_s29 = smul.u32 24, %s1407_s28  ;;  %v1212_v8 = vld [vmem:[%s1400_s3] sm:$0xff]   ;;  %v1213_v19 = vld [vmem:[%s1399_s2 + $0x10] sm:$0xff]   ;;  %v1215_v24 = vld [vmem:[%s1400_s3 + $0x8] sm:$0xff]   ;;  %vm739_vm2 = vcmask 293888   ;;  %vm756_vm3 = vcmask 130048  }
   0xd   : > { %1130 = vmatprep.mubr.msk.bf16.mxu1 %vm1229_vm0, %v1228_v0  ;;  %1120 = vmatprep.mubr.msk.bf16.mxu0 %vm1229_vm0, %v1228_v0  ;;  %v1214_v21 = vld [vmem:[%s1400_s3 + $0x10] sm:$0xff]   ;;  %v1070_v53 = vld [vmem:[%s1404_s7] ss:$0 sm:$0xff]  ;;  %s1079_s22 = sshll.u32 %s1407_s28, 3  ;;  %vm965_vm4 = vcmask 289792  }
   0xe   : > { %s315_s10 = scalar_lea.vmem %s1397_s0, %s1188_s29  ;;  %s320_s14 = scalar_lea.vmem %s1398_s1, %s1188_s29 }
   0xf   : > { %v1204_v1 = vld [vmem:[%s315_s10 + $0x10] sm:$0xff]   ;;  %v1205_v2 = vld [vmem:[%s315_s10 + $0x8] sm:$0xff]   ;;  %v1206_v3 = vld [vmem:[%s315_s10] sm:$0xff]   ;;  %s325_s25 = scalar_lea.vmem %s1405_s8, %s1079_s22 }
  0x10   : > { %362 = vrot.lane.b32.xlu0 %v1204_v1, %s1230_s11  ;;  %1125 = vmatpush3.bf16.msra.mxu1 %v1204_v1  ;;  %v1207_v5 = vld [vmem:[%s320_s14 + $0x10] sm:$0xff]   ;;  %v1208_v6 = vld [vmem:[%s320_s14 + $0x8] sm:$0xff]   ;;  %v1209_v7 = vld [vmem:[%s320_s14] sm:$0xff]  }
  0x11   : > { %1126 = vmatprep.subr.bf16.mxu1 %v1228_v0  ;;  %358 = vrot.lane.b32.xlu1 %v1206_v3, %s1230_s11 }
  0x14   : > { %360 = vrot.lane.b32.xlu0 %v1205_v2, %s1230_s11  ;;  %1127 = vmatpush3.bf16.msra.mxu1 %v1205_v2 }
  0x15   : > { %1128 = vmatprep.subr.bf16.mxu1 %v1228_v0  ;;  %476 = vrot.lane.b32.xlu1 %v1204_v1, %s1231_s15 }
  0x18   : > { %474 = vrot.lane.b32.xlu0 %v1205_v2, %s1231_s15  ;;  %1129 = vmatpush3.bf16.msra.mxu1 %v1206_v3 }
  0x19   : > { %1144 = vmatprep.subr.bf16.mxu1 %v1228_v0  ;;  %472 = vrot.lane.b32.xlu1 %v1206_v3, %s1231_s15 }
  0x1b   : > { %1131 = vmatmul.mubr.msk.bf16.vlgmr.msra.gmra.mxu1 %vm367_vm1, %v1210_v4  ;;  %v754_v4 = vld [vmem:[%s1403_s6] sm:$0xff] }
  0x1c   : > { %616 = vrot.lane.b32.xlu0 %v1207_v5, %s1230_s11  ;;  %1145 = vmatpush3.bf16.msra.mxu1 %v1207_v5 }
  0x1d   : > { %1146 = vmatprep.subr.bf16.mxu1 %v1228_v0  ;;  %1150 = vmatprep.mubr.msk.bf16.mxu1 %vm1229_vm0, %v1228_v0 }
  0x1e   : > { %679 = vrot.lane.b32.xlu1 %v1207_v5, %s1231_s15 }
  0x20   : > { %614 = vrot.lane.b32.xlu0 %v1208_v6, %s1230_s11  ;;  %1147 = vmatpush3.bf16.msra.mxu1 %v1208_v6 }
  0x21   : > { %1148 = vmatprep.subr.bf16.mxu1 %v1228_v0 }
  0x22   : > { %677 = vrot.lane.b32.xlu1 %v1208_v6, %s1231_s15 }
  0x24   : > { %612 = vrot.lane.b32.xlu0 %v1209_v7, %s1230_s11  ;;  %1149 = vmatpush3.bf16.msra.mxu1 %v1209_v7 }
  0x25   : > { %1164 = vmatprep.subr.bf16.mxu1 %v1228_v0 }
  0x26   : > { %675 = vrot.lane.b32.xlu1 %v1209_v7, %s1231_s15  ;;  %v755_v7 = vld [vmem:[%s1403_s6 + $0x8] sm:$0xff] }
  0x27   : > { %1151 = vmatmul.mubr.msk.bf16.vlgmr.msra.gmra.mxu1 %vm367_vm1, %v1212_v8 }
  0x28   : > { %1170 = vmatprep.mubr.msk.bf16.mxu1 %vm1229_vm0, %v1228_v0 }
  0x82   : > { %v363_v9 = vpop.permute.xlu0 %362 }
  0x83   : > { %1115 = vmatpush3.bf16.msra.mxu0 %v363_v9  ;;  %v359_v10 = vpop.permute.xlu1 %358 }
  0x84   : > { %1116 = vmatprep.subr.bf16.mxu0 %v1228_v0 }
  0x86   : > { %v361_v11 = vpop.permute.xlu0 %360 }
  0x87   : > { %1117 = vmatpush3.bf16.msra.mxu0 %v361_v11  ;;  %v477_v12 = vpop.permute.xlu1 %476 }
  0x88   : > { %1118 = vmatprep.subr.bf16.mxu0 %v1228_v0 }
  0x8a   : > { %v475_v15 = vpop.permute.xlu0 %474 }
  0x8b   : > { %1119 = vmatpush3.bf16.msra.mxu0 %v359_v10  ;;  %v473_v14 = vpop.permute.xlu1 %472  ;;  %v1232_v10 = vmov 0  }
  0x8c   : > { %1134 = vmatprep.subr.bf16.mxu0 %v1228_v0  ;;  %1203 = vset.pattern.permute.xlu0 %v1232_v10 }
  0x8d   : > { %1202 = vset.pattern.permute.xlu1 %v1232_v10 }
  0x8e   : > { %1121 = vmatmul.mubr.msk.bf16.vlgmr.msra.gmra.mxu0 %vm367_vm1, %v1211_v13  ;;  %v617_v17 = vpop.permute.xlu0 %616 }
  0x8f   : > { %1135 = vmatpush3.bf16.msra.mxu0 %v477_v12  ;;  %1140 = vmatprep.mubr.msk.bf16.mxu0 %vm1229_vm0, %v1228_v0 }
  0x90   : > { %1136 = vmatprep.subr.bf16.mxu0 %v1228_v0  ;;  %v680_v16 = vpop.permute.xlu1 %679 }
  0x91   : > { %1165 = vmatpush3.bf16.msra.mxu1 %v680_v16 }
  0x92   : > { %1166 = vmatprep.subr.bf16.mxu1 %v1228_v0  ;;  %v615_v22 = vpop.permute.xlu0 %614 }
  0x93   : > { %1137 = vmatpush3.bf16.msra.mxu0 %v475_v15 }
  0x94   : > { %1138 = vmatprep.subr.bf16.mxu0 %v1228_v0  ;;  %v678_v18 = vpop.permute.xlu1 %677 }
  0x95   : > { %1167 = vmatpush3.bf16.msra.mxu1 %v678_v18 }
  0x96   : > { %1168 = vmatprep.subr.bf16.mxu1 %v1228_v0  ;;  %v613_v23 = vpop.permute.xlu0 %612 }
  0x97   : > { %1139 = vmatpush3.bf16.msra.mxu0 %v473_v14 }
  0x98   : > { %1154 = vmatprep.subr.bf16.mxu0 %v1228_v0  ;;  %v676_v20 = vpop.permute.xlu1 %675 }
  0x99   : > { %1169 = vmatpush3.bf16.msra.mxu1 %v676_v20 }
  0x9a   : > { %1141 = vmatmul.mubr.msk.bf16.vlgmr.msra.gmra.mxu0 %vm367_vm1, %v1213_v19 }
  0x9b   : > { %1155 = vmatpush3.bf16.msra.mxu0 %v617_v17  ;;  %1160 = vmatprep.mubr.msk.bf16.mxu0 %vm1229_vm0, %v1228_v0 }
  0x9c   : > { %1156 = vmatprep.subr.bf16.mxu0 %v1228_v0  ;;  %1171 = vmatmul.mubr.msk.bf16.vlgmr.msra.gmra.mxu1 %vm367_vm1, %v1214_v21  ;;  %v922_v21 = vld [vmem:[%s1401_s4 + $0x8] sm:$0xff] }
  0x9d   : > { %1185 = vmatprep.mubr.msk.f32.mxu1 %vm756_vm3, %v754_v4 }
  0x9f   : > { %1157 = vmatpush3.bf16.msra.mxu0 %v615_v22 }
  0xa0   : > { %1158 = vmatprep.subr.bf16.mxu0 %v1228_v0 }
  0xa3   : > { %1159 = vmatpush3.bf16.msra.mxu0 %v613_v23  ;;  %v921_v23 = vld [vmem:[%s1401_s4] sm:$0xff] }
  0xa6   : > { %1161 = vmatmul.mubr.msk.bf16.vlgmr.msra.gmra.mxu0 %vm367_vm1, %v1215_v24 }
  0xa7   : > { %1178 = vmatprep.mubr.msk.f32.mxu0 %vm756_vm3, %v754_v4 }
  0xdb   : > { %v457_v25 = vpop.f32.mrf.mxu1 }
  0xdd   : > { %v1132_v26 = vpop.f32.mrf.mxu1 }
  0xdf   : > { %v460_v27 = vpop.f32.mrf.mxu1 }
  0xe1   : > { %v1133_v28 = vpop.f32.mrf.mxu1 }
  0xe7   : > { %v595_v29 = vpop.f32.mrf.mxu1 }
  0xe9   : > { %v1152_v30 = vpop.f32.mrf.mxu1 }
  0xeb   : > { %v598_v31 = vpop.f32.mrf.mxu1 }
  0xed   : > { %v1153_v32 = vpop.f32.mrf.mxu1 }
 0x14e   : > { %v405_v33 = vpop.f32.mrf.mxu0 }
 0x14f   : > { %v458_v42 = vadd.f32 %v457_v25, %v405_v33 }
 0x150   : > { %v1122_v34 = vpop.f32.mrf.mxu0 }
 0x152   : > { %v408_v35 = vpop.f32.mrf.mxu0 }
 0x153   : > { %v461_v47 = vadd.f32 %v460_v27, %v408_v35  ;;  %v925_v27 = vld [vmem:[%s1402_s5] sm:$0xff] }
 0x154   : > { %v1123_v36 = vpop.f32.mrf.mxu0 }
 0x15a   : > { %v518_v37 = vpop.f32.mrf.mxu0 }
 0x15b   : > { %v525_v45 = vadd.f32 %v518_v37, %v458_v42 }
 0x15c   : > { %v1142_v38 = vpop.f32.mrf.mxu0  ;;  %v721_v39 = vpop.f32.mrf.mxu1 }
 0x15d   : > { %v602_v49 = vadd.f32 %v595_v29, %v525_v45 }
 0x15e   : > { %v521_v40 = vpop.f32.mrf.mxu0  ;;  %v1172_v41 = vpop.f32.mrf.mxu1 }
 0x15f   : > { %v526_v48 = vadd.f32 %v521_v40, %v461_v47 }
 0x160   : > { %v1143_v43 = vpop.f32.mrf.mxu0  ;;  %v724_v44 = vpop.f32.mrf.mxu1 }
 0x161   : > { %v603_v55 = vadd.f32 %v598_v31, %v526_v48  ;;  %v926_v31 = vld [vmem:[%s1402_s5 + $0x8] sm:$0xff] }
 0x162   : > { %v1173_v46 = vpop.f32.mrf.mxu1 }
 0x166   : > { %v658_v50 = vpop.f32.mrf.mxu0 }
 0x167   : > { %v665_v51 = vadd.f32 %v658_v50, %v602_v49 }
 0x168   : > { %v1162_v52 = vpop.f32.mrf.mxu0 }
 0x169   : > { %v1358_v54 = vadd.f32 %v721_v39, %v665_v51 }
 0x16a   : > { %v661_v56 = vpop.f32.mrf.mxu0 }
 0x16b   : > { %v666_v57 = vadd.f32 %v661_v56, %v603_v55  ;;  %v737_v58 = vmul.f32 %v1070_v53, %v1358_v54 }
 0x16c   : > { %v1163_v59 = vpop.f32.mrf.mxu0 }
 0x16d   : > { %v1361_v60 = vadd.f32 %v724_v44, %v666_v57  ;;  %v740_v61 = vsel %vm739_vm2, %v737_v58, 0.0  ;;  %v746_v2 = vmul.f32 %v737_v58, %v1358_v54 }
 0x16e   : > { %741 = vadd.xlane.f32.xlu1 %v740_v61 }
 0x16f   : > { %v738_v62 = vmul.f32 %v1070_v53, %v1361_v60  ;;  %v748_v3 = vsel %vm739_vm2, %v746_v2, 0.0 }
 0x171   : > { %v743_v63 = vsel %vm739_vm2, %v738_v62, 0.0  ;;  %v747_v0 = vmul.f32 %v738_v62, %v1361_v60 }
 0x172   : > { %744 = vadd.xlane.f32.xlu0 %v743_v63 }
 0x173   : > { %v751_v1 = vsel %vm739_vm2, %v747_v0, 0.0 }
 0x176   : > { %752 = vadd.xlane.f32.xlu0 %v751_v1 }
 0x17a   : > { %749 = vadd.xlane.f32.xlu0 %v748_v3 }
 0x1f7   : > { %v742_v6 = vpop.xlane.xlu1 %741 }
 0x1fb   : > { %v745_v5 = vpop.xlane.xlu0 %744 }
 0x1fc   : > { %1174 = vmatprep.subr.mxu0 %v745_v5 }
 0x1fd   : > { %1175 = vmatpush3.msra.mxu0 %v745_v5 }
 0x1fe   : > { %1176 = vmatprep.subr.mxu0 %v742_v6 }
 0x1ff   : > { %1177 = vmatpush3.msra.mxu0 %v742_v6  ;;  %v753_v8 = vpop.xlane.xlu0 %752 }
 0x200   : > { %1181 = vmatprep.subr.mxu1 %v753_v8  ;;  %1179 = vmatmul.mubr.msk.f32.vlgmr.msra.gmra.mxu0 %vm756_vm3, %v755_v7 }
 0x201   : > { %1182 = vmatpush3.msra.mxu1 %v753_v8 }
 0x203   : > { %v750_v9 = vpop.xlane.xlu0 %749 }
 0x204   : > { %1183 = vmatprep.subr.mxu1 %v750_v9 }
 0x205   : > { %1184 = vmatpush3.msra.mxu1 %v750_v9 }
 0x206   : > { %1186 = vmatmul.mubr.msk.f32.vlgmr.msra.gmra.mxu1 %vm756_vm3, %v755_v7 }
 0x2c0   : > { %v1180_v11 = vpop.f32.mrf.mxu0 }
 0x2c1   : > { %v914_v12 = vmul.f32 %v1180_v11, %v1180_v11 }
 0x2c2   : > { %v829_v13 = vpop.f32.mrf.mxu0 }
 0x2c3   : > { %v913_v15 = vmul.f32 %v829_v13, %v829_v13 }
 0x2c6   : > { %v1187_v14 = vpop.f32.mrf.mxu1 }
 0x2c7   : > { %v916_v16 = vsub.f32 %v1187_v14, %v914_v12 }
 0x2c8   : > { %v904_v17 = vpop.f32.mrf.mxu1 }
 0x2c9   : > { %v918_v18 = vadd.f32 1e-05, %v916_v16  ;;  %v915_v19 = vsub.f32 %v904_v17, %v913_v15 }
 0x2cb   : > { %1216 = vrsqrt.f32 %v918_v18  ;;  %v917_v20 = vadd.f32 1e-05, %v915_v19 }
 0x2cd   : > { %1218 = vrsqrt.f32 %v917_v20 }
 0x2d8   : > { %v1217_v22 = vpop.eup %1216 }
 0x2d9   : > { %v924_v24 = vmul.f32 %v1217_v22, %v922_v21 }
 0x2da   : > { %v1219_v25 = vpop.eup %1218 }
 0x2db   : > { %938 = vperm.xlu0 %1203, %v924_v24   ;;  %v923_v26 = vmul.f32 %v1219_v25, %v921_v23  ;;  %v928_v30 = vmul.f32 %v1180_v11, %v924_v24 }
 0x2dd   : > { %933 = vperm.xlu1 %1202, %v923_v26   ;;  %v927_v28 = vmul.f32 %v923_v26, %v829_v13  ;;  %v930_v32 = vsub.f32 %v926_v31, %v928_v30 }
 0x2df   : > { %v929_v29 = vsub.f32 %v925_v27, %v927_v28 }
 0x2e1   : > { %945 = vperm.xlu1 %1202, %v929_v29  }
 0x2e5   : > { %950 = vperm.xlu1 %1202, %v930_v32  }
 0x356   : > { %v939_v35 = vpop.permute.xlu0 %938 }
 0x357   : > { %v942_v38 = vmul.f32 %v939_v35, %v1361_v60 }
 0x358   : > { %v934_v33 = vpop.permute.xlu1 %933 }
 0x359   : > { %v941_v34 = vmul.f32 %v934_v33, %v1358_v54 }
 0x35c   : > { %v946_v36 = vpop.permute.xlu1 %945 }
 0x35d   : > { %v953_v37 = vadd.f32 %v946_v36, %v941_v34 }
 0x35f   : > { %v955_v39 = vmax.f32 %v953_v37, 0.0 }
 0x360   : > { %v951_v40 = vpop.permute.xlu1 %950 }
 0x361   : > { %v1080_v41 = vpack.c.bf16 %v955_v39, %v955_v39  ;;  %v954_v42 = vadd.f32 %v951_v40, %v942_v38 }
 0x363   : > { %966 = vst.msk [vmem:[%s325_s25] sm:$0xf] %vm965_vm4, %v1080_v41  ;;  %v956_v43 = vmax.f32 %v954_v42, 0.0 }
 0x365   : > { %v1081_v44 = vpack.c.bf16 %v956_v43, %v956_v43 }
 0x367   : > { %967 = vst.msk [vmem:[%s325_s25 + $0x4] sm:$0xf] %vm965_vm4, %v1081_v44 }
 0x368 PF: > { %s18_s27 = sadd.s32 1, %s1226_s27  }
 0x369   : > { %p15_p4 = scmp.ge.s32.totalorder %s18_s27, 4  }
 0x36b   :  { %17 = sbr.rel (!%p15_p4) target bundleno = 1 (0x1), region = 89 }

// kernel: unet_forward.16
= control target key start
LH: loop header
LB: loop body
LE: loop exit
PB: predicated region body
PF: predicated region fallthrough
CT: control target
= control target key end

     0   :  { %s1142_s27 = smov 0   ;;  %s1244_s0 = inlined_call_operand.vmem [shape: bf16[2,48,102], index: 0, kind: input, shape index: {}]   ;;  %s1245_s1 = inlined_call_operand.vmem [shape: bf16[2,48,102], index: 1, kind: input, shape index: {}]   ;;  %s1246_s2 = inlined_call_operand.vmem [shape: bf16[3,8,48], index: 2, kind: input, shape index: {}]   ;;  %s1247_s3 = inlined_call_operand.vmem [shape: bf16[3,8,48], index: 3, kind: input, shape index: {}]   ;;  %s1248_s4 = inlined_call_operand.vmem [shape: f32[8,1], index: 4, kind: input, shape index: {}]   ;;  %s1249_s5 = inlined_call_operand.vmem [shape: f32[8,1], index: 5, kind: input, shape index: {}]   ;;  %s1250_s6 = inlined_call_operand.vmem [shape: f32[8,8], index: 6, kind: input, shape index: {}]   ;;  %s1251_s7 = inlined_call_operand.vmem [shape: f32[1,100], index: 7, kind: input, shape index: {}]   ;;  %s1252_s8 = inlined_call_operand.vmem [shape: bf16[2,8,100], index: 8, kind: output, shape index: {}]  }
   0x1 LB: > { %s933_s28 = sadd.s32 4294967295, %s1090_s27   ;;  %p937_p0 = scmp.ge.s32.totalorder %s1090_s27, 1  ;;  %s1090_s27 = sphi %s1142_s27, %s18_s27  }
   0x2   : > { %p272_p1 = scmp.lt.s32.totalorder %s1090_s27, 3 }
   0x4   : > { %p273_p2 = pnand %p937_p0, %p272_p1 }
   0x5   : > { %p310_p3 = scmp.lt.s32.totalorder (!%p273_p2), %s933_s28, 1  ;;  %s1094_s11 = smov (!%p273_p2), 127  }
   0x6   : > { %276 = sbr.rel (%p273_p2) target bundleno = 855 (0x357), region = 52  ;;  %s1095_s15 = smov (!%p273_p2), 126  }
   0xb   : > { %v1092_v0 = vmov 0.0   ;;  %s1254_s28 = smov (!%p310_p3, %s933_s28), 1  ;;  %vm1093_vm0 = vmmov 0   ;;  %v325_v4 = vld [vmem:[%s1246_s2] sm:$0xf]  ;;  %vm358_vm1 = vcmask 392192  }
   0xc   : > { %1000 = vmatprep.subr.bf16.mxu1 %v1092_v0  ;;  %990 = vmatprep.subr.bf16.mxu0 %v1092_v0  ;;  %s1060_s29 = smul.u32 24, %s1254_s28  ;;  %v503_v8 = vld [vmem:[%s1247_s3] sm:$0xf]  ;;  %v941_v13 = vld [vmem:[%s1246_s2 + $0x4] sm:$0xf]  ;;  %vm690_vm2 = vcmask 818176  }
   0xd   : > { %1006 = vmatprep.mubr.msk.bf16.mxu1 %vm1093_vm0, %v1092_v0  ;;  %996 = vmatprep.mubr.msk.bf16.mxu0 %vm1093_vm0, %v1092_v0  ;;  %v947_v19 = vld [vmem:[%s1246_s2 + $0x8] sm:$0xf]  ;;  %v953_v24 = vld [vmem:[%s1247_s3 + $0x4] sm:$0xf]  ;;  %v957_v51 = vld [vmem:[%s1251_s7] ss:$0 sm:$0xff] }
   0xe   : > { %s314_s10 = scalar_lea.vmem %s1244_s0, %s1060_s29  ;;  %s319_s14 = scalar_lea.vmem %s1245_s1, %s1060_s29  ;;  %v955_v21 = vld [vmem:[%s1247_s3 + $0x8] sm:$0xf]  ;;  %v698_v59 = vld [vmem:[%s1250_s6] sm:$0xff]  ;;  %vm699_vm3 = vcmask 64512   ;;  %v1096_v62 = vmov 0   ;;  %vm866_vm4 = vcmask 814080  }
   0xf   : > { %v1076_v1 = vld [vmem:[%s314_s10 + $0x10] sm:$0xff]   ;;  %v1077_v2 = vld [vmem:[%s314_s10 + $0x8] sm:$0xff]   ;;  %v1078_v3 = vld [vmem:[%s314_s10] sm:$0xff]   ;;  %1074 = vset.pattern.permute.xlu0 %v1096_v62  ;;  %1075 = vset.pattern.permute.xlu1 %v1096_v62  ;;  %s940_s16 = sshll.u32 %s1254_s28, 2 }
  0x10   : > { %353 = vrot.lane.b32.xlu0 %v1076_v1, %s1094_s11  ;;  %1001 = vmatpush3.bf16.msra.mxu1 %v1076_v1  ;;  %v1079_v5 = vld [vmem:[%s319_s14 + $0x10] sm:$0xff]   ;;  %v1080_v6 = vld [vmem:[%s319_s14 + $0x8] sm:$0xff]   ;;  %v1081_v7 = vld [vmem:[%s319_s14] sm:$0xff]   ;;  %s323_s19 = scalar_lea.vmem %s1252_s8, %s940_s16 }
  0x11   : > { %1002 = vmatprep.subr.bf16.mxu1 %v1092_v0  ;;  %349 = vrot.lane.b32.xlu1 %v1078_v3, %s1094_s11 }
  0x14   : > { %351 = vrot.lane.b32.xlu0 %v1077_v2, %s1094_s11  ;;  %1003 = vmatpush3.bf16.msra.mxu1 %v1077_v2 }
  0x15   : > { %1004 = vmatprep.subr.bf16.mxu1 %v1092_v0  ;;  %454 = vrot.lane.b32.xlu1 %v1076_v1, %s1095_s15 }
  0x18   : > { %452 = vrot.lane.b32.xlu0 %v1077_v2, %s1095_s15  ;;  %1005 = vmatpush3.bf16.msra.mxu1 %v1078_v3 }
  0x19   : > { %1020 = vmatprep.subr.bf16.mxu1 %v1092_v0  ;;  %450 = vrot.lane.b32.xlu1 %v1078_v3, %s1095_s15 }
  0x1b   : > { %1007 = vmatmul.mubr.msk.bf16.vlgmr.msra.gmra.mxu1 %vm358_vm1, %v325_v4 }
  0x1c   : > { %578 = vrot.lane.b32.xlu0 %v1079_v5, %s1094_s11  ;;  %1021 = vmatpush3.bf16.msra.mxu1 %v1079_v5 }
  0x1d   : > { %1022 = vmatprep.subr.bf16.mxu1 %v1092_v0  ;;  %1026 = vmatprep.mubr.msk.bf16.mxu1 %vm1093_vm0, %v1092_v0 }
  0x1e   : > { %633 = vrot.lane.b32.xlu1 %v1079_v5, %s1095_s15 }
  0x20   : > { %576 = vrot.lane.b32.xlu0 %v1080_v6, %s1094_s11  ;;  %1023 = vmatpush3.bf16.msra.mxu1 %v1080_v6 }
  0x21   : > { %1024 = vmatprep.subr.bf16.mxu1 %v1092_v0 }
  0x22   : > { %631 = vrot.lane.b32.xlu1 %v1080_v6, %s1095_s15  ;;  %v847_v6 = vld [vmem:[%s1248_s4] sm:$0xff] }
  0x24   : > { %574 = vrot.lane.b32.xlu0 %v1081_v7, %s1094_s11  ;;  %1025 = vmatpush3.bf16.msra.mxu1 %v1081_v7 }
  0x25   : > { %1040 = vmatprep.subr.bf16.mxu1 %v1092_v0 }
  0x26   : > { %629 = vrot.lane.b32.xlu1 %v1081_v7, %s1095_s15 }
  0x27   : > { %1027 = vmatmul.mubr.msk.bf16.vlgmr.msra.gmra.mxu1 %vm358_vm1, %v503_v8 }
  0x28   : > { %1046 = vmatprep.mubr.msk.bf16.mxu1 %vm1093_vm0, %v1092_v0 }
  0x82   : > { %v354_v9 = vpop.permute.xlu0 %353 }
  0x83   : > { %991 = vmatpush3.bf16.msra.mxu0 %v354_v9  ;;  %v350_v10 = vpop.permute.xlu1 %349  ;;  %v849_v9 = vld [vmem:[%s1249_s5] sm:$0xff] }
  0x84   : > { %992 = vmatprep.subr.bf16.mxu0 %v1092_v0 }
  0x86   : > { %v352_v11 = vpop.permute.xlu0 %351 }
  0x87   : > { %993 = vmatpush3.bf16.msra.mxu0 %v352_v11  ;;  %v455_v12 = vpop.permute.xlu1 %454 }
  0x88   : > { %994 = vmatprep.subr.bf16.mxu0 %v1092_v0 }
  0x8a   : > { %v453_v15 = vpop.permute.xlu0 %452 }
  0x8b   : > { %995 = vmatpush3.bf16.msra.mxu0 %v350_v10  ;;  %v451_v14 = vpop.permute.xlu1 %450 }
  0x8c   : > { %1010 = vmatprep.subr.bf16.mxu0 %v1092_v0 }
  0x8e   : > { %997 = vmatmul.mubr.msk.bf16.vlgmr.msra.gmra.mxu0 %vm358_vm1, %v941_v13  ;;  %v579_v17 = vpop.permute.xlu0 %578 }
  0x8f   : > { %1011 = vmatpush3.bf16.msra.mxu0 %v455_v12  ;;  %1016 = vmatprep.mubr.msk.bf16.mxu0 %vm1093_vm0, %v1092_v0 }
  0x90   : > { %1012 = vmatprep.subr.bf16.mxu0 %v1092_v0  ;;  %v634_v16 = vpop.permute.xlu1 %633 }
  0x91   : > { %1041 = vmatpush3.bf16.msra.mxu1 %v634_v16 }
  0x92   : > { %1042 = vmatprep.subr.bf16.mxu1 %v1092_v0  ;;  %v577_v22 = vpop.permute.xlu0 %576 }
  0x93   : > { %1013 = vmatpush3.bf16.msra.mxu0 %v453_v15 }
  0x94   : > { %1014 = vmatprep.subr.bf16.mxu0 %v1092_v0  ;;  %v632_v18 = vpop.permute.xlu1 %631 }
  0x95   : > { %1043 = vmatpush3.bf16.msra.mxu1 %v632_v18 }
  0x96   : > { %1044 = vmatprep.subr.bf16.mxu1 %v1092_v0  ;;  %v575_v23 = vpop.permute.xlu0 %574 }
  0x97   : > { %1015 = vmatpush3.bf16.msra.mxu0 %v451_v14 }
  0x98   : > { %1030 = vmatprep.subr.bf16.mxu0 %v1092_v0  ;;  %v630_v20 = vpop.permute.xlu1 %629 }
  0x99   : > { %1045 = vmatpush3.bf16.msra.mxu1 %v630_v20 }
  0x9a   : > { %1017 = vmatmul.mubr.msk.bf16.vlgmr.msra.gmra.mxu0 %vm358_vm1, %v947_v19  ;;  %1055 = vmatprep.subr.mxu1 %v1092_v0 }
  0x9b   : > { %1031 = vmatpush3.bf16.msra.mxu0 %v579_v17  ;;  %1036 = vmatprep.mubr.msk.bf16.mxu0 %vm1093_vm0, %v1092_v0 }
  0x9c   : > { %1032 = vmatprep.subr.bf16.mxu0 %v1092_v0  ;;  %1047 = vmatmul.mubr.msk.bf16.vlgmr.msra.gmra.mxu1 %vm358_vm1, %v955_v21 }
  0x9d   : > { %1057 = vmatprep.mubr.msk.f32.mxu1 %vm1093_vm0, %v1092_v0 }
  0x9f   : > { %1033 = vmatpush3.bf16.msra.mxu0 %v577_v22 }
  0xa0   : > { %1034 = vmatprep.subr.bf16.mxu0 %v1092_v0 }
  0xa3   : > { %1035 = vmatpush3.bf16.msra.mxu0 %v575_v23 }
  0xa4   : > { %1050 = vmatprep.subr.mxu0 %v1092_v0 }
  0xa6   : > { %1037 = vmatmul.mubr.msk.bf16.vlgmr.msra.gmra.mxu0 %vm358_vm1, %v953_v24 }
  0xa7   : > { %1052 = vmatprep.mubr.msk.f32.mxu0 %vm1093_vm0, %v1092_v0 }
  0xdb   : > { %v442_v25 = vpop.f32.mrf.mxu1 }
  0xdd   : > { %v1008_v26 = vpop.f32.mrf.mxu1 }
  0xdf   : > { %v445_v27 = vpop.f32.mrf.mxu1 }
  0xe1   : > { %v1009_v28 = vpop.f32.mrf.mxu1 }
  0xe7   : > { %v565_v29 = vpop.f32.mrf.mxu1 }
  0xe9   : > { %v1028_v30 = vpop.f32.mrf.mxu1 }
  0xeb   : > { %v568_v31 = vpop.f32.mrf.mxu1 }
  0xed   : > { %v1029_v32 = vpop.f32.mrf.mxu1 }
 0x14e   : > { %v396_v33 = vpop.f32.mrf.mxu0 }
 0x14f   : > { %v443_v42 = vadd.f32 %v442_v25, %v396_v33 }
 0x150   : > { %v998_v34 = vpop.f32.mrf.mxu0 }
 0x152   : > { %v399_v35 = vpop.f32.mrf.mxu0 }
 0x154   : > { %v999_v36 = vpop.f32.mrf.mxu0 }
 0x15a   : > { %v496_v37 = vpop.f32.mrf.mxu0 }
 0x15b   : > { %v502_v45 = vadd.f32 %v496_v37, %v443_v42 }
 0x15c   : > { %v1018_v38 = vpop.f32.mrf.mxu0  ;;  %v675_v39 = vpop.f32.mrf.mxu1 }
 0x15d   : > { %v571_v47 = vadd.f32 %v565_v29, %v502_v45 }
 0x15e   : > { %v499_v40 = vpop.f32.mrf.mxu0  ;;  %v1048_v41 = vpop.f32.mrf.mxu1 }
 0x160   : > { %v1019_v43 = vpop.f32.mrf.mxu0  ;;  %v678_v44 = vpop.f32.mrf.mxu1 }
 0x162   : > { %v1049_v46 = vpop.f32.mrf.mxu1 }
 0x166   : > { %v620_v48 = vpop.f32.mrf.mxu0 }
 0x167   : > { %v626_v49 = vadd.f32 %v620_v48, %v571_v47 }
 0x168   : > { %v1038_v50 = vpop.f32.mrf.mxu0 }
 0x169   : > { %v681_v52 = vadd.f32 %v675_v39, %v626_v49 }
 0x16a   : > { %v623_v53 = vpop.f32.mrf.mxu0 }
 0x16b   : > { %v689_v54 = vmul.f32 %v957_v51, %v681_v52 }
 0x16c   : > { %v1039_v55 = vpop.f32.mrf.mxu0 }
 0x16d   : > { %v691_v56 = vsel %vm690_vm2, %v689_v54, 0.0  ;;  %v694_v57 = vmul.f32 %v689_v54, %v681_v52 }
 0x16e   : > { %692 = vadd.xlane.f32.xlu0 %v691_v56 }
 0x16f   : > { %v695_v58 = vsel %vm690_vm2, %v694_v57, 0.0 }
 0x170   : > { %696 = vadd.xlane.f32.xlu1 %v695_v58 }
 0x1f7   : > { %v693_v60 = vpop.xlane.xlu0 %692 }
 0x1f8   : > { %1051 = vmatpush3.msra.mxu0 %v693_v60 }
 0x1f9   : > { %v697_v61 = vpop.xlane.xlu1 %696  ;;  %1053 = vmatmul.mubr.msk.f32.vlgmr.msra.gmra.mxu0 %vm699_vm3, %v698_v59 }
 0x1fa   : > { %1056 = vmatpush3.msra.mxu1 %v697_v61 }
 0x1fb   : > { %1058 = vmatmul.mubr.msk.f32.vlgmr.msra.gmra.mxu1 %vm699_vm3, %v698_v59 }
 0x2b9   : > { %v769_v63 = vpop.f32.mrf.mxu0 }
 0x2ba   : > { %v843_v0 = vmul.f32 %v769_v63, %v769_v63 }
 0x2bb   : > { %v839_v1 = vpop.f32.mrf.mxu1  ;;  %v1054_v2 = vpop.f32.mrf.mxu0 }
 0x2bc   : > { %v844_v3 = vsub.f32 %v839_v1, %v843_v0 }
 0x2bd   : > { %v1059_v4 = vpop.f32.mrf.mxu1 }
 0x2be   : > { %v845_v5 = vadd.f32 1e-05, %v844_v3 }
 0x2c0   : > { %1082 = vrsqrt.f32 %v845_v5 }
 0x2cd   : > { %v1083_v7 = vpop.eup %1082 }
 0x2ce   : > { %v848_v8 = vmul.f32 %v1083_v7, %v847_v6 }
 0x2d0   : > { %854 = vperm.xlu0 %1074, %v848_v8   ;;  %v850_v10 = vmul.f32 %v848_v8, %v769_v63 }
 0x2d2   : > { %v851_v11 = vsub.f32 %v849_v9, %v850_v10 }
 0x2d4   : > { %860 = vperm.xlu1 %1075, %v851_v11  }
 0x34b   : > { %v855_v12 = vpop.permute.xlu0 %854 }
 0x34c   : > { %v857_v13 = vmul.f32 %v855_v12, %v681_v52 }
 0x34f   : > { %v861_v14 = vpop.permute.xlu1 %860 }
 0x350   : > { %v863_v15 = vadd.f32 %v861_v14, %v857_v13 }
 0x352   : > { %v864_v16 = vmax.f32 %v863_v15, 0.0 }
 0x354   : > { %v865_v17 = vpack.c.bf16 %v864_v16, %v864_v16 }
 0x356   : > { %867 = vst.msk [vmem:[%s323_s19] sm:$0xf] %vm866_vm4, %v865_v17 }
 0x357 PF: > { %s18_s27 = sadd.s32 1, %s1090_s27  }
 0x358   : > { %p15_p4 = scmp.ge.s32.totalorder %s18_s27, 4  }
 0x35a   :  { %17 = sbr.rel (!%p15_p4) target bundleno = 1 (0x1), region = 89 }

// kernel: unet_forward.17
= control target key start
LH: loop header
LB: loop body
LE: loop exit
PB: predicated region body
PF: predicated region fallthrough
CT: control target
= control target key end

     0   :  { %s1541_s27 = smov 0   ;;  %s1761_s0 = inlined_call_operand.vmem [shape: bf16[2,24,326], index: 0, kind: input, shape index: {}]   ;;  %s1762_s1 = inlined_call_operand.vmem [shape: bf16[2,24,326], index: 1, kind: input, shape index: {}]   ;;  %s1763_s2 = inlined_call_operand.vmem [shape: bf16[3,8,24], index: 2, kind: input, shape index: {}]   ;;  %s1764_s3 = inlined_call_operand.vmem [shape: bf16[3,8,24], index: 3, kind: input, shape index: {}]   ;;  %s1765_s4 = inlined_call_operand.vmem [shape: f32[8,1], index: 4, kind: input, shape index: {}]   ;;  %s1766_s5 = inlined_call_operand.vmem [shape: f32[8,1], index: 5, kind: input, shape index: {}]   ;;  %s1767_s6 = inlined_call_operand.vmem [shape: f32[8,8], index: 6, kind: input, shape index: {}]   ;;  %s1768_s7 = inlined_call_operand.vmem [shape: f32[1,324], index: 7, kind: input, shape index: {}]   ;;  %s1769_s8 = inlined_call_operand.vmem [shape: f32[2,8,324], index: 8, kind: output, shape index: {}]  }
   0x1 LB: > { %s1324_s28 = sadd.s32 4294967295, %s1489_s27   ;;  %p1328_p0 = scmp.ge.s32.totalorder %s1489_s27, 1  ;;  %s1489_s27 = sphi %s1541_s27, %s18_s27  }
   0x2   : > { %p272_p1 = scmp.lt.s32.totalorder %s1489_s27, 3 }
   0x4   : > { %p273_p2 = pnand %p1328_p0, %p272_p1 }
   0x5   : > { %p311_p3 = scmp.lt.s32.totalorder (!%p273_p2), %s1324_s28, 1  ;;  %s1493_s11 = smov (!%p273_p2), 127  }
   0x6   : > { %276 = sbr.rel (%p273_p2) target bundleno = 877 (0x36d), region = 52  ;;  %s1495_s15 = smov (!%p273_p2), 126  }
   0xb   : > { %v1491_v0 = vmov 0.0   ;;  %s1771_s28 = smov (!%p311_p3, %s1324_s28), 1  ;;  %vm1492_vm0 = vmmov 0   ;;  %v1494_v5 = vmov 0   ;;  %vm381_vm1 = vcmask 1043456  }
   0xc   : > { %1392 = vmatprep.subr.bf16.mxu1 %v1491_v0  ;;  %s1450_s29 = smul.u32 36, %s1771_s28  ;;  %1396 = vmatprep.mubr.msk.bf16.mxu1 %vm1492_vm0, %v1491_v0  ;;  %vm369_vm2 = vcmask 1039360   ;;  %v1332_v27 = vld [vmem:[%s1763_s2 + $0x4] sm:$0xf]  ;;  %vm377_vm3 = vcmask 195584   ;;  %vm582_vm4 = vcmask 1031168  }
   0xd   : > { %423 = vmatprep.mubr.bf16.mxu0 %v1494_v5  ;;  %1466 = vset.pattern.permute.xlu1 %v1494_v5  ;;  %v327_v36 = vld [vmem:[%s1763_s2] sm:$0xf]  ;;  %v1345_v45 = vld [vmem:[%s1763_s2 + $0x8] sm:$0xf]  ;;  %vm1068_vm5 = vcmask 556032   ;;  %vm1082_vm6 = vcmask 64512  }
   0xe   : > { %s315_s10 = scalar_lea.vmem %s1761_s0, %s1450_s29  ;;  %s1569_s14 = scalar_lea.vmem %s1762_s1, %s1450_s29  ;;  %1465 = vset.pattern.permute.xlu0 %v1494_v5  ;;  %v686_v53 = vld [vmem:[%s1764_s3] sm:$0xf] }
   0xf   : > { %v1556_v1 = vld [vmem:[%s315_s10 + $0x20] ss:$0 sps:$4 sm:$0xff]   ;;  %v332_v2 = vld [vmem:[%s315_s10 + $0x18] sm:$0xff]  ;;  %v1564_v4 = vld [vmem:[%s315_s10 + $0x4] ss:$12 sps:$4 sm:$0xff]   ;;  %s1451_s16 = smul.u32 24, %s1771_s28 }
  0x10   : > { %v1560_v3 = vcombine.low %v332_v2, %v332_v2  ;;  %367 = vrot.lane.b32.xlu1 %v1556_v1, %s1493_s11  ;;  %v1574_v6 = vcombine.high %v332_v2, %v332_v2  ;;  %v1580_v7 = vld [vmem:[%s315_s10] ss:$12 sps:$4 sm:$0xff]   ;;  %v1584_v8 = vld [vmem:[%s315_s10 + $0x8] ss:$12 sps:$4 sm:$0xff]   ;;  %v691_v9 = vld [vmem:[%s1569_s14 + $0x18] sm:$0xff]  ;;  %v485_v29 = vsel %vm381_vm1, %v1556_v1, 0 }
  0x11   : > { %v1596_v10 = vcombine.high %v691_v9, %v691_v9  ;;  %v1599_v11 = vcombine.low %v691_v9, %v691_v9  ;;  %v1604_v12 = vld [vmem:[%s1569_s14 + $0x4] ss:$12 sps:$4 sm:$0xff]   ;;  %v1609_v13 = vld [vmem:[%s1569_s14 + $0x20] ss:$0 sps:$4 sm:$0xff]   ;;  %v1619_v15 = vld [vmem:[%s1569_s14 + $0x8] ss:$12 sps:$4 sm:$0xff]   ;;  %s325_s19 = scalar_lea.vmem %s1769_s8, %s1451_s16 }
  0x12   : > { %363 = vrot.lane.b32.xlu0 %v1560_v3, %s1493_s11  ;;  %v1614_v14 = vld [vmem:[%s1569_s14] ss:$12 sps:$4 sm:$0xff]   ;;  %v479_v32 = vsel %vm381_vm1, %v1560_v3, 0  ;;  %v727_v47 = vsel %vm381_vm1, %v1609_v13, 0 }
  0x13   : > { %v721_v50 = vsel %vm381_vm1, %v1599_v11, 0 }
  0x14   : > { %359 = vrot.lane.b32.xlu1 %v1564_v4, %s1493_s11 }
  0x16   : > { %365 = vrot.lane.b32.xlu0 %v1574_v6, %s1493_s11 }
  0x18   : > { %357 = vrot.lane.b32.xlu1 %v1580_v7, %s1493_s11 }
  0x1a   : > { %361 = vrot.lane.b32.xlu0 %v1584_v8, %s1493_s11 }
  0x1c   : > { %578 = vrot.lane.b32.xlu1 %v1574_v6, %s1495_s15 }
  0x1e   : > { %576 = vrot.lane.b32.xlu0 %v1560_v3, %s1495_s15 }
  0x20   : > { %572 = vrot.lane.b32.xlu1 %v1564_v4, %s1495_s15 }
  0x22   : > { %580 = vrot.lane.b32.xlu0 %v1556_v1, %s1495_s15  ;;  %v1358_v1 = vld [vmem:[%s1764_s3 + $0x4] sm:$0xf] }
  0x24   : > { %570 = vrot.lane.b32.xlu1 %v1580_v7, %s1495_s15 }
  0x26   : > { %574 = vrot.lane.b32.xlu0 %v1584_v8, %s1495_s15 }
  0x28   : > { %823 = vrot.lane.b32.xlu1 %v1596_v10, %s1493_s11 }
  0x2a   : > { %821 = vrot.lane.b32.xlu0 %v1599_v11, %s1493_s11 }
  0x2c   : > { %817 = vrot.lane.b32.xlu1 %v1604_v12, %s1493_s11 }
  0x2e   : > { %825 = vrot.lane.b32.xlu0 %v1609_v13, %s1493_s11 }
  0x30   : > { %815 = vrot.lane.b32.xlu1 %v1614_v14, %s1493_s11 }
  0x32   : > { %819 = vrot.lane.b32.xlu0 %v1619_v15, %s1493_s11 }
  0x34   : > { %940 = vrot.lane.b32.xlu1 %v1596_v10, %s1495_s15 }
  0x36   : > { %938 = vrot.lane.b32.xlu0 %v1599_v11, %s1495_s15 }
  0x38   : > { %934 = vrot.lane.b32.xlu1 %v1604_v12, %s1495_s15 }
  0x3a   : > { %942 = vrot.lane.b32.xlu0 %v1609_v13, %s1495_s15 }
  0x3c   : > { %932 = vrot.lane.b32.xlu1 %v1614_v14, %s1495_s15 }
  0x3e   : > { %936 = vrot.lane.b32.xlu0 %v1619_v15, %s1495_s15 }
  0x82   : > { %v368_v16 = vpop.permute.xlu1 %367 }
  0x83   : > { %v389_v18 = vsel %vm381_vm1, %v368_v16, 0 }
  0x84   : > { %v364_v17 = vpop.permute.xlu0 %363  ;;  %1393 = vmatpush3.bf16.msra.mxu1 %v389_v18 }
  0x85   : > { %1394 = vmatprep.subr.bf16.mxu1 %v1491_v0 }
  0x86   : > { %v360_v19 = vpop.permute.xlu1 %359 }
  0x88   : > { %v366_v20 = vpop.permute.xlu0 %365 }
  0x89   : > { %v373_v21 = vsel %vm369_vm2, %v366_v20, %v368_v16  ;;  %v372_v22 = vsel %vm369_vm2, %v364_v17, %v366_v20 }
  0x8a   : > { %1339 = vmatprep.subr.msk.bf16.mxu0 %vm381_vm1, %v373_v21  ;;  %v383_v23 = vsel %vm381_vm1, %v372_v22, 0  ;;  %v358_v24 = vpop.permute.xlu1 %357 }
  0x8b   : > { %404 = vmatpush1.bf16.msra.mxu0 %v383_v23  ;;  %v370_v28 = vsel %vm369_vm2, %v358_v24, %v360_v19 }
  0x8c   : > { %v362_v25 = vpop.permute.xlu0 %361 }
  0x8d   : > { %1395 = vmatpush3.bf16.msra.mxu1 %v362_v25  ;;  %v371_v26 = vsel %vm369_vm2, %v360_v19, %v362_v25 }
  0x8e   : > { %405 = vmatprep.subr.bf16.mxu0 %v371_v26  ;;  %1400 = vmatprep.subr.bf16.mxu1 %v1491_v0  ;;  %v579_v30 = vpop.permute.xlu1 %578 }
  0x8f   : > { %406 = vmatpush1.bf16.msra.mxu0 %v370_v28 }
  0x90   : > { %1397 = vmatmul.mubr.msk.bf16.vlgmr.msra.gmra.mxu1 %vm377_vm3, %v1332_v27  ;;  %v577_v31 = vpop.permute.xlu0 %576  ;;  %1342 = vmatprep.subr.msk.bf16.mxu0 %vm381_vm1, %v1574_v6 }
  0x91   : > { %1401 = vmatpush3.bf16.msra.mxu1 %v485_v29  ;;  %1404 = vmatprep.mubr.msk.bf16.mxu1 %vm1492_vm0, %v1491_v0  ;;  %v585_v38 = vsel %vm582_vm4, %v577_v31, %v579_v30 }
  0x92   : > { %1340 = vmatmul.mubr.msk.bf16.vlgmr.msra.gmra.mxu0 %vm377_vm3, %v1332_v27  ;;  %1402 = vmatprep.subr.bf16.mxu1 %v1491_v0  ;;  %v573_v33 = vpop.permute.xlu1 %572  ;;  %v594_v42 = vsel %vm381_vm1, %v585_v38, 0 }
  0x93   : > { %500 = vmatpush1.bf16.msra.mxu0 %v479_v32  ;;  %519 = vmatprep.mubr.bf16.mxu0 %v1494_v5 }
  0x94   : > { %v581_v34 = vpop.permute.xlu0 %580  ;;  %501 = vmatprep.subr.bf16.mxu0 %v1564_v4 }
  0x95   : > { %1403 = vmatpush3.bf16.msra.mxu1 %v1584_v8  ;;  %v586_v35 = vsel %vm582_vm4, %v579_v30, %v581_v34  ;;  %v600_v37 = vsel %vm381_vm1, %v581_v34, 0 }
  0x96   : > { %1408 = vmatprep.subr.bf16.mxu1 %v1491_v0  ;;  %v571_v39 = vpop.permute.xlu1 %570 }
  0x97   : > { %502 = vmatpush1.bf16.msra.mxu0 %v1580_v7  ;;  %v583_v46 = vsel %vm582_vm4, %v571_v39, %v573_v33  ;;  %v1049_v39 = vlaneseq }
  0x98   : > { %1405 = vmatmul.mubr.msk.bf16.vlgmr.msra.gmra.mxu1 %vm377_vm3, %v327_v36  ;;  %1346 = vmatprep.subr.msk.bf16.mxu0 %vm381_vm1, %v586_v35  ;;  %v575_v40 = vpop.permute.xlu0 %574 }
  0x99   : > { %1409 = vmatpush3.bf16.msra.mxu1 %v600_v37  ;;  %v584_v41 = vsel %vm582_vm4, %v573_v33, %v575_v40  ;;  %1412 = vmatprep.mubr.msk.bf16.mxu1 %vm1492_vm0, %v1491_v0 }
  0x9a   : > { %1343 = vmatmul.mubr.msk.bf16.vlgmr.msra.gmra.mxu0 %vm377_vm3, %v327_v36  ;;  %1410 = vmatprep.subr.bf16.mxu1 %v1491_v0  ;;  %v824_v43 = vpop.permute.xlu1 %823 }
  0x9b   : > { %615 = vmatpush1.bf16.msra.mxu0 %v594_v42  ;;  %634 = vmatprep.mubr.bf16.mxu0 %v1494_v5 }
  0x9c   : > { %616 = vmatprep.subr.bf16.mxu0 %v584_v41  ;;  %v822_v44 = vpop.permute.xlu0 %821 }
  0x9d   : > { %1411 = vmatpush3.bf16.msra.mxu1 %v575_v40  ;;  %v829_v54 = vsel %vm369_vm2, %v822_v44, %v824_v43  ;;  %v1050_v44 = vshrl.u32 %v1049_v39, 7 }
  0x9e   : > { %1416 = vmatprep.subr.bf16.mxu1 %v1491_v0  ;;  %v818_v48 = vpop.permute.xlu1 %817  ;;  %v838_v59 = vsel %vm381_vm1, %v829_v54, 0 }
  0x9f   : > { %617 = vmatpush1.bf16.msra.mxu0 %v583_v46 }
  0xa0   : > { %1413 = vmatmul.mubr.msk.bf16.vlgmr.msra.gmra.mxu1 %vm377_vm3, %v1345_v45  ;;  %v826_v49 = vpop.permute.xlu0 %825  ;;  %1355 = vmatprep.subr.msk.bf16.mxu0 %vm381_vm1, %v1596_v10  ;;  %v1362_v10 = vld [vmem:[%s1764_s3 + $0x8] sm:$0xf] }
  0xa1   : > { %1417 = vmatpush3.bf16.msra.mxu1 %v727_v47  ;;  %1420 = vmatprep.mubr.msk.bf16.mxu1 %vm1492_vm0, %v1491_v0  ;;  %v830_v55 = vsel %vm369_vm2, %v824_v43, %v826_v49  ;;  %v844_v57 = vsel %vm381_vm1, %v826_v49, 0 }
  0xa2   : > { %1347 = vmatmul.mubr.msk.bf16.vlgmr.msra.gmra.mxu0 %vm377_vm3, %v1345_v45  ;;  %1418 = vmatprep.subr.bf16.mxu1 %v1491_v0  ;;  %v816_v51 = vpop.permute.xlu1 %815 }
  0xa3   : > { %742 = vmatpush1.bf16.msra.mxu0 %v721_v50  ;;  %761 = vmatprep.mubr.bf16.mxu0 %v1494_v5  ;;  %v827_v2 = vsel %vm369_vm2, %v816_v51, %v818_v48 }
  0xa4   : > { %v820_v52 = vpop.permute.xlu0 %819  ;;  %743 = vmatprep.subr.bf16.mxu0 %v1604_v12 }
  0xa5   : > { %1419 = vmatpush3.bf16.msra.mxu1 %v1619_v15  ;;  %v828_v60 = vsel %vm369_vm2, %v818_v48, %v820_v52 }
  0xa6   : > { %1424 = vmatprep.subr.bf16.mxu1 %v1491_v0  ;;  %v941_v56 = vpop.permute.xlu1 %940 }
  0xa7   : > { %744 = vmatpush1.bf16.msra.mxu0 %v1614_v14 }
  0xa8   : > { %1421 = vmatmul.mubr.msk.bf16.vlgmr.msra.gmra.mxu1 %vm377_vm3, %v686_v53  ;;  %1359 = vmatprep.subr.msk.bf16.mxu0 %vm381_vm1, %v830_v55  ;;  %v939_v58 = vpop.permute.xlu0 %938 }
  0xa9   : > { %1425 = vmatpush3.bf16.msra.mxu1 %v844_v57  ;;  %1428 = vmatprep.mubr.msk.bf16.mxu1 %vm1492_vm0, %v1491_v0  ;;  %v946_v4 = vsel %vm582_vm4, %v939_v58, %v941_v56  ;;  %v1051_v57 = vsub.s32 0, %v1050_v44 }
  0xaa   : > { %1356 = vmatmul.mubr.msk.bf16.vlgmr.msra.gmra.mxu0 %vm377_vm3, %v686_v53  ;;  %1426 = vmatprep.subr.bf16.mxu1 %v1491_v0  ;;  %v935_v63 = vpop.permute.xlu1 %934  ;;  %v955_v8 = vsel %vm381_vm1, %v946_v4, 0 }
  0xab   : > { %859 = vmatpush1.bf16.msra.mxu0 %v838_v59  ;;  %878 = vmatprep.mubr.bf16.mxu0 %v1494_v5 }
  0xac   : > { %860 = vmatprep.subr.bf16.mxu0 %v828_v60  ;;  %v943_v61 = vpop.permute.xlu0 %942 }
  0xad   : > { %1427 = vmatpush3.bf16.msra.mxu1 %v820_v52  ;;  %v947_v62 = vsel %vm582_vm4, %v941_v56, %v943_v61  ;;  %v961_v3 = vsel %vm381_vm1, %v943_v61, 0  ;;  %v1059_v52 = vsub.s32 2, %v1050_v44  ;;  %v1047_v56 = vld [vmem:[%s1768_s7] sm:$0x7] }
  0xae   : > { %1432 = vmatprep.subr.bf16.mxu1 %v1491_v0  ;;  %v933_v9 = vpop.permute.xlu1 %932 }
  0xaf   : > { %861 = vmatpush1.bf16.msra.mxu0 %v827_v2  ;;  %v944_v11 = vsel %vm582_vm4, %v933_v9, %v935_v63 }
  0xb0   : > { %1429 = vmatmul.mubr.msk.bf16.vlgmr.msra.gmra.mxu1 %vm377_vm3, %v1358_v1  ;;  %1363 = vmatprep.subr.msk.bf16.mxu0 %vm381_vm1, %v947_v62  ;;  %v937_v6 = vpop.permute.xlu0 %936 }
  0xb1   : > { %1433 = vmatpush3.bf16.msra.mxu1 %v961_v3  ;;  %v945_v7 = vsel %vm582_vm4, %v935_v63, %v937_v6  ;;  %1436 = vmatprep.mubr.msk.bf16.mxu1 %vm1492_vm0, %v1491_v0  ;;  %v1055_v63 = vsub.s32 1, %v1050_v44  ;;  %v1060_v3 = vrot.slane %v1047_v56, %v1059_v52 }
  0xb2   : > { %1360 = vmatmul.mubr.msk.bf16.vlgmr.msra.gmra.mxu0 %vm377_vm3, %v1358_v1  ;;  %1434 = vmatprep.subr.bf16.mxu1 %v1491_v0 }
  0xb3   : > { %976 = vmatpush1.bf16.msra.mxu0 %v955_v8  ;;  %995 = vmatprep.mubr.bf16.mxu0 %v1494_v5  ;;  %v1052_v8 = vrot.slane %v1047_v56, %v1051_v57 }
  0xb4   : > { %977 = vmatprep.subr.bf16.mxu0 %v945_v7 }
  0xb5   : > { %1435 = vmatpush3.bf16.msra.mxu1 %v937_v6 }
  0xb6   : > { %1445 = vmatprep.subr.mxu1 %v1491_v0 }
  0xb7   : > { %978 = vmatpush1.bf16.msra.mxu0 %v944_v11 }
  0xb8   : > { %1437 = vmatmul.mubr.msk.bf16.vlgmr.msra.gmra.mxu1 %vm377_vm3, %v1362_v10  ;;  %1440 = vmatprep.subr.mxu0 %v1491_v0 }
  0xb9   : > { %1447 = vmatprep.mubr.msk.f32.mxu1 %vm1492_vm0, %v1491_v0 }
  0xba   : > { %1364 = vmatmul.mubr.msk.bf16.vlgmr.msra.gmra.mxu0 %vm377_vm3, %v1362_v10 }
  0xbb   : > { %1442 = vmatprep.mubr.msk.f32.mxu0 %vm1492_vm0, %v1491_v0 }
 0x150   : > { %v466_v5 = vpop.f32.mrf.mxu1 }
 0x152   : > { %v425_v12 = vpop.f32.mrf.mxu0  ;;  %v1398_v13 = vpop.f32.mrf.mxu1 }
 0x154   : > { %v427_v14 = vpop.f32.mrf.mxu0  ;;  %v469_v15 = vpop.f32.mrf.mxu1 }
 0x156   : > { %v429_v16 = vpop.f32.mrf.mxu0  ;;  %v1399_v17 = vpop.f32.mrf.mxu1 }
 0x158   : > { %v430_v18 = vpop.f32.mrf.mxu0  ;;  %v562_v19 = vpop.f32.mrf.mxu1 }
 0x159   : > { %v563_v45 = vadd.f32 %v562_v19, %v466_v5 }
 0x15a   : > { %v521_v20 = vpop.f32.mrf.mxu0  ;;  %v1406_v21 = vpop.f32.mrf.mxu1 }
 0x15b   : > { %v522_v48 = vadd.f32 %v521_v20, %v425_v12  ;;  %v1056_v12 = vrot.slane %v1047_v56, %v1055_v63 }
 0x15c   : > { %v523_v22 = vpop.f32.mrf.mxu0  ;;  %v565_v23 = vpop.f32.mrf.mxu1 }
 0x15d   : > { %v524_v53 = vadd.f32 %v523_v22, %v427_v14 }
 0x15e   : > { %v525_v24 = vpop.f32.mrf.mxu0  ;;  %v1407_v25 = vpop.f32.mrf.mxu1 }
 0x160   : > { %v526_v26 = vpop.f32.mrf.mxu0  ;;  %v677_v27 = vpop.f32.mrf.mxu1 }
 0x161   : > { %v685_v49 = vadd.f32 %v677_v27, %v563_v45 }
 0x162   : > { %v636_v28 = vpop.f32.mrf.mxu0  ;;  %v1414_v29 = vpop.f32.mrf.mxu1 }
 0x163   : > { %v683_v54 = vadd.f32 %v636_v28, %v522_v48 }
 0x164   : > { %v638_v0 = vpop.f32.mrf.mxu0  ;;  %v680_v30 = vpop.f32.mrf.mxu1 }
 0x165   : > { %v684_v60 = vadd.f32 %v638_v0, %v524_v53  ;;  %v1081_v30 = vld [vmem:[%s1767_s6] sm:$0xff] }
 0x166   : > { %v640_v31 = vpop.f32.mrf.mxu0  ;;  %v1415_v32 = vpop.f32.mrf.mxu1 }
 0x168   : > { %v641_v33 = vpop.f32.mrf.mxu0  ;;  %v804_v34 = vpop.f32.mrf.mxu1 }
 0x169   : > { %v812_v55 = vadd.f32 %v804_v34, %v685_v49 }
 0x16a   : > { %v763_v35 = vpop.f32.mrf.mxu0  ;;  %v1422_v36 = vpop.f32.mrf.mxu1 }
 0x16b   : > { %v810_v61 = vadd.f32 %v763_v35, %v683_v54 }
 0x16c   : > { %v765_v37 = vpop.f32.mrf.mxu0  ;;  %v807_v38 = vpop.f32.mrf.mxu1 }
 0x16d   : > { %v811_v4 = vadd.f32 %v765_v37, %v684_v60 }
 0x16e   : > { %v767_v40 = vpop.f32.mrf.mxu0  ;;  %v1423_v41 = vpop.f32.mrf.mxu1 }
 0x16f   : > { %v1230_v40 = vld [vmem:[%s1765_s4] sm:$0xff] }
 0x170   : > { %v768_v42 = vpop.f32.mrf.mxu0  ;;  %v921_v43 = vpop.f32.mrf.mxu1 }
 0x171   : > { %v929_v62 = vadd.f32 %v921_v43, %v812_v55  ;;  %v1232_v43 = vld [vmem:[%s1766_s5] sm:$0xff] }
 0x172   : > { %v880_v46 = vpop.f32.mrf.mxu0  ;;  %v1430_v47 = vpop.f32.mrf.mxu1 }
 0x173   : > { %v927_v6 = vadd.f32 %v880_v46, %v810_v61 }
 0x174   : > { %v882_v50 = vpop.f32.mrf.mxu0  ;;  %v924_v51 = vpop.f32.mrf.mxu1 }
 0x175   : > { %v928_v11 = vadd.f32 %v882_v50, %v811_v4 }
 0x176   : > { %v884_v58 = vpop.f32.mrf.mxu0  ;;  %v1431_v59 = vpop.f32.mrf.mxu1 }
 0x178   : > { %v885_v1 = vpop.f32.mrf.mxu0  ;;  %v1038_v2 = vpop.f32.mrf.mxu1 }
 0x179   : > { %v1046_v7 = vadd.f32 %v1038_v2, %v929_v62 }
 0x17a   : > { %v997_v9 = vpop.f32.mrf.mxu0  ;;  %v1438_v10 = vpop.f32.mrf.mxu1 }
 0x17b   : > { %v1044_v5 = vadd.f32 %v997_v9, %v927_v6  ;;  %v1066_v15 = vmul.f32 %v1060_v3, %v1046_v7 }
 0x17c   : > { %v999_v13 = vpop.f32.mrf.mxu0  ;;  %v1041_v14 = vpop.f32.mrf.mxu1 }
 0x17d   : > { %v1064_v16 = vmul.f32 %v1052_v8, %v1044_v5  ;;  %v1045_v17 = vadd.f32 %v999_v13, %v928_v11  ;;  %v1075_v22 = vmul.f32 %v1066_v15, %v1046_v7  ;;  %v1069_v26 = vsel %vm1068_vm5, %v1066_v15, 0.0 }
 0x17e   : > { %v1001_v18 = vpop.f32.mrf.mxu0  ;;  %v1439_v19 = vpop.f32.mrf.mxu1 }
 0x17f   : > { %v1065_v20 = vmul.f32 %v1056_v12, %v1045_v17  ;;  %v1073_v23 = vmul.f32 %v1064_v16, %v1044_v5  ;;  %v1077_v29 = vsel %vm1068_vm5, %v1075_v22, 0.0 }
 0x180   : > { %v1002_v21 = vpop.f32.mrf.mxu0 }
 0x181   : > { %v1074_v24 = vmul.f32 %v1065_v20, %v1045_v17  ;;  %v1067_v25 = vadd.f32 %v1065_v20, %v1064_v16 }
 0x183   : > { %v1070_v27 = vadd.f32 %v1069_v26, %v1067_v25  ;;  %v1076_v28 = vadd.f32 %v1074_v24, %v1073_v23 }
 0x185   : > { %1071 = vadd.xlane.f32.xlu0 %v1070_v27  ;;  %v1078_v0 = vadd.f32 %v1077_v29, %v1076_v28 }
 0x187   : > { %1079 = vadd.xlane.f32.xlu1 %v1078_v0 }
 0x20e   : > { %v1072_v31 = vpop.xlane.xlu0 %1071 }
 0x20f   : > { %1441 = vmatpush3.msra.mxu0 %v1072_v31 }
 0x210   : > { %v1080_v32 = vpop.xlane.xlu1 %1079  ;;  %1443 = vmatmul.mubr.msk.f32.vlgmr.msra.gmra.mxu0 %vm1082_vm6, %v1081_v30 }
 0x211   : > { %1446 = vmatpush3.msra.mxu1 %v1080_v32 }
 0x212   : > { %1448 = vmatmul.mubr.msk.f32.vlgmr.msra.gmra.mxu1 %vm1082_vm6, %v1081_v30 }
 0x2d0   : > { %v1152_v33 = vpop.f32.mrf.mxu0 }
 0x2d1   : > { %v1226_v34 = vmul.f32 %v1152_v33, %v1152_v33 }
 0x2d2   : > { %v1222_v35 = vpop.f32.mrf.mxu1  ;;  %v1444_v36 = vpop.f32.mrf.mxu0 }
 0x2d3   : > { %v1227_v37 = vsub.f32 %v1222_v35, %v1226_v34 }
 0x2d4   : > { %v1449_v38 = vpop.f32.mrf.mxu1 }
 0x2d5   : > { %v1228_v39 = vadd.f32 1e-05, %v1227_v37 }
 0x2d7   : > { %1481 = vrsqrt.f32 %v1228_v39 }
 0x2e4   : > { %v1482_v41 = vpop.eup %1481 }
 0x2e5   : > { %v1231_v42 = vmul.f32 %v1482_v41, %v1230_v40 }
 0x2e7   : > { %1237 = vperm.xlu0 %1465, %v1231_v42   ;;  %v1233_v44 = vmul.f32 %v1231_v42, %v1152_v33 }
 0x2e9   : > { %v1234_v45 = vsub.f32 %v1232_v43, %v1233_v44 }
 0x2eb   : > { %1245 = vperm.xlu1 %1466, %v1234_v45  }
 0x362   : > { %v1238_v46 = vpop.permute.xlu0 %1237 }
 0x363   : > { %v1240_v47 = vmul.f32 %v1238_v46, %v1044_v5  ;;  %v1241_v48 = vmul.f32 %v1238_v46, %v1045_v17  ;;  %v1242_v49 = vmul.f32 %v1238_v46, %v1046_v7 }
 0x366   : > { %v1246_v50 = vpop.permute.xlu1 %1245 }
 0x367   : > { %v1248_v51 = vadd.f32 %v1246_v50, %v1240_v47  ;;  %v1249_v52 = vadd.f32 %v1246_v50, %v1241_v48  ;;  %v1250_v53 = vadd.f32 %v1246_v50, %v1242_v49 }
 0x369   : > { %v1251_v54 = vmax.f32 %v1248_v51, 0.0  ;;  %v1252_v55 = vmax.f32 %v1249_v52, 0.0  ;;  %v1253_v56 = vmax.f32 %v1250_v53, 0.0 }
 0x36b   : > { %1254 = vst [vmem:[%s325_s19] sm:$0xff] %v1251_v54  ;;  %1255 = vst [vmem:[%s325_s19 + $0x8] sm:$0xff] %v1252_v55 }
 0x36c   : > { %1256 = vst.msk [vmem:[%s325_s19 + $0x10] sm:$0xff] %vm1068_vm5, %v1253_v56 }
 0x36d PF: > { %s18_s27 = sadd.s32 1, %s1489_s27  }
 0x36e   : > { %p15_p4 = scmp.ge.s32.totalorder %s18_s27, 4  }
 0x370   :  { %17 = sbr.rel (!%p15_p4) target bundleno = 1 (0x1), region = 89 }

</bundles_post_ra>
